<compile_context>
chip_gen: v6e
topology: v6e:2x2x1
jax: 0.10.0
libtpu: 0.0.40
codegen_flags: <defaults>
</compile_context>

<pallas_src>
import math
import functools

import jax
import jax.numpy as jnp
from jax.experimental import pallas as pl
from jax.experimental.pallas import tpu as pltpu


_VMEM_LIMIT_BYTES = 48 * 1024 * 1024   # > default scoped, < v7x 64 MiB physical


# --------------------------------------------------------------- helpers ---

def _pick_row_tile(h1, w1, target_m=512):
    """Smallest divisor of h1 whose row tile gives a matmul M >= target_m."""
    for d in range(1, h1 + 1):
        if h1 % d == 0 and d * w1 >= target_m:
            return d
    return h1


def _store_padded(pad_ref, interior, p):
    """Write `interior` into pad_ref leaving a zero halo of width p.

    Only the halo strips are zeroed (perimeter, not the full area).
    """
    hp, wp, c = pad_ref.shape
    h = hp - 2 * p
    w = wp - 2 * p
    dt = pad_ref.dtype
    if p > 0:
        pad_ref[0:p, :, :] = jnp.zeros((p, wp, c), dt)
        pad_ref[hp - p:hp, :, :] = jnp.zeros((p, wp, c), dt)
        pad_ref[:, 0:p, :] = jnp.zeros((hp, p, c), dt)
        pad_ref[:, wp - p:wp, :] = jnp.zeros((hp, p, c), dt)
    pad_ref[p:p + h, p:p + w, :] = interior.astype(dt)


def _conv3x3_rows(pad_ref, w_ref, r0, rows, wout, stride):
    """Row tile of a 3x3 conv as 9 shifted-window matmuls (no im2col patch).

    pad_ref : (hp, wp, cin) f32 VMEM ref, zero halo already in place
    w_ref   : (9, cin, cout) bf16 VMEM ref, tap index t = ky*3 + kx
    r0      : first padded input row of this output-row tile (= out_row0*stride)
    returns : (rows*wout, cout) f32 accumulator
    """
    cin = pad_ref.shape[-1]
    acc = None
    for t in range(9):
        ky, kx = t // 3, t % 3
        if stride == 1:
            tap = pad_ref[pl.ds(r0 + ky, rows), kx:kx + wout, :]
        else:
            tap = pad_ref[pl.ds(r0 + ky, rows, stride=stride),
                          pl.ds(kx, wout, stride=stride), :]
        lhs = tap.reshape(rows * wout, cin).astype(jnp.bfloat16)
        part = jnp.dot(lhs, w_ref[t], preferred_element_type=jnp.float32)
        acc = part if acc is None else acc + part
    return acc


# ----------------------------------------------------------------- forward --

def residual_conv_forward(x_nchw, params, *, stride=1, padding=1,
                          training=True, eps=1e-5, row_tile=None):
    """Pallas forward.  x_nchw: (N, Cin, H, W) f32 -> (N, Cout, H1, W1) f32."""
    x = jnp.transpose(x_nchw, (0, 2, 3, 1)).astype(jnp.float32)   # NCHW -> NHWC
    N, H, W, Cin = x.shape
    Cout = params["w1"].shape[0]

    H1 = (H + 2 * padding - 3) // stride + 1
    W1 = (W + 2 * padding - 3) // stride + 1
    Hs = (H + 2 - 3) // stride + 1
    Ws = (W + 2 - 3) // stride + 1
    assert (H1, W1) == (Hs, Ws), (
        "conv_block / conv_skip spatial outputs must match for the residual add")

    th = row_tile if row_tile is not None else _pick_row_tile(H1, W1)
    if H1 % th != 0:
        th = H1
    R = H1 // th

    f32, bf16 = jnp.float32, jnp.bfloat16

    def repack_w(wt):                  # (Cout,Cin,3,3) -> (9, Cin, Cout) bf16
        co, ci = wt.shape[0], wt.shape[1]
        return jnp.transpose(wt, (2, 3, 1, 0)).reshape(9, ci, co).astype(bf16)

    w1r = repack_w(params["w1"])
    wsr = repack_w(params["ws"])
    w2r = repack_w(params["w2"])

    # ---- BN1 folded to per-channel scale/shift (batch stats in training mode)
    if training:
        mu1 = jnp.mean(x, axis=(0, 1, 2))
        var1 = jnp.var(x, axis=(0, 1, 2))
    else:
        mu1, var1 = params["bn1_m"], params["bn1_v"]
    scale1 = params["bn1_g"] * jax.lax.rsqrt(var1 + eps)
    shift1 = params["bn1_b"] - mu1 * scale1
    bn1p = jnp.stack([scale1, shift1]).astype(f32)                 # (2, Cin)

    # ---------------------------------------------------- kernel A ----------
    # per (sample, row tile): a1 = relu(BN1(x)); c1 = conv1(a1) (no bias);
    #                         cs = conv_skip(x)  (no bias);
    #                         + per-sample f32 sum / sumsq of c1, cs.
    def kernel_a(x_ref, bn1_ref, w1_ref, ws_ref, c1_ref, cs_ref, st_ref,
                 xpad_ref, a1pad_ref):
        r = pl.program_id(1)

        @pl.when(r == 0)
        def _():
            xf = x_ref[...]                                   # (H, W, Cin) f32
            _store_padded(xpad_ref, xf, 1)
            scale = bn1_ref[0:1, :].reshape(1, 1, Cin)
            shift = bn1_ref[1:2, :].reshape(1, 1, Cin)
            _store_padded(a1pad_ref, jnp.maximum(xf * scale + shift, 0.0),
                          padding)
            st_ref[...] = jnp.zeros_like(st_ref)

        r0 = r * (th * stride)
        c1 = _conv3x3_rows(a1pad_ref, w1_ref, r0, th, W1, stride)  # (th*W1,Cout)
        cs = _conv3x3_rows(xpad_ref, ws_ref, r0, th, W1, stride)

        c1_ref[...] = c1.reshape(th, W1, Cout).astype(c1_ref.dtype)
        cs_ref[...] = cs.reshape(th, W1, Cout).astype(cs_ref.dtype)

        # f32 batch-norm statistics (computed before the bf16 round of c1/cs).
        st_ref[0:1, :] += jnp.sum(c1, axis=0, keepdims=True)
        st_ref[1:2, :] += jnp.sum(c1 * c1, axis=0, keepdims=True)
        st_ref[2:3, :] += jnp.sum(cs, axis=0, keepdims=True)
        st_ref[3:4, :] += jnp.sum(cs * cs, axis=0, keepdims=True)

    flops_a = 2 * (2 * N * H1 * W1 * 9 * Cin * Cout)
    bytes_a = (N * H * W * Cin * 4 + 2 * N * H1 * W1 * Cout * 2
               + N * 4 * Cout * 4 + 2 * 9 * Cin * Cout * 2 + 2 * Cin * 4)

    grid_a = pltpu.PrefetchScalarGridSpec(
        num_scalar_prefetch=0,
        grid=(N, R),
        in_specs=[
            pl.BlockSpec((None, H, W, Cin), lambda n, r: (n, 0, 0, 0)),
            pl.BlockSpec((2, Cin), lambda n, r: (0, 0)),
            pl.BlockSpec((9, Cin, Cout), lambda n, r: (0, 0, 0)),
            pl.BlockSpec((9, Cin, Cout), lambda n, r: (0, 0, 0)),
        ],
        out_specs=(
            pl.BlockSpec((None, th, W1, Cout), lambda n, r: (n, r, 0, 0)),
            pl.BlockSpec((None, th, W1, Cout), lambda n, r: (n, r, 0, 0)),
            pl.BlockSpec((None, 4, Cout), lambda n, r: (n, 0, 0)),
        ),
        scratch_shapes=[
            pltpu.VMEM((H + 2, W + 2, Cin), f32),                      # xpad
            pltpu.VMEM((H + 2 * padding, W + 2 * padding, Cin), f32),  # a1pad
        ],
    )
    c1, cs, stats = pl.pallas_call(
        kernel_a,
        out_shape=(jax.ShapeDtypeStruct((N, H1, W1, Cout), bf16),
                   jax.ShapeDtypeStruct((N, H1, W1, Cout), bf16),
                   jax.ShapeDtypeStruct((N, 4, Cout), f32)),
        grid_spec=grid_a,
        compiler_params=pltpu.CompilerParams(
            dimension_semantics=("parallel", "arbitrary"),
            vmem_limit_bytes=_VMEM_LIMIT_BYTES),
        cost_estimate=pl.CostEstimate(flops=flops_a, transcendentals=0,
                                      bytes_accessed=bytes_a),
    )(x, bn1p, w1r, wsr)

    # ---- BN2 / BN_skip folded params.  Conv biases b1/bs fold in exactly:
    # training mode -> a batch-stat BN cancels per-channel constants;
    # eval mode     -> bias is folded into the shift analytically.
    if training:
        cnt = float(N * H1 * W1)
        tot = jnp.sum(stats, axis=0)                           # (4, Cout) f32
        mu2 = tot[0] / cnt
        var2 = jnp.maximum(tot[1] / cnt - mu2 * mu2, 0.0)
        mus = tot[2] / cnt
        vars_ = jnp.maximum(tot[3] / cnt - mus * mus, 0.0)
        scale2 = params["bn2_g"] * jax.lax.rsqrt(var2 + eps)
        shift2 = params["bn2_b"] - mu2 * scale2
        scale_s = params["bns_g"] * jax.lax.rsqrt(vars_ + eps)
        shift_s = params["bns_b"] - mus * scale_s
    else:
        scale2 = params["bn2_g"] * jax.lax.rsqrt(params["bn2_v"] + eps)
        shift2 = params["bn2_b"] + scale2 * (params["b1"] - params["bn2_m"])
        scale_s = params["bns_g"] * jax.lax.rsqrt(params["bns_v"] + eps)
        shift_s = params["bns_b"] + scale_s * (params["bs"] - params["bns_m"])
    bn2p = jnp.stack([scale2, shift2, scale_s, shift_s,
                      params["b2"].astype(f32)]).astype(f32)       # (5, Cout)

    # ---------------------------------------------------- kernel B ----------
    # per (sample, row tile): out = conv2(relu(BN2(c1))) + b2 + BNs(cs)
    def kernel_b(c1_ref, cs_ref, bnp_ref, w2_ref, o_ref, a2pad_ref):
        r = pl.program_id(1)
        s2 = bnp_ref[0:1, :].reshape(1, 1, Cout)
        t2 = bnp_ref[1:2, :].reshape(1, 1, Cout)
        ss = bnp_ref[2:3, :].reshape(1, 1, Cout)
        ts = bnp_ref[3:4, :].reshape(1, 1, Cout)
        b2 = bnp_ref[4:5, :].reshape(1, 1, Cout)

        @pl.when(r == 0)
        def _():
            a2 = jnp.maximum(c1_ref[...].astype(jnp.float32) * s2 + t2, 0.0)
            _store_padded(a2pad_ref, a2, 1)

        r0 = r * th
        c2 = _conv3x3_rows(a2pad_ref, w2_ref, r0, th, W1, 1)       # (th*W1,Cout)
        skip = cs_ref[pl.ds(r0, th), :, :].astype(jnp.float32) * ss + ts
        o_ref[...] = (c2.reshape(th, W1, Cout) + b2 + skip).astype(o_ref.dtype)

    flops_b = 2 * N * H1 * W1 * 9 * Cout * Cout
    bytes_b = (2 * N * H1 * W1 * Cout * 2 + N * H1 * W1 * Cout * 4
               + 9 * Cout * Cout * 2 + 5 * Cout * 4)

    grid_b = pltpu.PrefetchScalarGridSpec(
        num_scalar_prefetch=0,
        grid=(N, R),
        in_specs=[
            pl.BlockSpec((None, H1, W1, Cout), lambda n, r: (n, 0, 0, 0)),
            pl.BlockSpec((None, H1, W1, Cout), lambda n, r: (n, 0, 0, 0)),
            pl.BlockSpec((5, Cout), lambda n, r: (0, 0)),
            pl.BlockSpec((9, Cout, Cout), lambda n, r: (0, 0, 0)),
        ],
        out_specs=pl.BlockSpec((None, th, W1, Cout), lambda n, r: (n, r, 0, 0)),
        scratch_shapes=[pltpu.VMEM((H1 + 2, W1 + 2, Cout), f32)],  # a2pad
    )
    out_nhwc = pl.pallas_call(
        kernel_b,
        out_shape=jax.ShapeDtypeStruct((N, H1, W1, Cout), f32),
        grid_spec=grid_b,
        compiler_params=pltpu.CompilerParams(
            dimension_semantics=("parallel", "arbitrary"),
            vmem_limit_bytes=_VMEM_LIMIT_BYTES),
        cost_estimate=pl.CostEstimate(flops=flops_b, transcendentals=0,
                                      bytes_accessed=bytes_b),
    )(c1, cs, bn2p, w2r)

    return jnp.transpose(out_nhwc, (0, 3, 1, 2))   # NHWC -> NCHW


# ------------------------------------------------------------ pure-JAX ref ---
# Mirrors PyTorch semantics (conv biases included, BN over biased outputs).
# Conv operands are cast to bf16 with f32 accumulation so the comparison uses
# the same MXU precision policy as the kernel.

def residual_conv_reference(x_nchw, params, *, stride=1, padding=1,
                            training=True, eps=1e-5):
    x = jnp.transpose(x_nchw, (0, 2, 3, 1)).astype(jnp.float32)

    def bn(t, g, b, m, v):
        if training:
            mu = jnp.mean(t, axis=(0, 1, 2))
            var = jnp.var(t, axis=(0, 1, 2))
        else:
            mu, var = m, v
        return (t - mu) * jax.lax.rsqrt(var + eps) * g + b

    def conv(t, w, b, s, p):
        w_hwio = jnp.transpose(w, (2, 3, 1, 0)).astype(jnp.bfloat16)
        y = jax.lax.conv_general_dilated(
            t.astype(jnp.bfloat16), w_hwio, window_strides=(s, s),
            padding=[(p, p), (p, p)],
            dimension_numbers=("NHWC", "HWIO", "NHWC"),
            preferred_element_type=jnp.float32)
        return y + b

    a = jnp.maximum(bn(x, params["bn1_g"], params["bn1_b"],
                       params["bn1_m"], params["bn1_v"]), 0.0)
    a = conv(a, params["w1"], params["b1"], stride, padding)
    a = jnp.maximum(bn(a, params["bn2_g"], params["bn2_b"],
                       params["bn2_m"], params["bn2_v"]), 0.0)
    a = conv(a, params["w2"], params["b2"], 1, 1)

    s_ = conv(x, params["ws"], params["bs"], stride, 1)
    s_ = bn(s_, params["bns_g"], params["bns_b"],
            params["bns_m"], params["bns_v"])

    return jnp.transpose(a + s_, (0, 3, 1, 2))


# --------------------------------------------------------------- parameters --

def init_params(key, cin, cout):
    keys = jax.random.split(key, 16)
    uni = lambda k, shp, b: jax.random.uniform(k, shp, jnp.float32, -b, b)
    bw1 = 1.0 / math.sqrt(cin * 9)
    bw2 = 1.0 / math.sqrt(cout * 9)
    return {
        "bn1_g": jax.random.uniform(keys[0], (cin,), jnp.float32, 0.5, 1.5),
        "bn1_b": uni(keys[1], (cin,), 0.1),
        "bn1_m": uni(keys[2], (cin,), 0.5),
        "bn1_v": jax.random.uniform(keys[3], (cin,), jnp.float32, 0.5, 1.5),
        "w1": uni(keys[4], (cout, cin, 3, 3), bw1),
        "b1": uni(keys[5], (cout,), bw1),
        "bn2_g": jax.random.uniform(keys[6], (cout,), jnp.float32, 0.5, 1.5),
        "bn2_b": uni(keys[7], (cout,), 0.1),
        "bn2_m": uni(keys[8], (cout,), 0.5),
        "bn2_v": jax.random.uniform(keys[9], (cout,), jnp.float32, 0.5, 1.5),
        "w2": uni(keys[10], (cout, cout, 3, 3), bw2),
        "b2": uni(keys[11], (cout,), bw2),
        "ws": uni(keys[12], (cout, cin, 3, 3), bw1),
        "bs": uni(keys[13], (cout,), bw1),
        "bns_g": jax.random.uniform(keys[14], (cout,), jnp.float32, 0.5, 1.5),
        "bns_b": uni(keys[15], (cout,), 0.1),
        "bns_m": jnp.zeros((cout,), jnp.float32),
        "bns_v": jnp.ones((cout,), jnp.float32),
    }


# --------------------------------------------------------------------- main --

if __name__ == "__main__":
    key = jax.random.PRNGKey(0)
    kx, kp = jax.random.split(key)

    N, Cin, Cout, H, W = 2, 4, 8, 16, 16
    stride, padding = 1, 1

    x = jax.random.normal(kx, (N, Cin, H, W), jnp.float32)
    params = init_params(kp, Cin, Cout)

    # row_tile=8 -> 2 row tiles per sample, exercising the row-tiled grid path.
    fwd = jax.jit(functools.partial(residual_conv_forward, stride=stride,
                                    padding=padding, row_tile=8))
    out = jax.block_until_ready(fwd(x, params))

    ref = residual_conv_reference(x, params, stride=stride, padding=padding)
    assert out.shape == ref.shape, (out.shape, ref.shape)
    err = float(jnp.max(jnp.abs(out - ref)))
    # Tolerance accounts for bf16 storage of the c1/cs intermediates and bf16
    # MXU operands (BN statistics themselves are kept in f32 inside kernel A).
    if err > 5e-2:
        raise AssertionError(f"kernel/reference mismatch, max abs err = {err}")

    print("KERNEL_OK")
</pallas_src>

<mosaic_0001>
module attributes {stable_mosaic.version = 11 : i64} {
  func.func @kernel_a(%arg0: i32, %arg1: i32, %arg2: memref<1x16x16x4xf32, #tpu.memory_space<vmem>>, %arg3: memref<2x4xf32, #tpu.memory_space<vmem>>, %arg4: memref<9x4x8xbf16, #tpu.memory_space<vmem>>, %arg5: memref<9x4x8xbf16, #tpu.memory_space<vmem>>, %arg6: memref<1x8x16x8xbf16, #tpu.memory_space<vmem>>, %arg7: memref<1x8x16x8xbf16, #tpu.memory_space<vmem>>, %arg8: memref<1x4x8xf32, #tpu.memory_space<vmem>>, %arg9: memref<18x18x4xf32, #tpu.memory_space<vmem>>, %arg10: memref<18x18x4xf32, #tpu.memory_space<vmem>>) attributes {dimension_semantics = [#tpu.dimension_semantics<parallel>, #tpu.dimension_semantics<arbitrary>], iteration_bounds = array<i64: 2, 2>, scalar_prefetch = 0 : i64, scratch_operands = 2 : i64, tpu.core_type = #tpu.core_type<tc>, window_params = [{transform_indices = @transform_0, window_bounds = array<i64: 1, 16, 16, 4>}, {pipeline_mode = #tpu.pipeline_mode<synchronous>, transform_indices = @transform_1, window_bounds = array<i64: 2, 4>}, {pipeline_mode = #tpu.pipeline_mode<synchronous>, transform_indices = @transform_2, window_bounds = array<i64: 9, 4, 8>}, {pipeline_mode = #tpu.pipeline_mode<synchronous>, transform_indices = @transform_3, window_bounds = array<i64: 9, 4, 8>}, {transform_indices = @transform_4, window_bounds = array<i64: 1, 8, 16, 8>}, {transform_indices = @transform_5, window_bounds = array<i64: 1, 8, 16, 8>}, {transform_indices = @transform_6, window_bounds = array<i64: 1, 4, 8>}]} {
    %c0_i32 = arith.constant 0 : i32
    %0 = arith.cmpi eq, %arg1, %c0_i32 : i32
    %1 = arith.extui %0 : i1 to i32
    %c0_i32_0 = arith.constant 0 : i32
    %2 = arith.cmpi ne, %1, %c0_i32_0 : i32
    scf.if %2 {
      %c0_151 = arith.constant 0 : index
      %c0_152 = arith.constant 0 : index
      %c0_153 = arith.constant 0 : index
      %c0_154 = arith.constant 0 : index
      %208 = vector.load %arg2[%c0_151, %c0_152, %c0_153, %c0_154] : memref<1x16x16x4xf32, #tpu.memory_space<vmem>>, vector<1x16x16x4xf32>
      %209 = vector.shape_cast %208 : vector<1x16x16x4xf32> to vector<16x16x4xf32>
      %cst_155 = arith.constant 0.000000e+00 : f32
      %210 = vector.broadcast %cst_155 : f32 to vector<1x18x4xf32>
      %c0_156 = arith.constant 0 : index
      %c0_157 = arith.constant 0 : index
      %c0_158 = arith.constant 0 : index
      %211 = vector.load %arg9[%c0_156, %c0_157, %c0_158] : memref<18x18x4xf32, #tpu.memory_space<vmem>>, vector<1x18x4xf32>
      tpu.vector_store %arg9[%c0_156, %c0_157, %c0_158], %210 {strides = array<i32>} : memref<18x18x4xf32, #tpu.memory_space<vmem>>, vector<1x18x4xf32>,
      %cst_159 = arith.constant 0.000000e+00 : f32
      %212 = vector.broadcast %cst_159 : f32 to vector<1x18x4xf32>
      %c17 = arith.constant 17 : index
      %c0_160 = arith.constant 0 : index
      %c0_161 = arith.constant 0 : index
      %213 = vector.load %arg9[%c17, %c0_160, %c0_161] : memref<18x18x4xf32, #tpu.memory_space<vmem>>, vector<1x18x4xf32>
      tpu.vector_store %arg9[%c17, %c0_160, %c0_161], %212 {strides = array<i32>} : memref<18x18x4xf32, #tpu.memory_space<vmem>>, vector<1x18x4xf32>,
      %cst_162 = arith.constant 0.000000e+00 : f32
      %214 = vector.broadcast %cst_162 : f32 to vector<18x1x4xf32>
      %c0_163 = arith.constant 0 : index
      %c0_164 = arith.constant 0 : index
      %c0_165 = arith.constant 0 : index
      %215 = vector.load %arg9[%c0_163, %c0_164, %c0_165] : memref<18x18x4xf32, #tpu.memory_space<vmem>>, vector<18x1x4xf32>
      tpu.vector_store %arg9[%c0_163, %c0_164, %c0_165], %214 {strides = array<i32>} : memref<18x18x4xf32, #tpu.memory_space<vmem>>, vector<18x1x4xf32>,
      %cst_166 = arith.constant 0.000000e+00 : f32
      %216 = vector.broadcast %cst_166 : f32 to vector<18x1x4xf32>
      %c0_167 = arith.constant 0 : index
      %c17_168 = arith.constant 17 : index
      %c0_169 = arith.constant 0 : index
      %217 = vector.load %arg9[%c0_167, %c17_168, %c0_169] : memref<18x18x4xf32, #tpu.memory_space<vmem>>, vector<18x1x4xf32>
      tpu.vector_store %arg9[%c0_167, %c17_168, %c0_169], %216 {strides = array<i32>} : memref<18x18x4xf32, #tpu.memory_space<vmem>>, vector<18x1x4xf32>,
      %c1_170 = arith.constant 1 : index
      %c1_171 = arith.constant 1 : index
      %c0_172 = arith.constant 0 : index
      %218 = vector.load %arg9[%c1_170, %c1_171, %c0_172] : memref<18x18x4xf32, #tpu.memory_space<vmem>>, vector<16x16x4xf32>
      tpu.vector_store %arg9[%c1_170, %c1_171, %c0_172], %209 {strides = array<i32>} : memref<18x18x4xf32, #tpu.memory_space<vmem>>, vector<16x16x4xf32>,
      %c0_173 = arith.constant 0 : index
      %c0_174 = arith.constant 0 : index
      %219 = vector.load %arg3[%c0_173, %c0_174] : memref<2x4xf32, #tpu.memory_space<vmem>>, vector<1x4xf32>
      %220 = vector.shape_cast %219 : vector<1x4xf32> to vector<1x1x4xf32>
      %c1_175 = arith.constant 1 : index
      %c0_176 = arith.constant 0 : index
      %221 = vector.load %arg3[%c1_175, %c0_176] : memref<2x4xf32, #tpu.memory_space<vmem>>, vector<1x4xf32>
      %222 = vector.shape_cast %221 : vector<1x4xf32> to vector<1x1x4xf32>
      %223 = vector.broadcast %220 : vector<1x1x4xf32> to vector<16x16x4xf32>
      %224 = arith.mulf %209, %223 : vector<16x16x4xf32>
      %225 = vector.broadcast %222 : vector<1x1x4xf32> to vector<16x16x4xf32>
      %226 = arith.addf %224, %225 : vector<16x16x4xf32>
      %cst_177 = arith.constant 0.000000e+00 : f32
      %227 = vector.broadcast %cst_177 : f32 to vector<16x16x4xf32>
      %228 = arith.maximumf %226, %227 : vector<16x16x4xf32>
      %cst_178 = arith.constant 0.000000e+00 : f32
      %229 = vector.broadcast %cst_178 : f32 to vector<1x18x4xf32>
      %c0_179 = arith.constant 0 : index
      %c0_180 = arith.constant 0 : index
      %c0_181 = arith.constant 0 : index
      %230 = vector.load %arg10[%c0_179, %c0_180, %c0_181] : memref<18x18x4xf32, #tpu.memory_space<vmem>>, vector<1x18x4xf32>
      tpu.vector_store %arg10[%c0_179, %c0_180, %c0_181], %229 {strides = array<i32>} : memref<18x18x4xf32, #tpu.memory_space<vmem>>, vector<1x18x4xf32>,
      %cst_182 = arith.constant 0.000000e+00 : f32
      %231 = vector.broadcast %cst_182 : f32 to vector<1x18x4xf32>
      %c17_183 = arith.constant 17 : index
      %c0_184 = arith.constant 0 : index
      %c0_185 = arith.constant 0 : index
      %232 = vector.load %arg10[%c17_183, %c0_184, %c0_185] : memref<18x18x4xf32, #tpu.memory_space<vmem>>, vector<1x18x4xf32>
      tpu.vector_store %arg10[%c17_183, %c0_184, %c0_185], %231 {strides = array<i32>} : memref<18x18x4xf32, #tpu.memory_space<vmem>>, vector<1x18x4xf32>,
      %cst_186 = arith.constant 0.000000e+00 : f32
      %233 = vector.broadcast %cst_186 : f32 to vector<18x1x4xf32>
      %c0_187 = arith.constant 0 : index
      %c0_188 = arith.constant 0 : index
      %c0_189 = arith.constant 0 : index
      %234 = vector.load %arg10[%c0_187, %c0_188, %c0_189] : memref<18x18x4xf32, #tpu.memory_space<vmem>>, vector<18x1x4xf32>
      tpu.vector_store %arg10[%c0_187, %c0_188, %c0_189], %233 {strides = array<i32>} : memref<18x18x4xf32, #tpu.memory_space<vmem>>, vector<18x1x4xf32>,
      %cst_190 = arith.constant 0.000000e+00 : f32
      %235 = vector.broadcast %cst_190 : f32 to vector<18x1x4xf32>
      %c0_191 = arith.constant 0 : index
      %c17_192 = arith.constant 17 : index
      %c0_193 = arith.constant 0 : index
      %236 = vector.load %arg10[%c0_191, %c17_192, %c0_193] : memref<18x18x4xf32, #tpu.memory_space<vmem>>, vector<18x1x4xf32>
      tpu.vector_store %arg10[%c0_191, %c17_192, %c0_193], %235 {strides = array<i32>} : memref<18x18x4xf32, #tpu.memory_space<vmem>>, vector<18x1x4xf32>,
      %c1_194 = arith.constant 1 : index
      %c1_195 = arith.constant 1 : index
      %c0_196 = arith.constant 0 : index
      %237 = vector.load %arg10[%c1_194, %c1_195, %c0_196] : memref<18x18x4xf32, #tpu.memory_space<vmem>>, vector<16x16x4xf32>
      tpu.vector_store %arg10[%c1_194, %c1_195, %c0_196], %228 {strides = array<i32>} : memref<18x18x4xf32, #tpu.memory_space<vmem>>, vector<16x16x4xf32>,
      %cst_197 = arith.constant 0.000000e+00 : f32
      %238 = vector.broadcast %cst_197 : f32 to vector<4x8xf32>
      %c0_198 = arith.constant 0 : index
      %c0_199 = arith.constant 0 : index
      %c0_200 = arith.constant 0 : index
      %239 = vector.load %arg8[%c0_198, %c0_199, %c0_200] : memref<1x4x8xf32, #tpu.memory_space<vmem>>, vector<1x4x8xf32>
      %240 = vector.shape_cast %239 : vector<1x4x8xf32> to vector<4x8xf32>
      %241 = vector.shape_cast %238 : vector<4x8xf32> to vector<1x4x8xf32>
      tpu.vector_store %arg8[%c0_198, %c0_199, %c0_200], %241 {strides = array<i32>} : memref<1x4x8xf32, #tpu.memory_space<vmem>>, vector<1x4x8xf32>,
    } else {
    }
    %c8_i32 = arith.constant 8 : i32
    %3 = arith.muli %arg1, %c8_i32 : i32
    %c0_i32_1 = arith.constant 0 : i32
    %4 = arith.addi %3, %c0_i32_1 : i32
    %5 = arith.index_cast %4 : i32 to index
    %c0 = arith.constant 0 : index
    %c0_2 = arith.constant 0 : index
    %6 = vector.load %arg10[%5, %c0, %c0_2] : memref<18x18x4xf32, #tpu.memory_space<vmem>>, vector<8x16x4xf32>
    %7 = vector.shape_cast %6 : vector<8x16x4xf32> to vector<128x4xf32>
    %8 = arith.truncf %7 : vector<128x4xf32> to vector<128x4xbf16>
    %c0_3 = arith.constant 0 : index
    %c0_4 = arith.constant 0 : index
    %c0_5 = arith.constant 0 : index
    %9 = vector.load %arg4[%c0_3, %c0_4, %c0_5] : memref<9x4x8xbf16, #tpu.memory_space<vmem>>, vector<1x4x8xbf16>
    %10 = vector.shape_cast %9 : vector<1x4x8xbf16> to vector<4x8xbf16>
    %cst = arith.constant dense<0.000000e+00> : vector<128x8xf32>
    %11 = tpu.matmul %8, %10, %cst {dimension_numbers = #tpu.dot_dimension_numbers<[1], [0], [0], [1], [0, 0, 1, 1], [], []>} : vector<128x4xbf16>, vector<4x8xbf16>, vector<128x8xf32> -> vector<128x8xf32>
    %c0_i32_6 = arith.constant 0 : i32
    %12 = arith.addi %3, %c0_i32_6 : i32
    %13 = arith.index_cast %12 : i32 to index
    %c1 = arith.constant 1 : index
    %c0_7 = arith.constant 0 : index
    %14 = vector.load %arg10[%13, %c1, %c0_7] : memref<18x18x4xf32, #tpu.memory_space<vmem>>, vector<8x16x4xf32>
    %15 = vector.shape_cast %14 : vector<8x16x4xf32> to vector<128x4xf32>
    %16 = arith.truncf %15 : vector<128x4xf32> to vector<128x4xbf16>
    %c1_8 = arith.constant 1 : index
    %c0_9 = arith.constant 0 : index
    %c0_10 = arith.constant 0 : index
    %17 = vector.load %arg4[%c1_8, %c0_9, %c0_10] : memref<9x4x8xbf16, #tpu.memory_space<vmem>>, vector<1x4x8xbf16>
    %18 = vector.shape_cast %17 : vector<1x4x8xbf16> to vector<4x8xbf16>
    %cst_11 = arith.constant dense<0.000000e+00> : vector<128x8xf32>
    %19 = tpu.matmul %16, %18, %cst_11 {dimension_numbers = #tpu.dot_dimension_numbers<[1], [0], [0], [1], [0, 0, 1, 1], [], []>} : vector<128x4xbf16>, vector<4x8xbf16>, vector<128x8xf32> -> vector<128x8xf32>
    %20 = arith.addf %11, %19 : vector<128x8xf32>
    %c0_i32_12 = arith.constant 0 : i32
    %21 = arith.addi %3, %c0_i32_12 : i32
    %22 = arith.index_cast %21 : i32 to index
    %c2 = arith.constant 2 : index
    %c0_13 = arith.constant 0 : index
    %23 = vector.load %arg10[%22, %c2, %c0_13] : memref<18x18x4xf32, #tpu.memory_space<vmem>>, vector<8x16x4xf32>
    %24 = vector.shape_cast %23 : vector<8x16x4xf32> to vector<128x4xf32>
    %25 = arith.truncf %24 : vector<128x4xf32> to vector<128x4xbf16>
    %c2_14 = arith.constant 2 : index
    %c0_15 = arith.constant 0 : index
    %c0_16 = arith.constant 0 : index
    %26 = vector.load %arg4[%c2_14, %c0_15, %c0_16] : memref<9x4x8xbf16, #tpu.memory_space<vmem>>, vector<1x4x8xbf16>
    %27 = vector.shape_cast %26 : vector<1x4x8xbf16> to vector<4x8xbf16>
    %cst_17 = arith.constant dense<0.000000e+00> : vector<128x8xf32>
    %28 = tpu.matmul %25, %27, %cst_17 {dimension_numbers = #tpu.dot_dimension_numbers<[1], [0], [0], [1], [0, 0, 1, 1], [], []>} : vector<128x4xbf16>, vector<4x8xbf16>, vector<128x8xf32> -> vector<128x8xf32>
    %29 = arith.addf %20, %28 : vector<128x8xf32>
    %c1_i32 = arith.constant 1 : i32
    %30 = arith.addi %3, %c1_i32 : i32
    %31 = arith.index_cast %30 : i32 to index
    %c0_18 = arith.constant 0 : index
    %c0_19 = arith.constant 0 : index
    %32 = vector.load %arg10[%31, %c0_18, %c0_19] : memref<18x18x4xf32, #tpu.memory_space<vmem>>, vector<8x16x4xf32>
    %33 = vector.shape_cast %32 : vector<8x16x4xf32> to vector<128x4xf32>
    %34 = arith.truncf %33 : vector<128x4xf32> to vector<128x4xbf16>
    %c3 = arith.constant 3 : index
    %c0_20 = arith.constant 0 : index
    %c0_21 = arith.constant 0 : index
    %35 = vector.load %arg4[%c3, %c0_20, %c0_21] : memref<9x4x8xbf16, #tpu.memory_space<vmem>>, vector<1x4x8xbf16>
    %36 = vector.shape_cast %35 : vector<1x4x8xbf16> to vector<4x8xbf16>
    %cst_22 = arith.constant dense<0.000000e+00> : vector<128x8xf32>
    %37 = tpu.matmul %34, %36, %cst_22 {dimension_numbers = #tpu.dot_dimension_numbers<[1], [0], [0], [1], [0, 0, 1, 1], [], []>} : vector<128x4xbf16>, vector<4x8xbf16>, vector<128x8xf32> -> vector<128x8xf32>
    %38 = arith.addf %29, %37 : vector<128x8xf32>
    %c1_i32_23 = arith.constant 1 : i32
    %39 = arith.addi %3, %c1_i32_23 : i32
    %40 = arith.index_cast %39 : i32 to index
    %c1_24 = arith.constant 1 : index
    %c0_25 = arith.constant 0 : index
    %41 = vector.load %arg10[%40, %c1_24, %c0_25] : memref<18x18x4xf32, #tpu.memory_space<vmem>>, vector<8x16x4xf32>
    %42 = vector.shape_cast %41 : vector<8x16x4xf32> to vector<128x4xf32>
    %43 = arith.truncf %42 : vector<128x4xf32> to vector<128x4xbf16>
    %c4 = arith.constant 4 : index
    %c0_26 = arith.constant 0 : index
    %c0_27 = arith.constant 0 : index
    %44 = vector.load %arg4[%c4, %c0_26, %c0_27] : memref<9x4x8xbf16, #tpu.memory_space<vmem>>, vector<1x4x8xbf16>
    %45 = vector.shape_cast %44 : vector<1x4x8xbf16> to vector<4x8xbf16>
    %cst_28 = arith.constant dense<0.000000e+00> : vector<128x8xf32>
    %46 = tpu.matmul %43, %45, %cst_28 {dimension_numbers = #tpu.dot_dimension_numbers<[1], [0], [0], [1], [0, 0, 1, 1], [], []>} : vector<128x4xbf16>, vector<4x8xbf16>, vector<128x8xf32> -> vector<128x8xf32>
    %47 = arith.addf %38, %46 : vector<128x8xf32>
    %c1_i32_29 = arith.constant 1 : i32
    %48 = arith.addi %3, %c1_i32_29 : i32
    %49 = arith.index_cast %48 : i32 to index
    %c2_30 = arith.constant 2 : index
    %c0_31 = arith.constant 0 : index
    %50 = vector.load %arg10[%49, %c2_30, %c0_31] : memref<18x18x4xf32, #tpu.memory_space<vmem>>, vector<8x16x4xf32>
    %51 = vector.shape_cast %50 : vector<8x16x4xf32> to vector<128x4xf32>
    %52 = arith.truncf %51 : vector<128x4xf32> to vector<128x4xbf16>
    %c5 = arith.constant 5 : index
    %c0_32 = arith.constant 0 : index
    %c0_33 = arith.constant 0 : index
    %53 = vector.load %arg4[%c5, %c0_32, %c0_33] : memref<9x4x8xbf16, #tpu.memory_space<vmem>>, vector<1x4x8xbf16>
    %54 = vector.shape_cast %53 : vector<1x4x8xbf16> to vector<4x8xbf16>
    %cst_34 = arith.constant dense<0.000000e+00> : vector<128x8xf32>
    %55 = tpu.matmul %52, %54, %cst_34 {dimension_numbers = #tpu.dot_dimension_numbers<[1], [0], [0], [1], [0, 0, 1, 1], [], []>} : vector<128x4xbf16>, vector<4x8xbf16>, vector<128x8xf32> -> vector<128x8xf32>
    %56 = arith.addf %47, %55 : vector<128x8xf32>
    %c2_i32 = arith.constant 2 : i32
    %57 = arith.addi %3, %c2_i32 : i32
    %58 = arith.index_cast %57 : i32 to index
    %c0_35 = arith.constant 0 : index
    %c0_36 = arith.constant 0 : index
    %59 = vector.load %arg10[%58, %c0_35, %c0_36] : memref<18x18x4xf32, #tpu.memory_space<vmem>>, vector<8x16x4xf32>
    %60 = vector.shape_cast %59 : vector<8x16x4xf32> to vector<128x4xf32>
    %61 = arith.truncf %60 : vector<128x4xf32> to vector<128x4xbf16>
    %c6 = arith.constant 6 : index
    %c0_37 = arith.constant 0 : index
    %c0_38 = arith.constant 0 : index
    %62 = vector.load %arg4[%c6, %c0_37, %c0_38] : memref<9x4x8xbf16, #tpu.memory_space<vmem>>, vector<1x4x8xbf16>
    %63 = vector.shape_cast %62 : vector<1x4x8xbf16> to vector<4x8xbf16>
    %cst_39 = arith.constant dense<0.000000e+00> : vector<128x8xf32>
    %64 = tpu.matmul %61, %63, %cst_39 {dimension_numbers = #tpu.dot_dimension_numbers<[1], [0], [0], [1], [0, 0, 1, 1], [], []>} : vector<128x4xbf16>, vector<4x8xbf16>, vector<128x8xf32> -> vector<128x8xf32>
    %65 = arith.addf %56, %64 : vector<128x8xf32>
    %c2_i32_40 = arith.constant 2 : i32
    %66 = arith.addi %3, %c2_i32_40 : i32
    %67 = arith.index_cast %66 : i32 to index
    %c1_41 = arith.constant 1 : index
    %c0_42 = arith.constant 0 : index
    %68 = vector.load %arg10[%67, %c1_41, %c0_42] : memref<18x18x4xf32, #tpu.memory_space<vmem>>, vector<8x16x4xf32>
    %69 = vector.shape_cast %68 : vector<8x16x4xf32> to vector<128x4xf32>
    %70 = arith.truncf %69 : vector<128x4xf32> to vector<128x4xbf16>
    %c7 = arith.constant 7 : index
    %c0_43 = arith.constant 0 : index
    %c0_44 = arith.constant 0 : index
    %71 = vector.load %arg4[%c7, %c0_43, %c0_44] : memref<9x4x8xbf16, #tpu.memory_space<vmem>>, vector<1x4x8xbf16>
    %72 = vector.shape_cast %71 : vector<1x4x8xbf16> to vector<4x8xbf16>
    %cst_45 = arith.constant dense<0.000000e+00> : vector<128x8xf32>
    %73 = tpu.matmul %70, %72, %cst_45 {dimension_numbers = #tpu.dot_dimension_numbers<[1], [0], [0], [1], [0, 0, 1, 1], [], []>} : vector<128x4xbf16>, vector<4x8xbf16>, vector<128x8xf32> -> vector<128x8xf32>
    %74 = arith.addf %65, %73 : vector<128x8xf32>
    %c2_i32_46 = arith.constant 2 : i32
    %75 = arith.addi %3, %c2_i32_46 : i32
    %76 = arith.index_cast %75 : i32 to index
    %c2_47 = arith.constant 2 : index
    %c0_48 = arith.constant 0 : index
    %77 = vector.load %arg10[%76, %c2_47, %c0_48] : memref<18x18x4xf32, #tpu.memory_space<vmem>>, vector<8x16x4xf32>
    %78 = vector.shape_cast %77 : vector<8x16x4xf32> to vector<128x4xf32>
    %79 = arith.truncf %78 : vector<128x4xf32> to vector<128x4xbf16>
    %c8 = arith.constant 8 : index
    %c0_49 = arith.constant 0 : index
    %c0_50 = arith.constant 0 : index
    %80 = vector.load %arg4[%c8, %c0_49, %c0_50] : memref<9x4x8xbf16, #tpu.memory_space<vmem>>, vector<1x4x8xbf16>
    %81 = vector.shape_cast %80 : vector<1x4x8xbf16> to vector<4x8xbf16>
    %cst_51 = arith.constant dense<0.000000e+00> : vector<128x8xf32>
    %82 = tpu.matmul %79, %81, %cst_51 {dimension_numbers = #tpu.dot_dimension_numbers<[1], [0], [0], [1], [0, 0, 1, 1], [], []>} : vector<128x4xbf16>, vector<4x8xbf16>, vector<128x8xf32> -> vector<128x8xf32>
    %83 = arith.addf %74, %82 : vector<128x8xf32>
    %c0_i32_52 = arith.constant 0 : i32
    %84 = arith.addi %3, %c0_i32_52 : i32
    %85 = arith.index_cast %84 : i32 to index
    %c0_53 = arith.constant 0 : index
    %c0_54 = arith.constant 0 : index
    %86 = vector.load %arg9[%85, %c0_53, %c0_54] : memref<18x18x4xf32, #tpu.memory_space<vmem>>, vector<8x16x4xf32>
    %87 = vector.shape_cast %86 : vector<8x16x4xf32> to vector<128x4xf32>
    %88 = arith.truncf %87 : vector<128x4xf32> to vector<128x4xbf16>
    %c0_55 = arith.constant 0 : index
    %c0_56 = arith.constant 0 : index
    %c0_57 = arith.constant 0 : index
    %89 = vector.load %arg5[%c0_55, %c0_56, %c0_57] : memref<9x4x8xbf16, #tpu.memory_space<vmem>>, vector<1x4x8xbf16>
    %90 = vector.shape_cast %89 : vector<1x4x8xbf16> to vector<4x8xbf16>
    %cst_58 = arith.constant dense<0.000000e+00> : vector<128x8xf32>
    %91 = tpu.matmul %88, %90, %cst_58 {dimension_numbers = #tpu.dot_dimension_numbers<[1], [0], [0], [1], [0, 0, 1, 1], [], []>} : vector<128x4xbf16>, vector<4x8xbf16>, vector<128x8xf32> -> vector<128x8xf32>
    %c0_i32_59 = arith.constant 0 : i32
    %92 = arith.addi %3, %c0_i32_59 : i32
    %93 = arith.index_cast %92 : i32 to index
    %c1_60 = arith.constant 1 : index
    %c0_61 = arith.constant 0 : index
    %94 = vector.load %arg9[%93, %c1_60, %c0_61] : memref<18x18x4xf32, #tpu.memory_space<vmem>>, vector<8x16x4xf32>
    %95 = vector.shape_cast %94 : vector<8x16x4xf32> to vector<128x4xf32>
    %96 = arith.truncf %95 : vector<128x4xf32> to vector<128x4xbf16>
    %c1_62 = arith.constant 1 : index
    %c0_63 = arith.constant 0 : index
    %c0_64 = arith.constant 0 : index
    %97 = vector.load %arg5[%c1_62, %c0_63, %c0_64] : memref<9x4x8xbf16, #tpu.memory_space<vmem>>, vector<1x4x8xbf16>
    %98 = vector.shape_cast %97 : vector<1x4x8xbf16> to vector<4x8xbf16>
    %cst_65 = arith.constant dense<0.000000e+00> : vector<128x8xf32>
    %99 = tpu.matmul %96, %98, %cst_65 {dimension_numbers = #tpu.dot_dimension_numbers<[1], [0], [0], [1], [0, 0, 1, 1], [], []>} : vector<128x4xbf16>, vector<4x8xbf16>, vector<128x8xf32> -> vector<128x8xf32>
    %100 = arith.addf %91, %99 : vector<128x8xf32>
    %c0_i32_66 = arith.constant 0 : i32
    %101 = arith.addi %3, %c0_i32_66 : i32
    %102 = arith.index_cast %101 : i32 to index
    %c2_67 = arith.constant 2 : index
    %c0_68 = arith.constant 0 : index
    %103 = vector.load %arg9[%102, %c2_67, %c0_68] : memref<18x18x4xf32, #tpu.memory_space<vmem>>, vector<8x16x4xf32>
    %104 = vector.shape_cast %103 : vector<8x16x4xf32> to vector<128x4xf32>
    %105 = arith.truncf %104 : vector<128x4xf32> to vector<128x4xbf16>
    %c2_69 = arith.constant 2 : index
    %c0_70 = arith.constant 0 : index
    %c0_71 = arith.constant 0 : index
    %106 = vector.load %arg5[%c2_69, %c0_70, %c0_71] : memref<9x4x8xbf16, #tpu.memory_space<vmem>>, vector<1x4x8xbf16>
    %107 = vector.shape_cast %106 : vector<1x4x8xbf16> to vector<4x8xbf16>
    %cst_72 = arith.constant dense<0.000000e+00> : vector<128x8xf32>
    %108 = tpu.matmul %105, %107, %cst_72 {dimension_numbers = #tpu.dot_dimension_numbers<[1], [0], [0], [1], [0, 0, 1, 1], [], []>} : vector<128x4xbf16>, vector<4x8xbf16>, vector<128x8xf32> -> vector<128x8xf32>
    %109 = arith.addf %100, %108 : vector<128x8xf32>
    %c1_i32_73 = arith.constant 1 : i32
    %110 = arith.addi %3, %c1_i32_73 : i32
    %111 = arith.index_cast %110 : i32 to index
    %c0_74 = arith.constant 0 : index
    %c0_75 = arith.constant 0 : index
    %112 = vector.load %arg9[%111, %c0_74, %c0_75] : memref<18x18x4xf32, #tpu.memory_space<vmem>>, vector<8x16x4xf32>
    %113 = vector.shape_cast %112 : vector<8x16x4xf32> to vector<128x4xf32>
    %114 = arith.truncf %113 : vector<128x4xf32> to vector<128x4xbf16>
    %c3_76 = arith.constant 3 : index
    %c0_77 = arith.constant 0 : index
    %c0_78 = arith.constant 0 : index
    %115 = vector.load %arg5[%c3_76, %c0_77, %c0_78] : memref<9x4x8xbf16, #tpu.memory_space<vmem>>, vector<1x4x8xbf16>
    %116 = vector.shape_cast %115 : vector<1x4x8xbf16> to vector<4x8xbf16>
    %cst_79 = arith.constant dense<0.000000e+00> : vector<128x8xf32>
    %117 = tpu.matmul %114, %116, %cst_79 {dimension_numbers = #tpu.dot_dimension_numbers<[1], [0], [0], [1], [0, 0, 1, 1], [], []>} : vector<128x4xbf16>, vector<4x8xbf16>, vector<128x8xf32> -> vector<128x8xf32>
    %118 = arith.addf %109, %117 : vector<128x8xf32>
    %c1_i32_80 = arith.constant 1 : i32
    %119 = arith.addi %3, %c1_i32_80 : i32
    %120 = arith.index_cast %119 : i32 to index
    %c1_81 = arith.constant 1 : index
    %c0_82 = arith.constant 0 : index
    %121 = vector.load %arg9[%120, %c1_81, %c0_82] : memref<18x18x4xf32, #tpu.memory_space<vmem>>, vector<8x16x4xf32>
    %122 = vector.shape_cast %121 : vector<8x16x4xf32> to vector<128x4xf32>
    %123 = arith.truncf %122 : vector<128x4xf32> to vector<128x4xbf16>
    %c4_83 = arith.constant 4 : index
    %c0_84 = arith.constant 0 : index
    %c0_85 = arith.constant 0 : index
    %124 = vector.load %arg5[%c4_83, %c0_84, %c0_85] : memref<9x4x8xbf16, #tpu.memory_space<vmem>>, vector<1x4x8xbf16>
    %125 = vector.shape_cast %124 : vector<1x4x8xbf16> to vector<4x8xbf16>
    %cst_86 = arith.constant dense<0.000000e+00> : vector<128x8xf32>
    %126 = tpu.matmul %123, %125, %cst_86 {dimension_numbers = #tpu.dot_dimension_numbers<[1], [0], [0], [1], [0, 0, 1, 1], [], []>} : vector<128x4xbf16>, vector<4x8xbf16>, vector<128x8xf32> -> vector<128x8xf32>
    %127 = arith.addf %118, %126 : vector<128x8xf32>
    %c1_i32_87 = arith.constant 1 : i32
    %128 = arith.addi %3, %c1_i32_87 : i32
    %129 = arith.index_cast %128 : i32 to index
    %c2_88 = arith.constant 2 : index
    %c0_89 = arith.constant 0 : index
    %130 = vector.load %arg9[%129, %c2_88, %c0_89] : memref<18x18x4xf32, #tpu.memory_space<vmem>>, vector<8x16x4xf32>
    %131 = vector.shape_cast %130 : vector<8x16x4xf32> to vector<128x4xf32>
    %132 = arith.truncf %131 : vector<128x4xf32> to vector<128x4xbf16>
    %c5_90 = arith.constant 5 : index
    %c0_91 = arith.constant 0 : index
    %c0_92 = arith.constant 0 : index
    %133 = vector.load %arg5[%c5_90, %c0_91, %c0_92] : memref<9x4x8xbf16, #tpu.memory_space<vmem>>, vector<1x4x8xbf16>
    %134 = vector.shape_cast %133 : vector<1x4x8xbf16> to vector<4x8xbf16>
    %cst_93 = arith.constant dense<0.000000e+00> : vector<128x8xf32>
    %135 = tpu.matmul %132, %134, %cst_93 {dimension_numbers = #tpu.dot_dimension_numbers<[1], [0], [0], [1], [0, 0, 1, 1], [], []>} : vector<128x4xbf16>, vector<4x8xbf16>, vector<128x8xf32> -> vector<128x8xf32>
    %136 = arith.addf %127, %135 : vector<128x8xf32>
    %c2_i32_94 = arith.constant 2 : i32
    %137 = arith.addi %3, %c2_i32_94 : i32
    %138 = arith.index_cast %137 : i32 to index
    %c0_95 = arith.constant 0 : index
    %c0_96 = arith.constant 0 : index
    %139 = vector.load %arg9[%138, %c0_95, %c0_96] : memref<18x18x4xf32, #tpu.memory_space<vmem>>, vector<8x16x4xf32>
    %140 = vector.shape_cast %139 : vector<8x16x4xf32> to vector<128x4xf32>
    %141 = arith.truncf %140 : vector<128x4xf32> to vector<128x4xbf16>
    %c6_97 = arith.constant 6 : index
    %c0_98 = arith.constant 0 : index
    %c0_99 = arith.constant 0 : index
    %142 = vector.load %arg5[%c6_97, %c0_98, %c0_99] : memref<9x4x8xbf16, #tpu.memory_space<vmem>>, vector<1x4x8xbf16>
    %143 = vector.shape_cast %142 : vector<1x4x8xbf16> to vector<4x8xbf16>
    %cst_100 = arith.constant dense<0.000000e+00> : vector<128x8xf32>
    %144 = tpu.matmul %141, %143, %cst_100 {dimension_numbers = #tpu.dot_dimension_numbers<[1], [0], [0], [1], [0, 0, 1, 1], [], []>} : vector<128x4xbf16>, vector<4x8xbf16>, vector<128x8xf32> -> vector<128x8xf32>
    %145 = arith.addf %136, %144 : vector<128x8xf32>
    %c2_i32_101 = arith.constant 2 : i32
    %146 = arith.addi %3, %c2_i32_101 : i32
    %147 = arith.index_cast %146 : i32 to index
    %c1_102 = arith.constant 1 : index
    %c0_103 = arith.constant 0 : index
    %148 = vector.load %arg9[%147, %c1_102, %c0_103] : memref<18x18x4xf32, #tpu.memory_space<vmem>>, vector<8x16x4xf32>
    %149 = vector.shape_cast %148 : vector<8x16x4xf32> to vector<128x4xf32>
    %150 = arith.truncf %149 : vector<128x4xf32> to vector<128x4xbf16>
    %c7_104 = arith.constant 7 : index
    %c0_105 = arith.constant 0 : index
    %c0_106 = arith.constant 0 : index
    %151 = vector.load %arg5[%c7_104, %c0_105, %c0_106] : memref<9x4x8xbf16, #tpu.memory_space<vmem>>, vector<1x4x8xbf16>
    %152 = vector.shape_cast %151 : vector<1x4x8xbf16> to vector<4x8xbf16>
    %cst_107 = arith.constant dense<0.000000e+00> : vector<128x8xf32>
    %153 = tpu.matmul %150, %152, %cst_107 {dimension_numbers = #tpu.dot_dimension_numbers<[1], [0], [0], [1], [0, 0, 1, 1], [], []>} : vector<128x4xbf16>, vector<4x8xbf16>, vector<128x8xf32> -> vector<128x8xf32>
    %154 = arith.addf %145, %153 : vector<128x8xf32>
    %c2_i32_108 = arith.constant 2 : i32
    %155 = arith.addi %3, %c2_i32_108 : i32
    %156 = arith.index_cast %155 : i32 to index
    %c2_109 = arith.constant 2 : index
    %c0_110 = arith.constant 0 : index
    %157 = vector.load %arg9[%156, %c2_109, %c0_110] : memref<18x18x4xf32, #tpu.memory_space<vmem>>, vector<8x16x4xf32>
    %158 = vector.shape_cast %157 : vector<8x16x4xf32> to vector<128x4xf32>
    %159 = arith.truncf %158 : vector<128x4xf32> to vector<128x4xbf16>
    %c8_111 = arith.constant 8 : index
    %c0_112 = arith.constant 0 : index
    %c0_113 = arith.constant 0 : index
    %160 = vector.load %arg5[%c8_111, %c0_112, %c0_113] : memref<9x4x8xbf16, #tpu.memory_space<vmem>>, vector<1x4x8xbf16>
    %161 = vector.shape_cast %160 : vector<1x4x8xbf16> to vector<4x8xbf16>
    %cst_114 = arith.constant dense<0.000000e+00> : vector<128x8xf32>
    %162 = tpu.matmul %159, %161, %cst_114 {dimension_numbers = #tpu.dot_dimension_numbers<[1], [0], [0], [1], [0, 0, 1, 1], [], []>} : vector<128x4xbf16>, vector<4x8xbf16>, vector<128x8xf32> -> vector<128x8xf32>
    %163 = arith.addf %154, %162 : vector<128x8xf32>
    %164 = vector.shape_cast %83 : vector<128x8xf32> to vector<8x16x8xf32>
    %165 = arith.truncf %164 : vector<8x16x8xf32> to vector<8x16x8xbf16>
    %c0_115 = arith.constant 0 : index
    %c0_116 = arith.constant 0 : index
    %c0_117 = arith.constant 0 : index
    %c0_118 = arith.constant 0 : index
    %166 = vector.load %arg6[%c0_115, %c0_116, %c0_117, %c0_118] : memref<1x8x16x8xbf16, #tpu.memory_space<vmem>>, vector<1x8x16x8xbf16>
    %167 = vector.shape_cast %166 : vector<1x8x16x8xbf16> to vector<8x16x8xbf16>
    %168 = vector.shape_cast %165 : vector<8x16x8xbf16> to vector<1x8x16x8xbf16>
    tpu.vector_store %arg6[%c0_115, %c0_116, %c0_117, %c0_118], %168 {strides = array<i32>} : memref<1x8x16x8xbf16, #tpu.memory_space<vmem>>, vector<1x8x16x8xbf16>,
    %169 = vector.shape_cast %163 : vector<128x8xf32> to vector<8x16x8xf32>
    %170 = arith.truncf %169 : vector<8x16x8xf32> to vector<8x16x8xbf16>
    %c0_119 = arith.constant 0 : index
    %c0_120 = arith.constant 0 : index
    %c0_121 = arith.constant 0 : index
    %c0_122 = arith.constant 0 : index
    %171 = vector.load %arg7[%c0_119, %c0_120, %c0_121, %c0_122] : memref<1x8x16x8xbf16, #tpu.memory_space<vmem>>, vector<1x8x16x8xbf16>
    %172 = vector.shape_cast %171 : vector<1x8x16x8xbf16> to vector<8x16x8xbf16>
    %173 = vector.shape_cast %170 : vector<8x16x8xbf16> to vector<1x8x16x8xbf16>
    tpu.vector_store %arg7[%c0_119, %c0_120, %c0_121, %c0_122], %173 {strides = array<i32>} : memref<1x8x16x8xbf16, #tpu.memory_space<vmem>>, vector<1x8x16x8xbf16>,
    %c0_123 = arith.constant 0 : index
    %c0_124 = arith.constant 0 : index
    %c0_125 = arith.constant 0 : index
    %174 = vector.load %arg8[%c0_123, %c0_124, %c0_125] : memref<1x4x8xf32, #tpu.memory_space<vmem>>, vector<1x1x8xf32>
    %175 = vector.shape_cast %174 : vector<1x1x8xf32> to vector<1x8xf32>
    %cst_126 = arith.constant dense<0.000000e+00> : vector<8xf32>
    %176 = vector.multi_reduction <add>, %83, %cst_126 [0] : vector<128x8xf32> to vector<8xf32>
    %177 = vector.shape_cast %176 : vector<8xf32> to vector<1x8xf32>
    %178 = arith.addf %175, %177 : vector<1x8xf32>
    %c0_127 = arith.constant 0 : index
    %c0_128 = arith.constant 0 : index
    %c0_129 = arith.constant 0 : index
    %179 = vector.load %arg8[%c0_127, %c0_128, %c0_129] : memref<1x4x8xf32, #tpu.memory_space<vmem>>, vector<1x1x8xf32>
    %180 = vector.shape_cast %179 : vector<1x1x8xf32> to vector<1x8xf32>
    %181 = vector.shape_cast %178 : vector<1x8xf32> to vector<1x1x8xf32>
    tpu.vector_store %arg8[%c0_127, %c0_128, %c0_129], %181 {strides = array<i32>} : memref<1x4x8xf32, #tpu.memory_space<vmem>>, vector<1x1x8xf32>,
    %c0_130 = arith.constant 0 : index
    %c1_131 = arith.constant 1 : index
    %c0_132 = arith.constant 0 : index
    %182 = vector.load %arg8[%c0_130, %c1_131, %c0_132] : memref<1x4x8xf32, #tpu.memory_space<vmem>>, vector<1x1x8xf32>
    %183 = vector.shape_cast %182 : vector<1x1x8xf32> to vector<1x8xf32>
    %184 = arith.mulf %83, %83 : vector<128x8xf32>
    %cst_133 = arith.constant dense<0.000000e+00> : vector<8xf32>
    %185 = vector.multi_reduction <add>, %184, %cst_133 [0] : vector<128x8xf32> to vector<8xf32>
    %186 = vector.shape_cast %185 : vector<8xf32> to vector<1x8xf32>
    %187 = arith.addf %183, %186 : vector<1x8xf32>
    %c0_134 = arith.constant 0 : index
    %c1_135 = arith.constant 1 : index
    %c0_136 = arith.constant 0 : index
    %188 = vector.load %arg8[%c0_134, %c1_135, %c0_136] : memref<1x4x8xf32, #tpu.memory_space<vmem>>, vector<1x1x8xf32>
    %189 = vector.shape_cast %188 : vector<1x1x8xf32> to vector<1x8xf32>
    %190 = vector.shape_cast %187 : vector<1x8xf32> to vector<1x1x8xf32>
    tpu.vector_store %arg8[%c0_134, %c1_135, %c0_136], %190 {strides = array<i32>} : memref<1x4x8xf32, #tpu.memory_space<vmem>>, vector<1x1x8xf32>,
    %c0_137 = arith.constant 0 : index
    %c2_138 = arith.constant 2 : index
    %c0_139 = arith.constant 0 : index
    %191 = vector.load %arg8[%c0_137, %c2_138, %c0_139] : memref<1x4x8xf32, #tpu.memory_space<vmem>>, vector<1x1x8xf32>
    %192 = vector.shape_cast %191 : vector<1x1x8xf32> to vector<1x8xf32>
    %cst_140 = arith.constant dense<0.000000e+00> : vector<8xf32>
    %193 = vector.multi_reduction <add>, %163, %cst_140 [0] : vector<128x8xf32> to vector<8xf32>
    %194 = vector.shape_cast %193 : vector<8xf32> to vector<1x8xf32>
    %195 = arith.addf %192, %194 : vector<1x8xf32>
    %c0_141 = arith.constant 0 : index
    %c2_142 = arith.constant 2 : index
    %c0_143 = arith.constant 0 : index
    %196 = vector.load %arg8[%c0_141, %c2_142, %c0_143] : memref<1x4x8xf32, #tpu.memory_space<vmem>>, vector<1x1x8xf32>
    %197 = vector.shape_cast %196 : vector<1x1x8xf32> to vector<1x8xf32>
    %198 = vector.shape_cast %195 : vector<1x8xf32> to vector<1x1x8xf32>
    tpu.vector_store %arg8[%c0_141, %c2_142, %c0_143], %198 {strides = array<i32>} : memref<1x4x8xf32, #tpu.memory_space<vmem>>, vector<1x1x8xf32>,
    %c0_144 = arith.constant 0 : index
    %c3_145 = arith.constant 3 : index
    %c0_146 = arith.constant 0 : index
    %199 = vector.load %arg8[%c0_144, %c3_145, %c0_146] : memref<1x4x8xf32, #tpu.memory_space<vmem>>, vector<1x1x8xf32>
    %200 = vector.shape_cast %199 : vector<1x1x8xf32> to vector<1x8xf32>
    %201 = arith.mulf %163, %163 : vector<128x8xf32>
    %cst_147 = arith.constant dense<0.000000e+00> : vector<8xf32>
    %202 = vector.multi_reduction <add>, %201, %cst_147 [0] : vector<128x8xf32> to vector<8xf32>
    %203 = vector.shape_cast %202 : vector<8xf32> to vector<1x8xf32>
    %204 = arith.addf %200, %203 : vector<1x8xf32>
    %c0_148 = arith.constant 0 : index
    %c3_149 = arith.constant 3 : index
    %c0_150 = arith.constant 0 : index
    %205 = vector.load %arg8[%c0_148, %c3_149, %c0_150] : memref<1x4x8xf32, #tpu.memory_space<vmem>>, vector<1x1x8xf32>
    %206 = vector.shape_cast %205 : vector<1x1x8xf32> to vector<1x8xf32>
    %207 = vector.shape_cast %204 : vector<1x8xf32> to vector<1x1x8xf32>
    tpu.vector_store %arg8[%c0_148, %c3_149, %c0_150], %207 {strides = array<i32>} : memref<1x4x8xf32, #tpu.memory_space<vmem>>, vector<1x1x8xf32>,
    return
  }
  func.func @transform_0(%arg0: i32, %arg1: i32) -> (i32, i32, i32, i32) {
    %c0_i32 = arith.constant 0 : i32
    %c0_i32_0 = arith.constant 0 : i32
    %c0_i32_1 = arith.constant 0 : i32
    %c0_i32_2 = arith.constant 0 : i32
    return %arg0, %c0_i32, %c0_i32_0, %c0_i32_1 : i32, i32, i32, i32
  }
  func.func @transform_1(%arg0: i32, %arg1: i32) -> (i32, i32) {
    %c0_i32 = arith.constant 0 : i32
    %c0_i32_0 = arith.constant 0 : i32
    %c0_i32_1 = arith.constant 0 : i32
    return %c0_i32, %c0_i32_0 : i32, i32
  }
  func.func @transform_2(%arg0: i32, %arg1: i32) -> (i32, i32, i32) {
    %c0_i32 = arith.constant 0 : i32
    %c0_i32_0 = arith.constant 0 : i32
    %c0_i32_1 = arith.constant 0 : i32
    %c0_i32_2 = arith.constant 0 : i32
    return %c0_i32, %c0_i32_0, %c0_i32_1 : i32, i32, i32
  }
  func.func @transform_3(%arg0: i32, %arg1: i32) -> (i32, i32, i32) {
    %c0_i32 = arith.constant 0 : i32
    %c0_i32_0 = arith.constant 0 : i32
    %c0_i32_1 = arith.constant 0 : i32
    %c0_i32_2 = arith.constant 0 : i32
    return %c0_i32, %c0_i32_0, %c0_i32_1 : i32, i32, i32
  }
  func.func @transform_4(%arg0: i32, %arg1: i32) -> (i32, i32, i32, i32) {
    %c0_i32 = arith.constant 0 : i32
    %c0_i32_0 = arith.constant 0 : i32
    %c0_i32_1 = arith.constant 0 : i32
    return %arg0, %arg1, %c0_i32, %c0_i32_0 : i32, i32, i32, i32
  }
  func.func @transform_5(%arg0: i32, %arg1: i32) -> (i32, i32, i32, i32) {
    %c0_i32 = arith.constant 0 : i32
    %c0_i32_0 = arith.constant 0 : i32
    %c0_i32_1 = arith.constant 0 : i32
    return %arg0, %arg1, %c0_i32, %c0_i32_0 : i32, i32, i32, i32
  }
  func.func @transform_6(%arg0: i32, %arg1: i32) -> (i32, i32, i32) {
    %c0_i32 = arith.constant 0 : i32
    %c0_i32_0 = arith.constant 0 : i32
    %c0_i32_1 = arith.constant 0 : i32
    return %arg0, %c0_i32, %c0_i32_0 : i32, i32, i32
  }
}

module attributes {stable_mosaic.version = 11 : i64} {
  func.func @kernel_b(%arg0: i32, %arg1: i32, %arg2: memref<1x16x16x8xbf16, #tpu.memory_space<vmem>>, %arg3: memref<1x16x16x8xbf16, #tpu.memory_space<vmem>>, %arg4: memref<5x8xf32, #tpu.memory_space<vmem>>, %arg5: memref<9x8x8xbf16, #tpu.memory_space<vmem>>, %arg6: memref<1x8x16x8xf32, #tpu.memory_space<vmem>>, %arg7: memref<18x18x8xf32, #tpu.memory_space<vmem>>) attributes {dimension_semantics = [#tpu.dimension_semantics<parallel>, #tpu.dimension_semantics<arbitrary>], iteration_bounds = array<i64: 2, 2>, scalar_prefetch = 0 : i64, scratch_operands = 1 : i64, tpu.core_type = #tpu.core_type<tc>, window_params = [{transform_indices = @transform_0, window_bounds = array<i64: 1, 16, 16, 8>}, {transform_indices = @transform_1, window_bounds = array<i64: 1, 16, 16, 8>}, {pipeline_mode = #tpu.pipeline_mode<synchronous>, transform_indices = @transform_2, window_bounds = array<i64: 5, 8>}, {pipeline_mode = #tpu.pipeline_mode<synchronous>, transform_indices = @transform_3, window_bounds = array<i64: 9, 8, 8>}, {transform_indices = @transform_4, window_bounds = array<i64: 1, 8, 16, 8>}]} {
    %c0 = arith.constant 0 : index
    %c0_0 = arith.constant 0 : index
    %0 = vector.load %arg4[%c0, %c0_0] : memref<5x8xf32, #tpu.memory_space<vmem>>, vector<1x8xf32>
    %1 = vector.shape_cast %0 : vector<1x8xf32> to vector<1x1x8xf32>
    %c1 = arith.constant 1 : index
    %c0_1 = arith.constant 0 : index
    %2 = vector.load %arg4[%c1, %c0_1] : memref<5x8xf32, #tpu.memory_space<vmem>>, vector<1x8xf32>
    %3 = vector.shape_cast %2 : vector<1x8xf32> to vector<1x1x8xf32>
    %c2 = arith.constant 2 : index
    %c0_2 = arith.constant 0 : index
    %4 = vector.load %arg4[%c2, %c0_2] : memref<5x8xf32, #tpu.memory_space<vmem>>, vector<1x8xf32>
    %5 = vector.shape_cast %4 : vector<1x8xf32> to vector<1x1x8xf32>
    %c3 = arith.constant 3 : index
    %c0_3 = arith.constant 0 : index
    %6 = vector.load %arg4[%c3, %c0_3] : memref<5x8xf32, #tpu.memory_space<vmem>>, vector<1x8xf32>
    %7 = vector.shape_cast %6 : vector<1x8xf32> to vector<1x1x8xf32>
    %c4 = arith.constant 4 : index
    %c0_4 = arith.constant 0 : index
    %8 = vector.load %arg4[%c4, %c0_4] : memref<5x8xf32, #tpu.memory_space<vmem>>, vector<1x8xf32>
    %9 = vector.shape_cast %8 : vector<1x8xf32> to vector<1x1x8xf32>
    %c0_i32 = arith.constant 0 : i32
    %10 = arith.cmpi eq, %arg1, %c0_i32 : i32
    %11 = arith.extui %10 : i1 to i32
    %c0_i32_5 = arith.constant 0 : i32
    %12 = arith.cmpi ne, %11, %c0_i32_5 : i32
    scf.if %12 {
      %c0_69 = arith.constant 0 : index
      %c0_70 = arith.constant 0 : index
      %c0_71 = arith.constant 0 : index
      %c0_72 = arith.constant 0 : index
      %109 = vector.load %arg2[%c0_69, %c0_70, %c0_71, %c0_72] : memref<1x16x16x8xbf16, #tpu.memory_space<vmem>>, vector<1x16x16x8xbf16>
      %110 = vector.shape_cast %109 : vector<1x16x16x8xbf16> to vector<16x16x8xbf16>
      %111 = arith.extf %110 : vector<16x16x8xbf16> to vector<16x16x8xf32>
      %112 = vector.broadcast %1 : vector<1x1x8xf32> to vector<16x16x8xf32>
      %113 = arith.mulf %111, %112 : vector<16x16x8xf32>
      %114 = vector.broadcast %3 : vector<1x1x8xf32> to vector<16x16x8xf32>
      %115 = arith.addf %113, %114 : vector<16x16x8xf32>
      %cst_73 = arith.constant 0.000000e+00 : f32
      %116 = vector.broadcast %cst_73 : f32 to vector<16x16x8xf32>
      %117 = arith.maximumf %115, %116 : vector<16x16x8xf32>
      %cst_74 = arith.constant 0.000000e+00 : f32
      %118 = vector.broadcast %cst_74 : f32 to vector<1x18x8xf32>
      %c0_75 = arith.constant 0 : index
      %c0_76 = arith.constant 0 : index
      %c0_77 = arith.constant 0 : index
      %119 = vector.load %arg7[%c0_75, %c0_76, %c0_77] : memref<18x18x8xf32, #tpu.memory_space<vmem>>, vector<1x18x8xf32>
      tpu.vector_store %arg7[%c0_75, %c0_76, %c0_77], %118 {strides = array<i32>} : memref<18x18x8xf32, #tpu.memory_space<vmem>>, vector<1x18x8xf32>,
      %cst_78 = arith.constant 0.000000e+00 : f32
      %120 = vector.broadcast %cst_78 : f32 to vector<1x18x8xf32>
      %c17 = arith.constant 17 : index
      %c0_79 = arith.constant 0 : index
      %c0_80 = arith.constant 0 : index
      %121 = vector.load %arg7[%c17, %c0_79, %c0_80] : memref<18x18x8xf32, #tpu.memory_space<vmem>>, vector<1x18x8xf32>
      tpu.vector_store %arg7[%c17, %c0_79, %c0_80], %120 {strides = array<i32>} : memref<18x18x8xf32, #tpu.memory_space<vmem>>, vector<1x18x8xf32>,
      %cst_81 = arith.constant 0.000000e+00 : f32
      %122 = vector.broadcast %cst_81 : f32 to vector<18x1x8xf32>
      %c0_82 = arith.constant 0 : index
      %c0_83 = arith.constant 0 : index
      %c0_84 = arith.constant 0 : index
      %123 = vector.load %arg7[%c0_82, %c0_83, %c0_84] : memref<18x18x8xf32, #tpu.memory_space<vmem>>, vector<18x1x8xf32>
      tpu.vector_store %arg7[%c0_82, %c0_83, %c0_84], %122 {strides = array<i32>} : memref<18x18x8xf32, #tpu.memory_space<vmem>>, vector<18x1x8xf32>,
      %cst_85 = arith.constant 0.000000e+00 : f32
      %124 = vector.broadcast %cst_85 : f32 to vector<18x1x8xf32>
      %c0_86 = arith.constant 0 : index
      %c17_87 = arith.constant 17 : index
      %c0_88 = arith.constant 0 : index
      %125 = vector.load %arg7[%c0_86, %c17_87, %c0_88] : memref<18x18x8xf32, #tpu.memory_space<vmem>>, vector<18x1x8xf32>
      tpu.vector_store %arg7[%c0_86, %c17_87, %c0_88], %124 {strides = array<i32>} : memref<18x18x8xf32, #tpu.memory_space<vmem>>, vector<18x1x8xf32>,
      %c1_89 = arith.constant 1 : index
      %c1_90 = arith.constant 1 : index
      %c0_91 = arith.constant 0 : index
      %126 = vector.load %arg7[%c1_89, %c1_90, %c0_91] : memref<18x18x8xf32, #tpu.memory_space<vmem>>, vector<16x16x8xf32>
      tpu.vector_store %arg7[%c1_89, %c1_90, %c0_91], %117 {strides = array<i32>} : memref<18x18x8xf32, #tpu.memory_space<vmem>>, vector<16x16x8xf32>,
    } else {
    }
    %c8_i32 = arith.constant 8 : i32
    %13 = arith.muli %arg1, %c8_i32 : i32
    %c0_i32_6 = arith.constant 0 : i32
    %14 = arith.addi %13, %c0_i32_6 : i32
    %15 = arith.index_cast %14 : i32 to index
    %c0_7 = arith.constant 0 : index
    %c0_8 = arith.constant 0 : index
    %16 = vector.load %arg7[%15, %c0_7, %c0_8] : memref<18x18x8xf32, #tpu.memory_space<vmem>>, vector<8x16x8xf32>
    %17 = vector.shape_cast %16 : vector<8x16x8xf32> to vector<128x8xf32>
    %18 = arith.truncf %17 : vector<128x8xf32> to vector<128x8xbf16>
    %c0_9 = arith.constant 0 : index
    %c0_10 = arith.constant 0 : index
    %c0_11 = arith.constant 0 : index
    %19 = vector.load %arg5[%c0_9, %c0_10, %c0_11] : memref<9x8x8xbf16, #tpu.memory_space<vmem>>, vector<1x8x8xbf16>
    %20 = vector.shape_cast %19 : vector<1x8x8xbf16> to vector<8x8xbf16>
    %cst = arith.constant dense<0.000000e+00> : vector<128x8xf32>
    %21 = tpu.matmul %18, %20, %cst {dimension_numbers = #tpu.dot_dimension_numbers<[1], [0], [0], [1], [0, 0, 1, 1], [], []>} : vector<128x8xbf16>, vector<8x8xbf16>, vector<128x8xf32> -> vector<128x8xf32>
    %c0_i32_12 = arith.constant 0 : i32
    %22 = arith.addi %13, %c0_i32_12 : i32
    %23 = arith.index_cast %22 : i32 to index
    %c1_13 = arith.constant 1 : index
    %c0_14 = arith.constant 0 : index
    %24 = vector.load %arg7[%23, %c1_13, %c0_14] : memref<18x18x8xf32, #tpu.memory_space<vmem>>, vector<8x16x8xf32>
    %25 = vector.shape_cast %24 : vector<8x16x8xf32> to vector<128x8xf32>
    %26 = arith.truncf %25 : vector<128x8xf32> to vector<128x8xbf16>
    %c1_15 = arith.constant 1 : index
    %c0_16 = arith.constant 0 : index
    %c0_17 = arith.constant 0 : index
    %27 = vector.load %arg5[%c1_15, %c0_16, %c0_17] : memref<9x8x8xbf16, #tpu.memory_space<vmem>>, vector<1x8x8xbf16>
    %28 = vector.shape_cast %27 : vector<1x8x8xbf16> to vector<8x8xbf16>
    %cst_18 = arith.constant dense<0.000000e+00> : vector<128x8xf32>
    %29 = tpu.matmul %26, %28, %cst_18 {dimension_numbers = #tpu.dot_dimension_numbers<[1], [0], [0], [1], [0, 0, 1, 1], [], []>} : vector<128x8xbf16>, vector<8x8xbf16>, vector<128x8xf32> -> vector<128x8xf32>
    %30 = arith.addf %21, %29 : vector<128x8xf32>
    %c0_i32_19 = arith.constant 0 : i32
    %31 = arith.addi %13, %c0_i32_19 : i32
    %32 = arith.index_cast %31 : i32 to index
    %c2_20 = arith.constant 2 : index
    %c0_21 = arith.constant 0 : index
    %33 = vector.load %arg7[%32, %c2_20, %c0_21] : memref<18x18x8xf32, #tpu.memory_space<vmem>>, vector<8x16x8xf32>
    %34 = vector.shape_cast %33 : vector<8x16x8xf32> to vector<128x8xf32>
    %35 = arith.truncf %34 : vector<128x8xf32> to vector<128x8xbf16>
    %c2_22 = arith.constant 2 : index
    %c0_23 = arith.constant 0 : index
    %c0_24 = arith.constant 0 : index
    %36 = vector.load %arg5[%c2_22, %c0_23, %c0_24] : memref<9x8x8xbf16, #tpu.memory_space<vmem>>, vector<1x8x8xbf16>
    %37 = vector.shape_cast %36 : vector<1x8x8xbf16> to vector<8x8xbf16>
    %cst_25 = arith.constant dense<0.000000e+00> : vector<128x8xf32>
    %38 = tpu.matmul %35, %37, %cst_25 {dimension_numbers = #tpu.dot_dimension_numbers<[1], [0], [0], [1], [0, 0, 1, 1], [], []>} : vector<128x8xbf16>, vector<8x8xbf16>, vector<128x8xf32> -> vector<128x8xf32>
    %39 = arith.addf %30, %38 : vector<128x8xf32>
    %c1_i32 = arith.constant 1 : i32
    %40 = arith.addi %13, %c1_i32 : i32
    %41 = arith.index_cast %40 : i32 to index
    %c0_26 = arith.constant 0 : index
    %c0_27 = arith.constant 0 : index
    %42 = vector.load %arg7[%41, %c0_26, %c0_27] : memref<18x18x8xf32, #tpu.memory_space<vmem>>, vector<8x16x8xf32>
    %43 = vector.shape_cast %42 : vector<8x16x8xf32> to vector<128x8xf32>
    %44 = arith.truncf %43 : vector<128x8xf32> to vector<128x8xbf16>
    %c3_28 = arith.constant 3 : index
    %c0_29 = arith.constant 0 : index
    %c0_30 = arith.constant 0 : index
    %45 = vector.load %arg5[%c3_28, %c0_29, %c0_30] : memref<9x8x8xbf16, #tpu.memory_space<vmem>>, vector<1x8x8xbf16>
    %46 = vector.shape_cast %45 : vector<1x8x8xbf16> to vector<8x8xbf16>
    %cst_31 = arith.constant dense<0.000000e+00> : vector<128x8xf32>
    %47 = tpu.matmul %44, %46, %cst_31 {dimension_numbers = #tpu.dot_dimension_numbers<[1], [0], [0], [1], [0, 0, 1, 1], [], []>} : vector<128x8xbf16>, vector<8x8xbf16>, vector<128x8xf32> -> vector<128x8xf32>
    %48 = arith.addf %39, %47 : vector<128x8xf32>
    %c1_i32_32 = arith.constant 1 : i32
    %49 = arith.addi %13, %c1_i32_32 : i32
    %50 = arith.index_cast %49 : i32 to index
    %c1_33 = arith.constant 1 : index
    %c0_34 = arith.constant 0 : index
    %51 = vector.load %arg7[%50, %c1_33, %c0_34] : memref<18x18x8xf32, #tpu.memory_space<vmem>>, vector<8x16x8xf32>
    %52 = vector.shape_cast %51 : vector<8x16x8xf32> to vector<128x8xf32>
    %53 = arith.truncf %52 : vector<128x8xf32> to vector<128x8xbf16>
    %c4_35 = arith.constant 4 : index
    %c0_36 = arith.constant 0 : index
    %c0_37 = arith.constant 0 : index
    %54 = vector.load %arg5[%c4_35, %c0_36, %c0_37] : memref<9x8x8xbf16, #tpu.memory_space<vmem>>, vector<1x8x8xbf16>
    %55 = vector.shape_cast %54 : vector<1x8x8xbf16> to vector<8x8xbf16>
    %cst_38 = arith.constant dense<0.000000e+00> : vector<128x8xf32>
    %56 = tpu.matmul %53, %55, %cst_38 {dimension_numbers = #tpu.dot_dimension_numbers<[1], [0], [0], [1], [0, 0, 1, 1], [], []>} : vector<128x8xbf16>, vector<8x8xbf16>, vector<128x8xf32> -> vector<128x8xf32>
    %57 = arith.addf %48, %56 : vector<128x8xf32>
    %c1_i32_39 = arith.constant 1 : i32
    %58 = arith.addi %13, %c1_i32_39 : i32
    %59 = arith.index_cast %58 : i32 to index
    %c2_40 = arith.constant 2 : index
    %c0_41 = arith.constant 0 : index
    %60 = vector.load %arg7[%59, %c2_40, %c0_41] : memref<18x18x8xf32, #tpu.memory_space<vmem>>, vector<8x16x8xf32>
    %61 = vector.shape_cast %60 : vector<8x16x8xf32> to vector<128x8xf32>
    %62 = arith.truncf %61 : vector<128x8xf32> to vector<128x8xbf16>
    %c5 = arith.constant 5 : index
    %c0_42 = arith.constant 0 : index
    %c0_43 = arith.constant 0 : index
    %63 = vector.load %arg5[%c5, %c0_42, %c0_43] : memref<9x8x8xbf16, #tpu.memory_space<vmem>>, vector<1x8x8xbf16>
    %64 = vector.shape_cast %63 : vector<1x8x8xbf16> to vector<8x8xbf16>
    %cst_44 = arith.constant dense<0.000000e+00> : vector<128x8xf32>
    %65 = tpu.matmul %62, %64, %cst_44 {dimension_numbers = #tpu.dot_dimension_numbers<[1], [0], [0], [1], [0, 0, 1, 1], [], []>} : vector<128x8xbf16>, vector<8x8xbf16>, vector<128x8xf32> -> vector<128x8xf32>
    %66 = arith.addf %57, %65 : vector<128x8xf32>
    %c2_i32 = arith.constant 2 : i32
    %67 = arith.addi %13, %c2_i32 : i32
    %68 = arith.index_cast %67 : i32 to index
    %c0_45 = arith.constant 0 : index
    %c0_46 = arith.constant 0 : index
    %69 = vector.load %arg7[%68, %c0_45, %c0_46] : memref<18x18x8xf32, #tpu.memory_space<vmem>>, vector<8x16x8xf32>
    %70 = vector.shape_cast %69 : vector<8x16x8xf32> to vector<128x8xf32>
    %71 = arith.truncf %70 : vector<128x8xf32> to vector<128x8xbf16>
    %c6 = arith.constant 6 : index
    %c0_47 = arith.constant 0 : index
    %c0_48 = arith.constant 0 : index
    %72 = vector.load %arg5[%c6, %c0_47, %c0_48] : memref<9x8x8xbf16, #tpu.memory_space<vmem>>, vector<1x8x8xbf16>
    %73 = vector.shape_cast %72 : vector<1x8x8xbf16> to vector<8x8xbf16>
    %cst_49 = arith.constant dense<0.000000e+00> : vector<128x8xf32>
    %74 = tpu.matmul %71, %73, %cst_49 {dimension_numbers = #tpu.dot_dimension_numbers<[1], [0], [0], [1], [0, 0, 1, 1], [], []>} : vector<128x8xbf16>, vector<8x8xbf16>, vector<128x8xf32> -> vector<128x8xf32>
    %75 = arith.addf %66, %74 : vector<128x8xf32>
    %c2_i32_50 = arith.constant 2 : i32
    %76 = arith.addi %13, %c2_i32_50 : i32
    %77 = arith.index_cast %76 : i32 to index
    %c1_51 = arith.constant 1 : index
    %c0_52 = arith.constant 0 : index
    %78 = vector.load %arg7[%77, %c1_51, %c0_52] : memref<18x18x8xf32, #tpu.memory_space<vmem>>, vector<8x16x8xf32>
    %79 = vector.shape_cast %78 : vector<8x16x8xf32> to vector<128x8xf32>
    %80 = arith.truncf %79 : vector<128x8xf32> to vector<128x8xbf16>
    %c7 = arith.constant 7 : index
    %c0_53 = arith.constant 0 : index
    %c0_54 = arith.constant 0 : index
    %81 = vector.load %arg5[%c7, %c0_53, %c0_54] : memref<9x8x8xbf16, #tpu.memory_space<vmem>>, vector<1x8x8xbf16>
    %82 = vector.shape_cast %81 : vector<1x8x8xbf16> to vector<8x8xbf16>
    %cst_55 = arith.constant dense<0.000000e+00> : vector<128x8xf32>
    %83 = tpu.matmul %80, %82, %cst_55 {dimension_numbers = #tpu.dot_dimension_numbers<[1], [0], [0], [1], [0, 0, 1, 1], [], []>} : vector<128x8xbf16>, vector<8x8xbf16>, vector<128x8xf32> -> vector<128x8xf32>
    %84 = arith.addf %75, %83 : vector<128x8xf32>
    %c2_i32_56 = arith.constant 2 : i32
    %85 = arith.addi %13, %c2_i32_56 : i32
    %86 = arith.index_cast %85 : i32 to index
    %c2_57 = arith.constant 2 : index
    %c0_58 = arith.constant 0 : index
    %87 = vector.load %arg7[%86, %c2_57, %c0_58] : memref<18x18x8xf32, #tpu.memory_space<vmem>>, vector<8x16x8xf32>
    %88 = vector.shape_cast %87 : vector<8x16x8xf32> to vector<128x8xf32>
    %89 = arith.truncf %88 : vector<128x8xf32> to vector<128x8xbf16>
    %c8 = arith.constant 8 : index
    %c0_59 = arith.constant 0 : index
    %c0_60 = arith.constant 0 : index
    %90 = vector.load %arg5[%c8, %c0_59, %c0_60] : memref<9x8x8xbf16, #tpu.memory_space<vmem>>, vector<1x8x8xbf16>
    %91 = vector.shape_cast %90 : vector<1x8x8xbf16> to vector<8x8xbf16>
    %cst_61 = arith.constant dense<0.000000e+00> : vector<128x8xf32>
    %92 = tpu.matmul %89, %91, %cst_61 {dimension_numbers = #tpu.dot_dimension_numbers<[1], [0], [0], [1], [0, 0, 1, 1], [], []>} : vector<128x8xbf16>, vector<8x8xbf16>, vector<128x8xf32> -> vector<128x8xf32>
    %93 = arith.addf %84, %92 : vector<128x8xf32>
    %c0_62 = arith.constant 0 : index
    %94 = arith.index_cast %13 : i32 to index
    %c0_63 = arith.constant 0 : index
    %c0_64 = arith.constant 0 : index
    %95 = vector.load %arg3[%c0_62, %94, %c0_63, %c0_64] : memref<1x16x16x8xbf16, #tpu.memory_space<vmem>>, vector<1x8x16x8xbf16>
    %96 = vector.shape_cast %95 : vector<1x8x16x8xbf16> to vector<8x16x8xbf16>
    %97 = arith.extf %96 : vector<8x16x8xbf16> to vector<8x16x8xf32>
    %98 = vector.broadcast %5 : vector<1x1x8xf32> to vector<8x16x8xf32>
    %99 = arith.mulf %97, %98 : vector<8x16x8xf32>
    %100 = vector.broadcast %7 : vector<1x1x8xf32> to vector<8x16x8xf32>
    %101 = arith.addf %99, %100 : vector<8x16x8xf32>
    %102 = vector.shape_cast %93 : vector<128x8xf32> to vector<8x16x8xf32>
    %103 = vector.broadcast %9 : vector<1x1x8xf32> to vector<8x16x8xf32>
    %104 = arith.addf %102, %103 : vector<8x16x8xf32>
    %105 = arith.addf %104, %101 : vector<8x16x8xf32>
    %c0_65 = arith.constant 0 : index
    %c0_66 = arith.constant 0 : index
    %c0_67 = arith.constant 0 : index
    %c0_68 = arith.constant 0 : index
    %106 = vector.load %arg6[%c0_65, %c0_66, %c0_67, %c0_68] : memref<1x8x16x8xf32, #tpu.memory_space<vmem>>, vector<1x8x16x8xf32>
    %107 = vector.shape_cast %106 : vector<1x8x16x8xf32> to vector<8x16x8xf32>
    %108 = vector.shape_cast %105 : vector<8x16x8xf32> to vector<1x8x16x8xf32>
    tpu.vector_store %arg6[%c0_65, %c0_66, %c0_67, %c0_68], %108 {strides = array<i32>} : memref<1x8x16x8xf32, #tpu.memory_space<vmem>>, vector<1x8x16x8xf32>,
    return
  }
  func.func @transform_0(%arg0: i32, %arg1: i32) -> (i32, i32, i32, i32) {
    %c0_i32 = arith.constant 0 : i32
    %c0_i32_0 = arith.constant 0 : i32
    %c0_i32_1 = arith.constant 0 : i32
    %c0_i32_2 = arith.constant 0 : i32
    return %arg0, %c0_i32, %c0_i32_0, %c0_i32_1 : i32, i32, i32, i32
  }
  func.func @transform_1(%arg0: i32, %arg1: i32) -> (i32, i32, i32, i32) {
    %c0_i32 = arith.constant 0 : i32
    %c0_i32_0 = arith.constant 0 : i32
    %c0_i32_1 = arith.constant 0 : i32
    %c0_i32_2 = arith.constant 0 : i32
    return %arg0, %c0_i32, %c0_i32_0, %c0_i32_1 : i32, i32, i32, i32
  }
  func.func @transform_2(%arg0: i32, %arg1: i32) -> (i32, i32) {
    %c0_i32 = arith.constant 0 : i32
    %c0_i32_0 = arith.constant 0 : i32
    %c0_i32_1 = arith.constant 0 : i32
    return %c0_i32, %c0_i32_0 : i32, i32
  }
  func.func @transform_3(%arg0: i32, %arg1: i32) -> (i32, i32, i32) {
    %c0_i32 = arith.constant 0 : i32
    %c0_i32_0 = arith.constant 0 : i32
    %c0_i32_1 = arith.constant 0 : i32
    %c0_i32_2 = arith.constant 0 : i32
    return %c0_i32, %c0_i32_0, %c0_i32_1 : i32, i32, i32
  }
  func.func @transform_4(%arg0: i32, %arg1: i32) -> (i32, i32, i32, i32) {
    %c0_i32 = arith.constant 0 : i32
    %c0_i32_0 = arith.constant 0 : i32
    %c0_i32_1 = arith.constant 0 : i32
    return %arg0, %arg1, %c0_i32, %c0_i32_0 : i32, i32, i32, i32
  }
}

</mosaic_0001>

<bundles_post_ra>
// kernel: residual_conv_forward.3
= control target key start
LH: loop header
LB: loop body
LE: loop exit
PB: predicated region body
PF: predicated region fallthrough
CT: control target
= control target key end

     0   :  { %s2902_s15 = smov 0   ;;  %s2904_s16 = smov 0   ;;  %s3785_s0 = inlined_call_operand.vmem [shape: bf16[2,16,16,8], index: 0, kind: input, shape index: {}]   ;;  %s3786_s1 = inlined_call_operand.vmem [shape: bf16[2,16,16,8], index: 1, kind: input, shape index: {}]   ;;  %s3787_s2 = inlined_call_operand.vmem [shape: f32[5,8], index: 2, kind: input, shape index: {}]   ;;  %s3788_s3 = inlined_call_operand.vmem [shape: bf16[9,8,8], index: 3, kind: input, shape index: {}]   ;;  %s3789_s4 = inlined_call_operand.vmem [shape: f32[2,16,16,8], index: 4, kind: output, shape index: {}]  }
   0x1   :  { %s2906_s17 = smov 0   ;;  %s2908_s18 = smov 0  }
   0x2   :  { %s2910_s19 = smov 0  }
   0x3 LB: > { %s23_s20 = sadd.s32 1, %s2866_s17  ;;  %s26_s21 = sadd.s32 1, %s2870_s18  ;;  %s2874_s19 = sphi %s2910_s19, %s14_s19   ;;  %s2870_s18 = sphi %s2908_s18, %s3859_s18   ;;  %s2866_s17 = sphi %s2906_s17, %s3858_s17   ;;  %s2862_s16 = sphi %s2904_s16, %s3857_s16   ;;  %s2858_s15 = sphi %s2902_s15, %s3856_s15  }
   0x4   : > { %p24_p0 = scmp.ge.s32.totalorder %s23_s20, 2  ;;  %p2217_p1 = scmp.ge.s32.totalorder %s2874_s19, 1 }
   0x5   : > { %p186_p2 = scmp.lt.s32.totalorder %s2874_s19, 5 }
   0x6   : > { %s3861_s20 = smov (%p24_p0, %s23_s20), 0  ;;  %s3863_s21 = smov (!%p24_p0, %s26_s21), %s2870_s18 }
   0x7   : > { %p187_p3 = pnand %p2217_p1, %p186_p2  ;;  %p28_p4 = scmp.ge.s32.totalorder %s3863_s21, 2 }
   0x9   : > { %s3865_s21 = smov (%p28_p4, %s3863_s21), 0  ;;  %190 = sbr.rel (%p187_p3) target bundleno = 419 (0x1a3), region = 36 }
   0xe   : > { %p222_p5 = scmp.lt.s32.totalorder %s2862_s16, 1  ;;  %s2222_s22 = sshll.u32 %s2858_s15, 3  ;;  %v2938_v0 = vld [vmem:[%s3787_s2] ss:$0 sm:$0xff]  ;;  %v2943_v1 = vld [vmem:[%s3787_s2 + $0x1] ss:$0 sm:$0xff] }
   0xf   : > { %p235_p6 = scmp.lt.s32.totalorder %s2222_s22, 15  ;;  %v2948_v2 = vld [vmem:[%s3787_s2 + $0x2] ss:$0 sm:$0xff]  ;;  %v2953_v3 = vld [vmem:[%s3787_s2 + $0x3] ss:$0 sm:$0xff]  ;;  %p2226_p7 = scmp.ne.s32.totalorder %s2858_s15, 0 }
  0x10   : > { %s3867_s16 = smov (!%p222_p5, %s2862_s16), 1  ;;  %v2958_v4 = vld [vmem:[%s3787_s2 + $0x4] ss:$0 sm:$0xff] }
  0x11   : > { %s3869_s22 = smov (!%p235_p6, %s2222_s22), 15  ;;  %s2418_s7 = sshll.u32 %s3867_s16, 7 }
  0x12   : > { %s2224_s8 = sshll.u32 %s3867_s16, 5  ;;  %s2963_s11 = scalar_lea.vmem %s3785_s0, %s2418_s7 }
  0x13   : > { %s2968_s14 = scalar_lea.vmem %s3786_s1, %s2418_s7  ;;  %s2223_s23 = sshll.u32 %s3869_s22, 1 }
  0x14   : > { %s239_s24 = sadd.s32 %s2224_s8, %s2223_s23  ;;  %252 = sbr.rel (%p2226_p7) target bundleno = 63 (0x3f), region = 40 }
  0x15   : > { %s2225_s25 = sshll.u32 %s239_s24, 3 }
  0x16   : > { %s2973_s28 = scalar_lea.vmem %s3789_s4, %s2225_s25 }
  0x19   : > { %vm421_vm0 = vcmask 64512   ;;  %vm424_vm1 = vcmask 58368   ;;  %vm430_vm2 = vcmask 57344   ;;  %v2423_v5 = vld [vmem:[%s2963_s11] sm:$0xff]   ;;  %v2518_v6 = vld [vmem:[%s2963_s11 + $0x8] sm:$0xff]   ;;  %v2876_v7 = vmov 0.0  }
  0x1a   : > { %422 = vst.msk [vmem:[#allocation2] sm:$0xff] %vm421_vm0, %v2876_v7  ;;  %423 = vst.msk [vmem:[#allocation2 + $0x8] sm:$0xff] %vm421_vm0, %v2876_v7  ;;  %v2424_v8 = vunpack.c.l.bf16 %v2423_v5  ;;  %v2425_v9 = vunpack.c.h.bf16 %v2423_v5  ;;  %v2428_v10 = vunpack.c.l.bf16 %v2518_v6  ;;  %v2429_v11 = vunpack.c.h.bf16 %v2518_v6  ;;  %v2519_v12 = vld [vmem:[%s2963_s11 + $0x10] sm:$0xff]   ;;  %v2520_v13 = vld [vmem:[%s2963_s11 + $0x18] sm:$0xff]  }
  0x1b   : > { %427 = vst.msk [vmem:[#allocation2 + $0x198] sm:$0xff] %vm421_vm0, %v2876_v7  ;;  %428 = vst.msk [vmem:[#allocation2 + $0x1a0] sm:$0xff] %vm421_vm0, %v2876_v7  ;;  %v2432_v14 = vunpack.c.l.bf16 %v2519_v12  ;;  %v2433_v15 = vunpack.c.h.bf16 %v2519_v12  ;;  %v2436_v16 = vunpack.c.l.bf16 %v2520_v13  ;;  %v2437_v17 = vunpack.c.h.bf16 %v2520_v13  ;;  %v2521_v34 = vld [vmem:[%s2963_s11 + $0x20] sm:$0xff]   ;;  %v2522_v35 = vld [vmem:[%s2963_s11 + $0x28] sm:$0xff]  }
  0x1c   : > { %425 = vst.msk [vmem:[#allocation2 + $0x10] sm:$0x3] %vm424_vm1, %v2876_v7  ;;  %429 = vst.msk [vmem:[#allocation2 + $0x1a8] sm:$0x3] %vm424_vm1, %v2876_v7  ;;  %v321_v18 = vmul.f32 %v2424_v8, %v2938_v0  ;;  %v322_v19 = vmul.f32 %v2425_v9, %v2938_v0  ;;  %v323_v20 = vmul.f32 %v2428_v10, %v2938_v0  ;;  %v2523_v40 = vld [vmem:[%s2963_s11 + $0x30] sm:$0xff]   ;;  %v2524_v41 = vld [vmem:[%s2963_s11 + $0x38] sm:$0xff]   ;;  %v2440_v46 = vunpack.c.l.bf16 %v2521_v34 }
  0x1d   : > { %432 = vst.msk [vmem:[#allocation2 + $0x18] sm:$0x1] %vm430_vm2, %v2876_v7  ;;  %433 = vst.msk [vmem:[#allocation2 + $0x30] sm:$0x1] %vm430_vm2, %v2876_v7  ;;  %v324_v21 = vmul.f32 %v2429_v11, %v2938_v0  ;;  %v325_v22 = vmul.f32 %v2432_v14, %v2938_v0  ;;  %v326_v23 = vmul.f32 %v2433_v15, %v2938_v0  ;;  %v2441_v47 = vunpack.c.h.bf16 %v2521_v34  ;;  %v2525_v11 = vld [vmem:[%s2963_s11 + $0x40] sm:$0xff]   ;;  %v2526_v12 = vld [vmem:[%s2963_s11 + $0x48] sm:$0xff]  }
  0x1e   : > { %434 = vst.msk [vmem:[#allocation2 + $0x48] sm:$0x1] %vm430_vm2, %v2876_v7  ;;  %435 = vst.msk [vmem:[#allocation2 + $0x60] sm:$0x1] %vm430_vm2, %v2876_v7  ;;  %v327_v24 = vmul.f32 %v2436_v16, %v2938_v0  ;;  %v328_v25 = vmul.f32 %v2437_v17, %v2938_v0  ;;  %v357_v26 = vadd.f32 %v2943_v1, %v321_v18  ;;  %v2444_v48 = vunpack.c.l.bf16 %v2522_v35  ;;  %v2527_v17 = vld [vmem:[%s2963_s11 + $0x50] sm:$0xff]   ;;  %v2528_v18 = vld [vmem:[%s2963_s11 + $0x58] sm:$0xff]  }
  0x1f   : > { %436 = vst.msk [vmem:[#allocation2 + $0x78] sm:$0x1] %vm430_vm2, %v2876_v7  ;;  %437 = vst.msk [vmem:[#allocation2 + $0x90] sm:$0x1] %vm430_vm2, %v2876_v7  ;;  %v358_v27 = vadd.f32 %v2943_v1, %v322_v19  ;;  %v359_v28 = vadd.f32 %v2943_v1, %v323_v20  ;;  %v360_v29 = vadd.f32 %v2943_v1, %v324_v21  ;;  %v2445_v49 = vunpack.c.h.bf16 %v2522_v35 }
  0x20   : > { %438 = vst.msk [vmem:[#allocation2 + $0xa8] sm:$0x1] %vm430_vm2, %v2876_v7  ;;  %439 = vst.msk [vmem:[#allocation2 + $0xc0] sm:$0x1] %vm430_vm2, %v2876_v7  ;;  %v361_v30 = vadd.f32 %v2943_v1, %v325_v22  ;;  %v362_v31 = vadd.f32 %v2943_v1, %v326_v23  ;;  %v363_v32 = vadd.f32 %v2943_v1, %v327_v24  ;;  %v389_v36 = vmax.f32 %v357_v26, 0.0 }
  0x21   : > { %440 = vst.msk [vmem:[#allocation2 + $0xd8] sm:$0x1] %vm430_vm2, %v2876_v7  ;;  %441 = vst.msk [vmem:[#allocation2 + $0xf0] sm:$0x1] %vm430_vm2, %v2876_v7  ;;  %v364_v33 = vadd.f32 %v2943_v1, %v328_v25  ;;  %v390_v37 = vmax.f32 %v358_v27, 0.0  ;;  %v391_v38 = vmax.f32 %v359_v28, 0.0  ;;  %v2448_v50 = vunpack.c.l.bf16 %v2523_v40 }
  0x22   : > { %442 = vst.msk [vmem:[#allocation2 + $0x108] sm:$0x1] %vm430_vm2, %v2876_v7  ;;  %443 = vst.msk [vmem:[#allocation2 + $0x120] sm:$0x1] %vm430_vm2, %v2876_v7  ;;  %v392_v39 = vmax.f32 %v360_v29, 0.0  ;;  %v393_v42 = vmax.f32 %v361_v30, 0.0  ;;  %v2449_v51 = vunpack.c.h.bf16 %v2523_v40  ;;  %v2452_v52 = vunpack.c.l.bf16 %v2524_v41 }
  0x23   : > { %444 = vst.msk [vmem:[#allocation2 + $0x138] sm:$0x1] %vm430_vm2, %v2876_v7  ;;  %445 = vst.msk [vmem:[#allocation2 + $0x150] sm:$0x1] %vm430_vm2, %v2876_v7  ;;  %v394_v43 = vmax.f32 %v362_v31, 0.0  ;;  %v395_v44 = vmax.f32 %v363_v32, 0.0  ;;  %v2453_v53 = vunpack.c.h.bf16 %v2524_v41  ;;  %v329_v54 = vmul.f32 %v2440_v46, %v2938_v0 }
  0x24   : > { %446 = vst.msk [vmem:[#allocation2 + $0x168] sm:$0x1] %vm430_vm2, %v2876_v7  ;;  %447 = vst.msk [vmem:[#allocation2 + $0x180] sm:$0x1] %vm430_vm2, %v2876_v7  ;;  %v396_v45 = vmax.f32 %v364_v33, 0.0  ;;  %v330_v55 = vmul.f32 %v2441_v47, %v2938_v0  ;;  %v331_v56 = vmul.f32 %v2444_v48, %v2938_v0  ;;  %v332_v57 = vmul.f32 %v2445_v49, %v2938_v0  ;;  %v2529_v47 = vld [vmem:[%s2963_s11 + $0x60] sm:$0xff]  }
  0x25   : > { %450 = vst.msk [vmem:[#allocation2 + $0x29] sm:$0x1] %vm430_vm2, %v2876_v7  ;;  %451 = vst.msk [vmem:[#allocation2 + $0x41] sm:$0x1] %vm430_vm2, %v2876_v7  ;;  %v333_v58 = vmul.f32 %v2448_v50, %v2938_v0  ;;  %v334_v59 = vmul.f32 %v2449_v51, %v2938_v0  ;;  %v335_v60 = vmul.f32 %v2452_v52, %v2938_v0  ;;  %v2456_v23 = vunpack.c.l.bf16 %v2525_v11  ;;  %v2530_v48 = vld [vmem:[%s2963_s11 + $0x68] sm:$0xff]  }
  0x26   : > { %452 = vst.msk [vmem:[#allocation2 + $0x59] sm:$0x1] %vm430_vm2, %v2876_v7  ;;  %453 = vst.msk [vmem:[#allocation2 + $0x71] sm:$0x1] %vm430_vm2, %v2876_v7  ;;  %v336_v61 = vmul.f32 %v2453_v53, %v2938_v0  ;;  %v365_v62 = vadd.f32 %v2943_v1, %v329_v54  ;;  %v366_v63 = vadd.f32 %v2943_v1, %v330_v55  ;;  %v2457_v24 = vunpack.c.h.bf16 %v2525_v11  ;;  %v2531_v53 = vld [vmem:[%s2963_s11 + $0x70] sm:$0xff]   ;;  %v2532_v54 = vld [vmem:[%s2963_s11 + $0x78] sm:$0xff]  }
  0x27   : > { %454 = vst.msk [vmem:[#allocation2 + $0x89] sm:$0x1] %vm430_vm2, %v2876_v7  ;;  %455 = vst.msk [vmem:[#allocation2 + $0xa1] sm:$0x1] %vm430_vm2, %v2876_v7  ;;  %v367_v5 = vadd.f32 %v2943_v1, %v331_v56  ;;  %v368_v6 = vadd.f32 %v2943_v1, %v332_v57  ;;  %v370_v8 = vadd.f32 %v2943_v1, %v334_v59  ;;  %v2460_v25 = vunpack.c.l.bf16 %v2526_v12 }
  0x28   : > { %456 = vst.msk [vmem:[#allocation2 + $0xb9] sm:$0x1] %vm430_vm2, %v2876_v7  ;;  %457 = vst.msk [vmem:[#allocation2 + $0xd1] sm:$0x1] %vm430_vm2, %v2876_v7  ;;  %v371_v9 = vadd.f32 %v2943_v1, %v335_v60  ;;  %v372_v10 = vadd.f32 %v2943_v1, %v336_v61  ;;  %v397_v13 = vmax.f32 %v365_v62, 0.0  ;;  %v398_v14 = vmax.f32 %v366_v63, 0.0 }
  0x29   : > { %458 = vst.msk [vmem:[#allocation2 + $0xe9] sm:$0x1] %vm430_vm2, %v2876_v7  ;;  %459 = vst.msk [vmem:[#allocation2 + $0x101] sm:$0x1] %vm430_vm2, %v2876_v7  ;;  %v399_v15 = vmax.f32 %v367_v5, 0.0  ;;  %v400_v16 = vmax.f32 %v368_v6, 0.0  ;;  %v2461_v26 = vunpack.c.h.bf16 %v2526_v12  ;;  %v2464_v27 = vunpack.c.l.bf16 %v2527_v17 }
  0x2a   : > { %460 = vst.msk [vmem:[#allocation2 + $0x119] sm:$0x1] %vm430_vm2, %v2876_v7  ;;  %461 = vst.msk [vmem:[#allocation2 + $0x131] sm:$0x1] %vm430_vm2, %v2876_v7  ;;  %v402_v20 = vmax.f32 %v370_v8, 0.0  ;;  %v403_v21 = vmax.f32 %v371_v9, 0.0  ;;  %v2465_v28 = vunpack.c.h.bf16 %v2527_v17  ;;  %v2468_v29 = vunpack.c.l.bf16 %v2528_v18 }
  0x2b   : > { %462 = vst.msk [vmem:[#allocation2 + $0x149] sm:$0x1] %vm430_vm2, %v2876_v7  ;;  %463 = vst.msk [vmem:[#allocation2 + $0x161] sm:$0x1] %vm430_vm2, %v2876_v7  ;;  %v404_v22 = vmax.f32 %v372_v10, 0.0  ;;  %v2469_v30 = vunpack.c.h.bf16 %v2528_v18  ;;  %v337_v31 = vmul.f32 %v2456_v23, %v2938_v0  ;;  %v338_v32 = vmul.f32 %v2457_v24, %v2938_v0 }
  0x2c   : > { %464 = vst.msk [vmem:[#allocation2 + $0x179] sm:$0x1] %vm430_vm2, %v2876_v7  ;;  %465 = vst.msk [vmem:[#allocation2 + $0x191] sm:$0x1] %vm430_vm2, %v2876_v7  ;;  %v339_v33 = vmul.f32 %v2460_v25, %v2938_v0  ;;  %v340_v34 = vmul.f32 %v2461_v26, %v2938_v0  ;;  %v341_v35 = vmul.f32 %v2464_v27, %v2938_v0  ;;  %v2472_v59 = vunpack.c.l.bf16 %v2529_v47 }
  0x2d   : > { %431 = vst.msk [vmem:[#allocation2] sm:$0x1] %vm430_vm2, %v2876_v7  ;;  %448 = vst.msk [vmem:[#allocation2 + $0x198] sm:$0x1] %vm430_vm2, %v2876_v7  ;;  %v374_v40 = vadd.f32 %v2943_v1, %v338_v32  ;;  %v2473_v60 = vunpack.c.h.bf16 %v2529_v47  ;;  %v2476_v61 = vunpack.c.l.bf16 %v2530_v48  ;;  %v2477_v62 = vunpack.c.h.bf16 %v2530_v48 }
  0x2e   : > { %449 = vst.msk [vmem:[#allocation2 + $0x11] sm:$0x1] %vm430_vm2, %v2876_v7  ;;  %466 = vst.msk [vmem:[#allocation2 + $0x1a9] sm:$0x1] %vm430_vm2, %v2876_v7  ;;  %v369_v7 = vadd.f32 %v2943_v1, %v333_v58  ;;  %v375_v41 = vadd.f32 %v2943_v1, %v339_v33  ;;  %v2480_v63 = vunpack.c.l.bf16 %v2531_v53  ;;  %v2481_v5 = vunpack.c.h.bf16 %v2531_v53 }
  0x2f   : > { %468 = vst.msk [vmem:[#allocation2 + $0x19] sm:$0xff] %vm421_vm0, %v389_v36  ;;  %469 = vst.msk [vmem:[#allocation2 + $0x21] sm:$0xff] %vm421_vm0, %v390_v37  ;;  %v342_v36 = vmul.f32 %v2465_v28, %v2938_v0  ;;  %v343_v37 = vmul.f32 %v2468_v29, %v2938_v0  ;;  %v406_v50 = vmax.f32 %v374_v40, 0.0  ;;  %v2484_v6 = vunpack.c.l.bf16 %v2532_v54 }
  0x30   : > { %470 = vst.msk [vmem:[#allocation2 + $0x31] sm:$0xff] %vm421_vm0, %v391_v38  ;;  %471 = vst.msk [vmem:[#allocation2 + $0x39] sm:$0xff] %vm421_vm0, %v392_v39  ;;  %v401_v19 = vmax.f32 %v369_v7, 0.0  ;;  %v344_v38 = vmul.f32 %v2469_v30, %v2938_v0  ;;  %v373_v39 = vadd.f32 %v2943_v1, %v337_v31  ;;  %v407_v51 = vmax.f32 %v375_v41, 0.0 }
  0x31   : > { %472 = vst.msk [vmem:[#allocation2 + $0x49] sm:$0xff] %vm421_vm0, %v393_v42  ;;  %473 = vst.msk [vmem:[#allocation2 + $0x51] sm:$0xff] %vm421_vm0, %v394_v43  ;;  %v376_v42 = vadd.f32 %v2943_v1, %v340_v34  ;;  %v377_v43 = vadd.f32 %v2943_v1, %v341_v35  ;;  %v2485_v7 = vunpack.c.h.bf16 %v2532_v54  ;;  %v345_v8 = vmul.f32 %v2472_v59, %v2938_v0 }
  0x32   : > { %474 = vst.msk [vmem:[#allocation2 + $0x61] sm:$0xff] %vm421_vm0, %v395_v44  ;;  %475 = vst.msk [vmem:[#allocation2 + $0x69] sm:$0xff] %vm421_vm0, %v396_v45  ;;  %v378_v44 = vadd.f32 %v2943_v1, %v342_v36  ;;  %v379_v45 = vadd.f32 %v2943_v1, %v343_v37  ;;  %v380_v46 = vadd.f32 %v2943_v1, %v344_v38  ;;  %v405_v49 = vmax.f32 %v373_v39, 0.0 }
  0x33   : > { %476 = vst.msk [vmem:[#allocation2 + $0x79] sm:$0xff] %vm421_vm0, %v397_v13  ;;  %477 = vst.msk [vmem:[#allocation2 + $0x81] sm:$0xff] %vm421_vm0, %v398_v14  ;;  %v408_v52 = vmax.f32 %v376_v42, 0.0  ;;  %v409_v55 = vmax.f32 %v377_v43, 0.0  ;;  %v346_v9 = vmul.f32 %v2473_v60, %v2938_v0  ;;  %v347_v10 = vmul.f32 %v2476_v61, %v2938_v0 }
  0x34   : > { %478 = vst.msk [vmem:[#allocation2 + $0x91] sm:$0xff] %vm421_vm0, %v399_v15  ;;  %479 = vst.msk [vmem:[#allocation2 + $0x99] sm:$0xff] %vm421_vm0, %v400_v16  ;;  %v410_v56 = vmax.f32 %v378_v44, 0.0  ;;  %v411_v57 = vmax.f32 %v379_v45, 0.0  ;;  %v412_v58 = vmax.f32 %v380_v46, 0.0  ;;  %v348_v11 = vmul.f32 %v2477_v62, %v2938_v0 }
  0x35   : > { %480 = vst.msk [vmem:[#allocation2 + $0xa9] sm:$0xff] %vm421_vm0, %v401_v19  ;;  %481 = vst.msk [vmem:[#allocation2 + $0xb1] sm:$0xff] %vm421_vm0, %v402_v20  ;;  %v349_v12 = vmul.f32 %v2480_v63, %v2938_v0  ;;  %v350_v13 = vmul.f32 %v2481_v5, %v2938_v0  ;;  %v351_v14 = vmul.f32 %v2484_v6, %v2938_v0 }
  0x36   : > { %482 = vst.msk [vmem:[#allocation2 + $0xc1] sm:$0xff] %vm421_vm0, %v403_v21  ;;  %483 = vst.msk [vmem:[#allocation2 + $0xc9] sm:$0xff] %vm421_vm0, %v404_v22  ;;  %v352_v15 = vmul.f32 %v2485_v7, %v2938_v0  ;;  %v381_v16 = vadd.f32 %v2943_v1, %v345_v8  ;;  %v382_v17 = vadd.f32 %v2943_v1, %v346_v9 }
  0x37   : > { %484 = vst.msk [vmem:[#allocation2 + $0xd9] sm:$0xff] %vm421_vm0, %v405_v49  ;;  %485 = vst.msk [vmem:[#allocation2 + $0xe1] sm:$0xff] %vm421_vm0, %v406_v50  ;;  %v383_v18 = vadd.f32 %v2943_v1, %v347_v10  ;;  %v384_v19 = vadd.f32 %v2943_v1, %v348_v11  ;;  %v385_v20 = vadd.f32 %v2943_v1, %v349_v12 }
  0x38   : > { %486 = vst.msk [vmem:[#allocation2 + $0xf1] sm:$0xff] %vm421_vm0, %v407_v51  ;;  %487 = vst.msk [vmem:[#allocation2 + $0xf9] sm:$0xff] %vm421_vm0, %v408_v52  ;;  %v386_v21 = vadd.f32 %v2943_v1, %v350_v13  ;;  %v387_v22 = vadd.f32 %v2943_v1, %v351_v14  ;;  %v388_v23 = vadd.f32 %v2943_v1, %v352_v15  ;;  %v413_v24 = vmax.f32 %v381_v16, 0.0 }
  0x39   : > { %488 = vst.msk [vmem:[#allocation2 + $0x109] sm:$0xff] %vm421_vm0, %v409_v55  ;;  %489 = vst.msk [vmem:[#allocation2 + $0x111] sm:$0xff] %vm421_vm0, %v410_v56  ;;  %v414_v25 = vmax.f32 %v382_v17, 0.0  ;;  %v415_v26 = vmax.f32 %v383_v18, 0.0  ;;  %v416_v0 = vmax.f32 %v384_v19, 0.0  ;;  %v417_v27 = vmax.f32 %v385_v20, 0.0 }
  0x3a   : > { %490 = vst.msk [vmem:[#allocation2 + $0x121] sm:$0xff] %vm421_vm0, %v411_v57  ;;  %491 = vst.msk [vmem:[#allocation2 + $0x129] sm:$0xff] %vm421_vm0, %v412_v58  ;;  %v418_v28 = vmax.f32 %v386_v21, 0.0  ;;  %v419_v29 = vmax.f32 %v387_v22, 0.0  ;;  %v420_v30 = vmax.f32 %v388_v23, 0.0 }
  0x3b   : > { %492 = vst.msk [vmem:[#allocation2 + $0x139] sm:$0xff] %vm421_vm0, %v413_v24  ;;  %493 = vst.msk [vmem:[#allocation2 + $0x141] sm:$0xff] %vm421_vm0, %v414_v25 }
  0x3c   : > { %494 = vst.msk [vmem:[#allocation2 + $0x151] sm:$0xff] %vm421_vm0, %v415_v26  ;;  %495 = vst.msk [vmem:[#allocation2 + $0x159] sm:$0xff] %vm421_vm0, %v416_v0 }
  0x3d   : > { %496 = vst.msk [vmem:[#allocation2 + $0x169] sm:$0xff] %vm421_vm0, %v417_v27  ;;  %497 = vst.msk [vmem:[#allocation2 + $0x171] sm:$0xff] %vm421_vm0, %v418_v28 }
  0x3e   : > { %498 = vst.msk [vmem:[#allocation2 + $0x181] sm:$0xff] %vm421_vm0, %v419_v29  ;;  %499 = vst.msk [vmem:[#allocation2 + $0x189] sm:$0xff] %vm421_vm0, %v420_v30 }
  0x3f PF: > { %v2231_v1 = vld [vmem:[%s3788_s3 + $0x4] sm:$0xf]  ;;  %vm579_vm3 = vcmask 1043456   ;;  %s2230_s29 = smul.u32 192, %s2858_s15  ;;  %v527_v32 = vld [vmem:[%s3788_s3] sm:$0xf] }
  0x40   : > { %2786 = vmatprep.subr.msk.bf16.mxu1 %vm579_vm3, %v2231_v1  ;;  %2785 = vmatprep.subr.msk.bf16.mxu0 %vm579_vm3, %v2231_v1  ;;  %v581_v31 = vsel %vm579_vm3, %v2231_v1, 0  ;;  %v2248_v33 = vld [vmem:[%s3788_s3 + $0x8] sm:$0xf]  ;;  %vm554_vm4 = vcmask 64512   ;;  %v705_v48 = vsel %vm579_vm3, %v527_v32, 0 }
  0x41   : > { %2784 = vmatpush3.bf16.msra.mxu1 %v581_v31  ;;  %2622 = vmatpush3.bf16.msra.mxu0 %v581_v31  ;;  %s3141_s8 = scalar_lea.vmem [#allocation2], %s2230_s29  ;;  %v855_v45 = vsel %vm579_vm3, %v2248_v33, 0  ;;  %v2275_v54 = vld [vmem:[%s3788_s3 + $0xc] sm:$0xf]  ;;  %v2300_v5 = vld [vmem:[%s3788_s3 + $0x10] sm:$0xf] }
  0x42   : > { %2787 = vmatprep.subr.msk.bf16.mxu1 %vm579_vm3, %v527_v32  ;;  %2788 = vmatprep.subr.msk.bf16.mxu0 %vm579_vm3, %v2248_v33  ;;  %v1190_v19 = vsel %vm579_vm3, %v2300_v5, 0  ;;  %v1024_v21 = vsel %vm579_vm3, %v2275_v54, 0  ;;  %v2325_v24 = vld [vmem:[%s3788_s3 + $0x14] sm:$0xf]  ;;  %v2352_v0 = vld [vmem:[%s3788_s3 + $0x18] sm:$0xf] }
  0x43   : > { %s2421_s29 = sshll.u32 %s2858_s15, 6 }
  0x44   : > { %s3515_s30 = scalar_lea.vmem %s2968_s14, %s2421_s29 }
  0x45   : > { %v528_v34 = vld [vmem:[%s3141_s8 + $0x1] sm:$0xff]  ;;  %v529_v35 = vld [vmem:[%s3141_s8 + $0x9] sm:$0xff]  ;;  %v530_v39 = vld [vmem:[%s3141_s8 + $0x19] sm:$0xff] }
  0x46   : > { %v536_v36 = vld [vmem:[%s3141_s8 + $0x61] sm:$0xff]  ;;  %v544_v37 = vpack.c.bf16 %v529_v35, %v528_v34  ;;  %v537_v38 = vld [vmem:[%s3141_s8 + $0x69] sm:$0xff]  ;;  %v538_v43 = vld [vmem:[%s3141_s8 + $0x79] sm:$0xff] }
  0x47   : > { %v531_v40 = vld [vmem:[%s3141_s8 + $0x21] sm:$0xff]  ;;  %v3151_v41 = vpack.c.bf16 %v537_v38, %v536_v36  ;;  %v532_v46 = vld [vmem:[%s3141_s8 + $0x31] sm:$0xff]  ;;  %v533_v49 = vld [vmem:[%s3141_s8 + $0x39] sm:$0xff] }
  0x48   : > { %v3153_v42 = vpack.c.bf16 %v531_v40, %v530_v39  ;;  %v539_v44 = vld [vmem:[%s3141_s8 + $0x81] sm:$0xff]  ;;  %2623 = vmatprep.mubr.msk.bf16.mxu0 %vm554_vm4, %v544_v37  ;;  %v540_v50 = vld [vmem:[%s3141_s8 + $0x91] sm:$0xff]  ;;  %v541_v51 = vld [vmem:[%s3141_s8 + $0x99] sm:$0xff]  ;;  %v3170_v52 = vpack.c.bf16 %v533_v49, %v532_v46 }
  0x49   : > { %v3160_v47 = vpack.c.bf16 %v539_v44, %v538_v43  ;;  %2631 = vmatprep.mubr.msk.bf16.mxu1 %vm554_vm4, %v3151_v41  ;;  %v3172_v53 = vpack.c.bf16 %v541_v51, %v540_v50  ;;  %v534_v55 = vld [vmem:[%s3141_s8 + $0x49] sm:$0xff]  ;;  %v535_v56 = vld [vmem:[%s3141_s8 + $0x51] sm:$0xff]  ;;  %v503_v61 = vld [vmem:[%s3141_s8] sm:$0xff] }
  0x4a   : > { %2624 = vmatmul.mubr.msk.bf16.vlgmr.msra.gmra.mxu0 %vm554_vm4, %v3153_v42  ;;  %v542_v57 = vld [vmem:[%s3141_s8 + $0xa9] sm:$0xff]  ;;  %v543_v58 = vld [vmem:[%s3141_s8 + $0xb1] sm:$0xff]  ;;  %v3192_v63 = vpack.c.bf16 %v535_v56, %v534_v55  ;;  %v806_v9 = vld [vmem:[%s3141_s8 + $0x1a] sm:$0xff] }
  0x4b   : > { %2632 = vmatmul.mubr.msk.bf16.vlgmr.msra.gmra.mxu1 %vm554_vm4, %v3160_v47  ;;  %2658 = vmatpush3.bf16.msra.mxu0 %v855_v45  ;;  %v804_v59 = vld [vmem:[%s3141_s8 + $0x2] sm:$0xff]  ;;  %v805_v60 = vld [vmem:[%s3141_s8 + $0xa] sm:$0xff]  ;;  %v3197_v6 = vpack.c.bf16 %v543_v58, %v542_v57  ;;  %v505_v11 = vld [vmem:[%s3141_s8 + $0x18] sm:$0xff]  ;;  %v1525_v58 = vsel %vm579_vm3, %v2352_v0, 0 }
  0x4c   : > { %2640 = vmatpush3.bf16.msra.mxu1 %v705_v48  ;;  %2627 = vmatprep.mubr.msk.bf16.mxu0 %vm554_vm4, %v3170_v52  ;;  %v504_v62 = vld [vmem:[%s3141_s8 + $0x8] sm:$0xff]  ;;  %v820_v7 = vpack.c.bf16 %v805_v60, %v804_v59  ;;  %v506_v12 = vld [vmem:[%s3141_s8 + $0x20] sm:$0xff]  ;;  %v507_v13 = vld [vmem:[%s3141_s8 + $0x30] sm:$0xff]  ;;  %v1356_v59 = vsel %vm579_vm3, %v2325_v24, 0 }
  0x4d   : > { %2635 = vmatprep.mubr.msk.bf16.mxu1 %vm554_vm4, %v3172_v53  ;;  %2789 = vmatprep.subr.msk.bf16.mxu1 %vm579_vm3, %v2275_v54  ;;  %v519_v8 = vpack.c.bf16 %v504_v62, %v503_v61  ;;  %v807_v10 = vld [vmem:[%s3141_s8 + $0x22] sm:$0xff]  ;;  %v508_v14 = vld [vmem:[%s3141_s8 + $0x38] sm:$0xff]  ;;  %v520_v18 = vpack.c.bf16 %v506_v12, %v505_v11  ;;  %v810_v25 = vld [vmem:[%s3141_s8 + $0x4a] sm:$0xff] }
  0x4e   : > { %2790 = vmatprep.subr.msk.bf16.mxu0 %vm579_vm3, %v2300_v5  ;;  %v3212_v15 = vpack.c.bf16 %v807_v10, %v806_v9  ;;  %v808_v16 = vld [vmem:[%s3141_s8 + $0x32] sm:$0xff]  ;;  %v809_v17 = vld [vmem:[%s3141_s8 + $0x3a] sm:$0xff]  ;;  %v3217_v20 = vpack.c.bf16 %v508_v14, %v507_v13  ;;  %v509_v23 = vld [vmem:[%s3141_s8 + $0x48] sm:$0xff] }
  0x4f   : > { %v3220_v22 = vpack.c.bf16 %v809_v17, %v808_v16  ;;  %v811_v26 = vld [vmem:[%s3141_s8 + $0x52] sm:$0xff]  ;;  %v812_v28 = vld [vmem:[%s3141_s8 + $0x62] sm:$0xff]  ;;  %v813_v29 = vld [vmem:[%s3141_s8 + $0x6a] sm:$0xff] }
  0x50   : > { %v510_v27 = vld [vmem:[%s3141_s8 + $0x50] sm:$0xff]  ;;  %v511_v30 = vld [vmem:[%s3141_s8 + $0x60] sm:$0xff]  ;;  %v512_v1 = vld [vmem:[%s3141_s8 + $0x68] sm:$0xff]  ;;  %v3244_v31 = vpack.c.bf16 %v811_v26, %v810_v25  ;;  %v3249_v33 = vpack.c.bf16 %v813_v29, %v812_v28 }
  0x51   : > { %v3247_v32 = vpack.c.bf16 %v510_v27, %v509_v23  ;;  %v3251_v34 = vpack.c.bf16 %v512_v1, %v511_v30  ;;  %v513_v35 = vld [vmem:[%s3141_s8 + $0x78] sm:$0xff]  ;;  %v815_v37 = vld [vmem:[%s3141_s8 + $0x82] sm:$0xff]  ;;  %v515_v43 = vld [vmem:[%s3141_s8 + $0x90] sm:$0xff] }
  0x52   : > { %2628 = vmatmul.mubr.msk.bf16.gmra.mxu0 %vm554_vm4, %v3192_v63  ;;  %v814_v36 = vld [vmem:[%s3141_s8 + $0x7a] sm:$0xff]  ;;  %v816_v39 = vld [vmem:[%s3141_s8 + $0x92] sm:$0xff]  ;;  %v818_v50 = vld [vmem:[%s3141_s8 + $0xaa] sm:$0xff] }
  0x53   : > { %2636 = vmatmul.mubr.msk.bf16.gmra.mxu1 %vm554_vm4, %v3197_v6  ;;  %2659 = vmatprep.mubr.msk.bf16.mxu0 %vm554_vm4, %v820_v7  ;;  %v514_v38 = vld [vmem:[%s3141_s8 + $0x80] sm:$0xff]  ;;  %v516_v44 = vld [vmem:[%s3141_s8 + $0x98] sm:$0xff]  ;;  %v3269_v45 = vpack.c.bf16 %v815_v37, %v814_v36  ;;  %v517_v54 = vld [vmem:[%s3141_s8 + $0xa8] sm:$0xff] }
  0x54   : > { %2641 = vmatprep.mubr.msk.bf16.mxu1 %vm554_vm4, %v519_v8  ;;  %v817_v40 = vld [vmem:[%s3141_s8 + $0x9a] sm:$0xff]  ;;  %v524_v46 = vpack.c.bf16 %v514_v38, %v513_v35  ;;  %v525_v49 = vpack.c.bf16 %v516_v44, %v515_v43  ;;  %v819_v51 = vld [vmem:[%s3141_s8 + $0xb2] sm:$0xff]  ;;  %v2299_v62 = vld [vmem:[%s3141_s8 + $0xc9] sm:$0xff] }
  0x55   : > { %v3271_v48 = vpack.c.bf16 %v817_v40, %v816_v39  ;;  %v518_v55 = vld [vmem:[%s3141_s8 + $0xb0] sm:$0xff]  ;;  %v3283_v56 = vpack.c.bf16 %v819_v51, %v818_v50  ;;  %v2377_v60 = vld [vmem:[%s3788_s3 + $0x1c] sm:$0xf]  ;;  %v2298_v61 = vld [vmem:[%s3141_s8 + $0xc1] sm:$0xff] }
  0x56   : > { %v526_v57 = vpack.c.bf16 %v518_v55, %v517_v54  ;;  %v2273_v5 = vld [vmem:[%s3141_s8 + $0xc0] sm:$0xff]  ;;  %v2274_v7 = vld [vmem:[%s3141_s8 + $0xc8] sm:$0xff]  ;;  %v1162_v8 = vpack.c.bf16 %v2299_v62, %v2298_v61  ;;  %v1691_v11 = vsel %vm579_vm3, %v2377_v60, 0  ;;  %v2350_v12 = vld [vmem:[%s3141_s8 + $0xd8] sm:$0xff] }
  0x57   : > { %v996_v9 = vpack.c.bf16 %v2274_v7, %v2273_v5  ;;  %v2351_v13 = vld [vmem:[%s3141_s8 + $0xe0] sm:$0xff] }
  0x58   : > { %v2323_v14 = vld [vmem:[%s3141_s8 + $0xc2] sm:$0xff]  ;;  %v1497_v16 = vpack.c.bf16 %v2351_v13, %v2350_v12 }
  0x5a   : > { %2660 = vmatmul.mubr.msk.bf16.vlgmr.msra.gmra.mxu0 %vm554_vm4, %v3212_v15 }
  0x5b   : > { %2642 = vmatmul.mubr.msk.bf16.vlgmr.msra.gmra.mxu1 %vm554_vm4, %v520_v18  ;;  %2694 = vmatpush3.bf16.msra.mxu0 %v1190_v19 }
  0x5c   : > { %2676 = vmatpush3.bf16.msra.mxu1 %v1024_v21  ;;  %2645 = vmatprep.mubr.msk.bf16.mxu1 %vm554_vm4, %v3217_v20 }
  0x5d   : > { %2663 = vmatprep.mubr.msk.bf16.mxu0 %vm554_vm4, %v3220_v22  ;;  %2791 = vmatprep.subr.msk.bf16.mxu1 %vm579_vm3, %v2325_v24 }
  0x5e   : > { %2792 = vmatprep.subr.msk.bf16.mxu0 %vm579_vm3, %v2352_v0 }
  0x62   : > { %2664 = vmatmul.mubr.msk.bf16.gmra.mxu0 %vm554_vm4, %v3244_v31 }
  0x63   : > { %2646 = vmatmul.mubr.msk.bf16.gmra.mxu1 %vm554_vm4, %v3247_v32  ;;  %2667 = vmatprep.mubr.msk.bf16.mxu0 %vm554_vm4, %v3249_v33 }
  0x64   : > { %2649 = vmatprep.mubr.msk.bf16.mxu1 %vm554_vm4, %v3251_v34 }
  0x6a   : > { %2668 = vmatmul.mubr.msk.bf16.gmra.mxu0 %vm554_vm4, %v3269_v45 }
  0x6b   : > { %2650 = vmatmul.mubr.msk.bf16.gmra.mxu1 %vm554_vm4, %v524_v46  ;;  %2671 = vmatprep.mubr.msk.bf16.mxu0 %vm554_vm4, %v3271_v48 }
  0x6c   : > { %2653 = vmatprep.mubr.msk.bf16.mxu1 %vm554_vm4, %v525_v49 }
  0x72   : > { %2672 = vmatmul.mubr.msk.bf16.gmra.mxu0 %vm554_vm4, %v3283_v56 }
  0x73   : > { %2654 = vmatmul.mubr.msk.bf16.gmra.mxu1 %vm554_vm4, %v526_v57  ;;  %2695 = vmatprep.mubr.msk.bf16.mxu0 %vm554_vm4, %v3153_v42  ;;  %v2402_v42 = vld [vmem:[%s3788_s3 + $0x20] sm:$0xf] }
  0x74   : > { %2677 = vmatprep.mubr.msk.bf16.mxu1 %vm554_vm4, %v520_v18  ;;  %v1857_v10 = vsel %vm579_vm3, %v2402_v42, 0 }
  0x7a   : > { %2696 = vmatmul.mubr.msk.bf16.vlgmr.msra.gmra.mxu0 %vm554_vm4, %v3170_v52 }
  0x7b   : > { %2678 = vmatmul.mubr.msk.bf16.vlgmr.msra.gmra.mxu1 %vm554_vm4, %v3217_v20  ;;  %2730 = vmatpush3.bf16.msra.mxu0 %v1525_v58 }
  0x7c   : > { %2712 = vmatpush3.bf16.msra.mxu1 %v1356_v59  ;;  %2681 = vmatprep.mubr.msk.bf16.mxu1 %vm554_vm4, %v3247_v32 }
  0x7d   : > { %2699 = vmatprep.mubr.msk.bf16.mxu0 %vm554_vm4, %v3192_v63  ;;  %2793 = vmatprep.subr.msk.bf16.mxu1 %vm579_vm3, %v2377_v60 }
  0x7e   : > { %2794 = vmatprep.subr.msk.bf16.mxu0 %vm579_vm3, %v2402_v42 }
  0x82   : > { %2700 = vmatmul.mubr.msk.bf16.gmra.mxu0 %vm554_vm4, %v3151_v41 }
  0x83   : > { %2682 = vmatmul.mubr.msk.bf16.gmra.mxu1 %vm554_vm4, %v3251_v34  ;;  %2703 = vmatprep.mubr.msk.bf16.mxu0 %vm554_vm4, %v3160_v47 }
  0x84   : > { %2685 = vmatprep.mubr.msk.bf16.mxu1 %vm554_vm4, %v524_v46 }
  0x8a   : > { %2704 = vmatmul.mubr.msk.bf16.gmra.mxu0 %vm554_vm4, %v3172_v53 }
  0x8b   : > { %2686 = vmatmul.mubr.msk.bf16.gmra.mxu1 %vm554_vm4, %v525_v49  ;;  %2707 = vmatprep.mubr.msk.bf16.mxu0 %vm554_vm4, %v3197_v6 }
  0x8c   : > { %2689 = vmatprep.mubr.msk.bf16.mxu1 %vm554_vm4, %v526_v57 }
  0x92   : > { %2708 = vmatmul.mubr.msk.bf16.gmra.mxu0 %vm554_vm4, %v1162_v8 }
  0x93   : > { %2690 = vmatmul.mubr.msk.bf16.gmra.mxu1 %vm554_vm4, %v996_v9  ;;  %2731 = vmatprep.mubr.msk.bf16.mxu0 %vm554_vm4, %v3217_v20 }
  0x94   : > { %2713 = vmatprep.mubr.msk.bf16.mxu1 %vm554_vm4, %v3212_v15  ;;  %v2324_v15 = vld [vmem:[%s3141_s8 + $0xca] sm:$0xff] }
  0x95   : > { %v1328_v17 = vpack.c.bf16 %v2324_v15, %v2323_v14 }
  0x9a   : > { %2732 = vmatmul.mubr.msk.bf16.vlgmr.msra.gmra.mxu0 %vm554_vm4, %v3247_v32 }
  0x9b   : > { %2714 = vmatmul.mubr.msk.bf16.vlgmr.msra.gmra.mxu1 %vm554_vm4, %v3220_v22  ;;  %2766 = vmatpush3.bf16.msra.mxu0 %v1857_v10 }
  0x9c   : > { %2748 = vmatpush3.bf16.msra.mxu1 %v1691_v11  ;;  %2717 = vmatprep.mubr.msk.bf16.mxu1 %vm554_vm4, %v3244_v31 }
  0x9d   : > { %2735 = vmatprep.mubr.msk.bf16.mxu0 %vm554_vm4, %v3251_v34 }
  0xa2   : > { %2736 = vmatmul.mubr.msk.bf16.gmra.mxu0 %vm554_vm4, %v524_v46 }
  0xa3   : > { %2718 = vmatmul.mubr.msk.bf16.gmra.mxu1 %vm554_vm4, %v3249_v33  ;;  %2739 = vmatprep.mubr.msk.bf16.mxu0 %vm554_vm4, %v525_v49 }
  0xa4   : > { %2721 = vmatprep.mubr.msk.bf16.mxu1 %vm554_vm4, %v3269_v45 }
  0xaa   : > { %2740 = vmatmul.mubr.msk.bf16.gmra.mxu0 %vm554_vm4, %v526_v57 }
  0xab   : > { %2722 = vmatmul.mubr.msk.bf16.gmra.mxu1 %vm554_vm4, %v3271_v48  ;;  %2743 = vmatprep.mubr.msk.bf16.mxu0 %vm554_vm4, %v996_v9 }
  0xac   : > { %2725 = vmatprep.mubr.msk.bf16.mxu1 %vm554_vm4, %v3283_v56 }
  0xb2   : > { %2744 = vmatmul.mubr.msk.bf16.gmra.mxu0 %vm554_vm4, %v1497_v16 }
  0xb3   : > { %2726 = vmatmul.mubr.msk.bf16.gmra.mxu1 %vm554_vm4, %v1328_v17  ;;  %2767 = vmatprep.mubr.msk.bf16.mxu0 %vm554_vm4, %v3220_v22 }
  0xb4   : > { %2749 = vmatprep.mubr.msk.bf16.mxu1 %vm554_vm4, %v3170_v52  ;;  %v2401_v52 = vld [vmem:[%s3141_s8 + $0xe2] sm:$0xff] }
  0xba   : > { %2768 = vmatmul.mubr.msk.bf16.vlgmr.msra.gmra.mxu0 %vm554_vm4, %v3244_v31 }
  0xbb   : > { %2750 = vmatmul.mubr.msk.bf16.vlgmr.msra.gmra.mxu1 %vm554_vm4, %v3192_v63  ;;  %2771 = vmatprep.mubr.msk.bf16.mxu0 %vm554_vm4, %v3249_v33  ;;  %v2375_v63 = vld [vmem:[%s3141_s8 + $0xd9] sm:$0xff] }
  0xbc   : > { %2753 = vmatprep.mubr.msk.bf16.mxu1 %vm554_vm4, %v3151_v41  ;;  %v2400_v41 = vld [vmem:[%s3141_s8 + $0xda] sm:$0xff] }
  0xbd   : > { %v1829_v18 = vpack.c.bf16 %v2401_v52, %v2400_v41 }
  0xc2   : > { %2772 = vmatmul.mubr.msk.bf16.gmra.mxu0 %vm554_vm4, %v3269_v45 }
  0xc3   : > { %2754 = vmatmul.mubr.msk.bf16.gmra.mxu1 %vm554_vm4, %v3160_v47  ;;  %2775 = vmatprep.mubr.msk.bf16.mxu0 %vm554_vm4, %v3271_v48  ;;  %v2376_v47 = vld [vmem:[%s3141_s8 + $0xe1] sm:$0xff] }
  0xc4   : > { %2757 = vmatprep.mubr.msk.bf16.mxu1 %vm554_vm4, %v3172_v53  ;;  %v1663_v19 = vpack.c.bf16 %v2376_v47, %v2375_v63 }
  0xca   : > { %2776 = vmatmul.mubr.msk.bf16.gmra.mxu0 %vm554_vm4, %v3283_v56 }
  0xcb   : > { %2758 = vmatmul.mubr.msk.bf16.gmra.mxu1 %vm554_vm4, %v3197_v6  ;;  %2779 = vmatprep.mubr.msk.bf16.mxu0 %vm554_vm4, %v1328_v17 }
  0xcc   : > { %2761 = vmatprep.mubr.msk.bf16.mxu1 %vm554_vm4, %v1162_v8 }
  0xd2   : > { %2780 = vmatmul.mubr.msk.bf16.gmra.mxu0 %vm554_vm4, %v1829_v18 }
  0xd3   : > { %2762 = vmatmul.mubr.msk.bf16.gmra.mxu1 %vm554_vm4, %v1663_v19 }
 0x10a   : > { %v2625_v53 = vpop.f32.mrf.mxu0 }
 0x10b   : > { %v2633_v20 = vpop.f32.mrf.mxu1 }
 0x10c   : > { %v617_v21 = vpop.f32.mrf.mxu0 }
 0x10d   : > { %v649_v22 = vpop.f32.mrf.mxu1 }
 0x10e   : > { %v2626_v23 = vpop.f32.mrf.mxu0 }
 0x10f   : > { %v2634_v6 = vpop.f32.mrf.mxu1 }
 0x110   : > { %v620_v24 = vpop.f32.mrf.mxu0 }
 0x111   : > { %v652_v25 = vpop.f32.mrf.mxu1 }
 0x112   : > { %v2629_v26 = vpop.f32.mrf.mxu0 }
 0x113   : > { %v2637_v0 = vpop.f32.mrf.mxu1 }
 0x114   : > { %v633_v27 = vpop.f32.mrf.mxu0 }
 0x115   : > { %v665_v28 = vpop.f32.mrf.mxu1 }
 0x116   : > { %v2630_v29 = vpop.f32.mrf.mxu0 }
 0x117   : > { %v2638_v30 = vpop.f32.mrf.mxu1 }
 0x118   : > { %v636_v1 = vpop.f32.mrf.mxu0 }
 0x119   : > { %v3392_v31 = vpop.f32.mrf.mxu1 }
 0x11a   : > { %v2661_v32 = vpop.f32.mrf.mxu0 }
 0x11b   : > { %v2643_v33 = vpop.f32.mrf.mxu1 }
 0x11c   : > { %v750_v34 = vadd.f32 %v2643_v33, %v2625_v53  ;;  %v891_v35 = vpop.f32.mrf.mxu0 }
 0x11d   : > { %v741_v36 = vpop.f32.mrf.mxu1 }
 0x11e   : > { %v3394_v37 = vadd.f32 %v2661_v32, %v750_v34  ;;  %v742_v38 = vadd.f32 %v741_v36, %v617_v21  ;;  %v2662_v39 = vpop.f32.mrf.mxu0 }
 0x11f   : > { %v2644_v40 = vpop.f32.mrf.mxu1 }
 0x120   : > { %v3396_v43 = vadd.f32 %v891_v35, %v742_v38  ;;  %v753_v44 = vadd.f32 %v2644_v40, %v2626_v23  ;;  %v894_v45 = vpop.f32.mrf.mxu0 }
 0x121   : > { %v744_v46 = vpop.f32.mrf.mxu1 }
 0x122   : > { %v3398_v48 = vadd.f32 %v2662_v39, %v753_v44  ;;  %v745_v49 = vadd.f32 %v744_v46, %v620_v24  ;;  %v2665_v50 = vpop.f32.mrf.mxu0 }
 0x123   : > { %v2647_v51 = vpop.f32.mrf.mxu1 }
 0x124   : > { %v3400_v54 = vadd.f32 %v894_v45, %v745_v49  ;;  %v766_v55 = vadd.f32 %v2647_v51, %v2629_v26  ;;  %v907_v56 = vpop.f32.mrf.mxu0 }
 0x125   : > { %v757_v57 = vpop.f32.mrf.mxu1 }
 0x126   : > { %v3402_v58 = vadd.f32 %v2665_v50, %v766_v55  ;;  %v758_v59 = vadd.f32 %v757_v57, %v633_v27  ;;  %v2666_v60 = vpop.f32.mrf.mxu0 }
 0x127   : > { %v2648_v42 = vpop.f32.mrf.mxu1 }
 0x128   : > { %v3404_v61 = vadd.f32 %v907_v56, %v758_v59  ;;  %v769_v62 = vadd.f32 %v2648_v42, %v2630_v29  ;;  %v910_v5 = vpop.f32.mrf.mxu0 }
 0x129   : > { %v760_v7 = vpop.f32.mrf.mxu1 }
 0x12a   : > { %v3406_v8 = vadd.f32 %v2666_v60, %v769_v62  ;;  %v761_v9 = vadd.f32 %v760_v7, %v636_v1  ;;  %v2669_v10 = vpop.f32.mrf.mxu0 }
 0x12b   : > { %v2651_v11 = vpop.f32.mrf.mxu1 }
 0x12c   : > { %v3408_v12 = vadd.f32 %v910_v5, %v761_v9  ;;  %v782_v13 = vadd.f32 %v2651_v11, %v2633_v20  ;;  %v923_v14 = vpop.f32.mrf.mxu0 }
 0x12d   : > { %v773_v15 = vpop.f32.mrf.mxu1 }
 0x12e   : > { %v3410_v16 = vadd.f32 %v2669_v10, %v782_v13  ;;  %v774_v17 = vadd.f32 %v773_v15, %v649_v22  ;;  %v2670_v41 = vpop.f32.mrf.mxu0 }
 0x12f   : > { %v2652_v52 = vpop.f32.mrf.mxu1 }
 0x130   : > { %v3412_v63 = vadd.f32 %v923_v14, %v774_v17  ;;  %v785_v47 = vadd.f32 %v2652_v52, %v2634_v6  ;;  %v926_v18 = vpop.f32.mrf.mxu0 }
 0x131   : > { %v776_v19 = vpop.f32.mrf.mxu1 }
 0x132   : > { %v3414_v53 = vadd.f32 %v2670_v41, %v785_v47  ;;  %v777_v21 = vadd.f32 %v776_v19, %v652_v25  ;;  %v2673_v23 = vpop.f32.mrf.mxu0 }
 0x133   : > { %v2655_v24 = vpop.f32.mrf.mxu1 }
 0x134   : > { %v3416_v26 = vadd.f32 %v926_v18, %v777_v21  ;;  %v798_v20 = vadd.f32 %v2655_v24, %v2637_v0  ;;  %v939_v27 = vpop.f32.mrf.mxu0 }
 0x135   : > { %v789_v29 = vpop.f32.mrf.mxu1 }
 0x136   : > { %3790 = vst [vmem:[#allocation3_spill] sm:$0xff] %v3416_v26  ;;  %v3418_v1 = vadd.f32 %v2673_v23, %v798_v20  ;;  %v790_v22 = vadd.f32 %v789_v29, %v665_v28  ;;  %v2674_v32 = vpop.f32.mrf.mxu0 }
 0x137   : > { %v2656_v33 = vpop.f32.mrf.mxu1 }
 0x138   : > { %3791 = vst [vmem:[#allocation4_spill] sm:$0xff] %v3418_v1  ;;  %v3420_v34 = vadd.f32 %v939_v27, %v790_v22  ;;  %v801_v6 = vadd.f32 %v2656_v33, %v2638_v30  ;;  %v942_v35 = vpop.f32.mrf.mxu0 }
 0x139   : > { %v792_v36 = vpop.f32.mrf.mxu1 }
 0x13a   : > { %3792 = vst [vmem:[#allocation5_spill] sm:$0xff] %v3420_v34  ;;  %v3422_v38 = vadd.f32 %v2674_v32, %v801_v6  ;;  %v793_v25 = vadd.f32 %v792_v36, %v3392_v31  ;;  %v3425_v39 = vpop.f32.mrf.mxu0 }
 0x13b   : > { %v3427_v40 = vpop.f32.mrf.mxu1 }
 0x13c   : > { %3793 = vst [vmem:[#allocation6_spill] sm:$0xff] %v3422_v38  ;;  %v3429_v0 = vadd.f32 %v942_v35, %v793_v25  ;;  %v3431_v44 = vpop.f32.mrf.mxu0 }
 0x13d   : > { %v3433_v28 = vpop.f32.mrf.mxu1 }
 0x13e   : > { %3794 = vst [vmem:[#allocation7_spill] sm:$0xff] %v3429_v0  ;;  %v3435_v45 = vpop.f32.mrf.mxu0  ;;  %v2487_v0 = vld [vmem:[%s3515_s30] sm:$0xff]  }
 0x13f   : > { %v3437_v46 = vpop.f32.mrf.mxu1  ;;  %v2489_v26 = vunpack.c.h.bf16 %v2487_v0 }
 0x140   : > { %v3439_v30 = vpop.f32.mrf.mxu0 }
 0x141   : > { %v3441_v49 = vpop.f32.mrf.mxu1 }
 0x142   : > { %v3443_v50 = vpop.f32.mrf.mxu0 }
 0x143   : > { %v3445_v31 = vpop.f32.mrf.mxu1 }
 0x144   : > { %v3447_v51 = vpop.f32.mrf.mxu0 }
 0x145   : > { %v3449_v55 = vpop.f32.mrf.mxu1 }
 0x146   : > { %v3451_v56 = vpop.f32.mrf.mxu0 }
 0x147   : > { %v3453_v57 = vpop.f32.mrf.mxu1 }
 0x148   : > { %v3455_v59 = vpop.f32.mrf.mxu0 }
 0x149   : > { %v3457_v60 = vpop.f32.mrf.mxu1 }
 0x14a   : > { %v3459_v42 = vpop.f32.mrf.mxu0 }
 0x14b   : > { %v3461_v62 = vpop.f32.mrf.mxu1 }
 0x14c   : > { %v3463_v5 = vpop.f32.mrf.mxu0 }
 0x14d   : > { %3795 = vst [vmem:[#allocation8_spill] sm:$0xff] %v3463_v5  ;;  %v3465_v7 = vpop.f32.mrf.mxu1  ;;  %v1125_v5 = vadd.f32 %v3427_v40, %v3394_v37 }
 0x14e   : > { %v3467_v9 = vpop.f32.mrf.mxu0 }
 0x14f   : > { %3796 = vst [vmem:[#allocation9_spill] sm:$0xff] %v3467_v9  ;;  %v3469_v10 = vpop.f32.mrf.mxu1  ;;  %v2534_v9 = vld [vmem:[%s3515_s30 + $0x10] sm:$0xff]  }
 0x150   : > { %3797 = vst [vmem:[#allocation10_spill] sm:$0xff] %v3469_v10  ;;  %v3471_v11 = vpop.f32.mrf.mxu0  ;;  %v2497_v10 = vunpack.c.h.bf16 %v2534_v9 }
 0x151   : > { %3798 = vst [vmem:[#allocation11_spill] sm:$0xff] %v3471_v11  ;;  %v3473_v13 = vpop.f32.mrf.mxu1  ;;  %v2535_v11 = vld [vmem:[%s3515_s30 + $0x18] sm:$0xff]  }
 0x152   : > { %3799 = vst [vmem:[#allocation12_spill] sm:$0xff] %v3473_v13  ;;  %v3475_v14 = vpop.f32.mrf.mxu0 }
 0x153   : > { %3800 = vst [vmem:[#allocation13_spill] sm:$0xff] %v3475_v14  ;;  %v3477_v15 = vpop.f32.mrf.mxu1 }
 0x154   : > { %3801 = vst [vmem:[#allocation14_spill] sm:$0xff] %v3477_v15  ;;  %v3479_v17 = vpop.f32.mrf.mxu0 }
 0x155   : > { %3802 = vst [vmem:[#allocation15_spill] sm:$0xff] %v3479_v17  ;;  %v3481_v41 = vpop.f32.mrf.mxu1 }
 0x156   : > { %3803 = vst [vmem:[#allocation16_spill] sm:$0xff] %v3481_v41  ;;  %v3483_v52 = vpop.f32.mrf.mxu0  ;;  %v2488_v41 = vunpack.c.l.bf16 %v2487_v0 }
 0x157   : > { %3804 = vst [vmem:[#allocation17_spill] sm:$0xff] %v3483_v52  ;;  %v3485_v47 = vpop.f32.mrf.mxu1  ;;  %v2533_v52 = vld [vmem:[%s3515_s30 + $0x8] sm:$0xff]  }
 0x158   : > { %3805 = vst [vmem:[#allocation18_spill] sm:$0xff] %v3485_v47  ;;  %v3487_v18 = vpop.f32.mrf.mxu0  ;;  %v2492_v38 = vunpack.c.l.bf16 %v2533_v52  ;;  %v2493_v1 = vunpack.c.h.bf16 %v2533_v52 }
 0x159   : > { %3806 = vst [vmem:[#allocation19_spill] sm:$0xff] %v3487_v18  ;;  %v3489_v19 = vpop.f32.mrf.mxu1 }
 0x15a   : > { %3807 = vst [vmem:[#allocation20_spill] sm:$0xff] %v3489_v19  ;;  %v3491_v21 = vpop.f32.mrf.mxu0 }
 0x15b   : > { %v3493_v23 = vpop.f32.mrf.mxu1 }
 0x15c   : > { %v3495_v24 = vpop.f32.mrf.mxu0 }
 0x15d   : > { %v3497_v20 = vpop.f32.mrf.mxu1 }
 0x15e   : > { %v3499_v27 = vpop.f32.mrf.mxu0 }
 0x15f   : > { %v3501_v29 = vpop.f32.mrf.mxu1 }
 0x160   : > { %v3503_v22 = vpop.f32.mrf.mxu0 }
 0x161   : > { %v3505_v32 = vpop.f32.mrf.mxu1 }
 0x162   : > { %v3508_v33 = vpop.f32.mrf.mxu0 }
 0x163   : > { %v3510_v6 = vpop.f32.mrf.mxu1 }
 0x164   : > { %v3512_v35 = vpop.f32.mrf.mxu0 }
 0x165   : > { %3808 = vst [vmem:[#allocation21_spill] sm:$0xff] %v3512_v35  ;;  %v3517_v36 = vpop.f32.mrf.mxu1  ;;  %v2014_v35 = vmul.f32 %v2493_v1, %v2948_v2 }
 0x166   : > { %v3519_v25 = vpop.f32.mrf.mxu0 }
 0x167   : > { %3809 = vst [vmem:[#allocation22_spill] sm:$0xff] %v3519_v25  ;;  %v3521_v18 = vpop.f32.mrf.mxu1 }
 0x168   : > { %v3524_v19 = vpop.f32.mrf.mxu0 }
 0x169   : > { %3810 = vst [vmem:[#allocation23_spill] sm:$0xff] %v3524_v19  ;;  %v3527_v17 = vpop.f32.mrf.mxu1  ;;  %v2013_v19 = vmul.f32 %v2492_v38, %v2948_v2  ;;  %v2536_v38 = vld [vmem:[%s3515_s30 + $0x20] sm:$0xff]  }
 0x16a   : > { %3811 = vst [vmem:[#allocation24_spill] sm:$0xff] %v3527_v17  ;;  %v3529_v47 = vpop.f32.mrf.mxu0  ;;  %v2496_v17 = vunpack.c.l.bf16 %v2534_v9  ;;  %v1291_v9 = vadd.f32 %v3425_v39, %v1125_v5 }
 0x16b   : > { %3812 = vst [vmem:[#allocation25_spill] sm:$0xff] %v3529_v47  ;;  %v3531_v14 = vpop.f32.mrf.mxu1  ;;  %v2011_v47 = vmul.f32 %v2488_v41, %v2948_v2  ;;  %v3559_v0 = vadd.f32 %v2953_v3, %v2013_v19 }
 0x16c   : > { %3813 = vst [vmem:[#allocation26_spill] sm:$0xff] %v3531_v14  ;;  %v3533_v34 = vpop.f32.mrf.mxu0  ;;  %v2500_v14 = vunpack.c.l.bf16 %v2535_v11  ;;  %v2015_v19 = vmul.f32 %v2496_v17, %v2948_v2  ;;  %v2505_v17 = vunpack.c.h.bf16 %v2536_v38 }
 0x16d   : > { %3814 = vst [vmem:[#allocation27_spill] sm:$0xff] %v3533_v34  ;;  %v3536_v15 = vpop.f32.mrf.mxu1  ;;  %v3564_v40 = vadd.f32 %v2953_v3, %v2011_v47  ;;  %v3577_v47 = vadd.f32 %v2953_v3, %v2014_v35  ;;  %v1129_v35 = vadd.f32 %v3445_v31, %v3402_v58  ;;  %v3607_v31 = vld [vmem:[%s3515_s30 + $0x38] sm:$0xff]  }
 0x16e   : > { %3815 = vst [vmem:[#allocation28_spill] sm:$0xff] %v3536_v15  ;;  %v3539_v25 = vpop.f32.mrf.mxu0  ;;  %v2537_v15 = vld [vmem:[%s3515_s30 + $0x28] sm:$0xff]   ;;  %v2017_v1 = vmul.f32 %v2500_v14, %v2948_v2  ;;  %v2016_v14 = vmul.f32 %v2497_v10, %v2948_v2 }
 0x16f   : > { %3816 = vst [vmem:[#allocation29_spill] sm:$0xff] %v3539_v25  ;;  %v3542_v13 = vpop.f32.mrf.mxu1  ;;  %v2501_v25 = vunpack.c.h.bf16 %v2535_v11  ;;  %v2508_v11 = vunpack.c.l.bf16 %v2537_v15 }
 0x170   : > { %3817 = vst [vmem:[#allocation30_spill] sm:$0xff] %v3542_v13  ;;  %v3547_v34 = vpop.f32.mrf.mxu0  ;;  %v1123_v13 = vadd.f32 %v3433_v28, %v3396_v43  ;;  %v1126_v43 = vadd.f32 %v3437_v46, %v3398_v48  ;;  %v1124_v48 = vadd.f32 %v3441_v49, %v3400_v54  ;;  %v1457_v46 = vadd.f32 %v3493_v23, %v1291_v9 }
 0x171   : > { %3818 = vst [vmem:[#allocation31_spill] sm:$0xff] %v3547_v34  ;;  %v3550_v52 = vpop.f32.mrf.mxu1  ;;  %v2012_v34 = vmul.f32 %v2489_v26, %v2948_v2  ;;  %v2018_v26 = vmul.f32 %v2501_v25, %v2948_v2  ;;  %v3595_v10 = vadd.f32 %v2953_v3, %v2017_v1 }
 0x172   : > { %3819 = vst [vmem:[#allocation32_spill] sm:$0xff] %v3550_v52  ;;  %v3556_v41 = vpop.f32.mrf.mxu0  ;;  %v1289_v39 = vadd.f32 %v3431_v44, %v1123_v13  ;;  %v2021_v44 = vmul.f32 %v2508_v11, %v2948_v2  ;;  %v1292_v54 = vadd.f32 %v3435_v45, %v1126_v43  ;;  %v3617_v45 = vadd.f32 %v2953_v3, %v2016_v14 }
 0x173   : > { %3820 = vst [vmem:[#allocation33_spill] sm:$0xff] %v3556_v41  ;;  %v3561_v37 = vpop.f32.mrf.mxu1  ;;  %v2504_v41 = vunpack.c.l.bf16 %v2536_v38  ;;  %v3592_v25 = vadd.f32 %v2953_v3, %v2012_v34  ;;  %v1127_v34 = vadd.f32 %v3449_v55, %v3404_v61  ;;  %v3614_v38 = vadd.f32 %v2953_v3, %v2018_v26 }
 0x174   : > { %3821 = vst [vmem:[#allocation34_spill] sm:$0xff] %v3561_v37  ;;  %v3571_v28 = vpop.f32.mrf.mxu0  ;;  %v2509_v37 = vunpack.c.h.bf16 %v2537_v15  ;;  %v1455_v49 = vadd.f32 %v3497_v20, %v1289_v39  ;;  %v3603_v15 = vadd.f32 %v2953_v3, %v2015_v19  ;;  %v1290_v1 = vadd.f32 %v3439_v30, %v1124_v48 }
 0x175   : > { %3822 = vst [vmem:[#allocation35_spill] sm:$0xff] %v3571_v28  ;;  %v3574_v52 = vpop.f32.mrf.mxu1  ;;  %v2019_v58 = vmul.f32 %v2504_v41, %v2948_v2  ;;  %v1626_v11 = vadd.f32 %v3491_v21, %v1457_v46  ;;  %v1458_v41 = vadd.f32 %v3501_v29, %v1292_v54  ;;  %v2020_v43 = vmul.f32 %v2505_v17, %v2948_v2 }
 0x176   : > { %v3585_v5 = vpop.f32.mrf.mxu0  ;;  %v2022_v20 = vmul.f32 %v2509_v37, %v2948_v2  ;;  %v1295_v61 = vadd.f32 %v3443_v50, %v1129_v35  ;;  %v1130_v55 = vadd.f32 %v3453_v57, %v3406_v8  ;;  %v3628_v26 = vadd.f32 %v2953_v3, %v2021_v44 }
 0x177   : > { %v3589_v28 = vpop.f32.mrf.mxu1  ;;  %v2516_v37 = vunpack.c.l.bf16 %v3607_v31  ;;  %v1624_v30 = vadd.f32 %v3495_v24, %v1455_v49  ;;  %v1456_v21 = vadd.f32 %v3505_v32, %v1290_v1  ;;  %v3634_v39 = vadd.f32 %v2953_v3, %v2019_v58 }
 0x178   : > { %v3600_v13 = vpop.f32.mrf.mxu0  ;;  %v1293_v50 = vadd.f32 %v3447_v51, %v1127_v34  ;;  %v1128_v8 = vadd.f32 %v3457_v60, %v3408_v12  ;;  %v1461_v57 = vadd.f32 %v3510_v6, %v1295_v61  ;;  %v3641_v46 = vadd.f32 %v2953_v3, %v2022_v20 }
 0x179   : > { %v3611_v23 = vpop.f32.mrf.mxu1  ;;  %v1627_v24 = vadd.f32 %v3499_v27, %v1458_v41  ;;  %v3645_v44 = vadd.f32 %v2953_v3, %v2020_v43  ;;  %v1296_v54 = vadd.f32 %v3451_v56, %v1130_v55  ;;  %v1133_v51 = vadd.f32 %v3461_v62, %v3410_v16  ;;  %v3823_v55 = vld [vmem:[#allocation10_spill] sm:$0xff] }
 0x17a   : > { %v2769_v9 = vpop.f32.mrf.mxu0  ;;  %v1459_v12 = vadd.f32 %v3517_v36, %v1293_v50  ;;  %v3652_v6 = vmul.f32 %v2516_v37, %v2948_v2  ;;  %v1625_v49 = vadd.f32 %v3503_v22, %v1456_v21  ;;  %v1294_v1 = vadd.f32 %v3455_v59, %v1128_v8  ;;  %v3827_v50 = vld [vmem:[#allocation3_spill] sm:$0xff]  ;;  %v3828_v8 = vld [vmem:[#allocation12_spill] sm:$0xff] }
 0x17b   : > { %v2751_v19 = vpop.f32.mrf.mxu1  ;;  %v1131_v56 = vadd.f32 %v3465_v7, %v3412_v63  ;;  %v1630_v16 = vadd.f32 %v3508_v33, %v1461_v57  ;;  %v1462_v62 = vadd.f32 %v3521_v18, %v1296_v54  ;;  %v1299_v61 = vadd.f32 %v3459_v42, %v1133_v51  ;;  %v3825_v7 = vld [vmem:[#allocation24_spill] sm:$0xff]  ;;  %v3829_v57 = vld [vmem:[#allocation22_spill] sm:$0xff] }
 0x17c   : > { %v1792_v14 = vadd.f32 %v2751_v19, %v1626_v11  ;;  %v1893_v29 = vpop.f32.mrf.mxu0  ;;  %v1134_v59 = vadd.f32 %v3823_v55, %v3414_v53  ;;  %v3824_v19 = vld [vmem:[#allocation21_spill] sm:$0xff]  ;;  %v1460_v33 = vadd.f32 %v3825_v7, %v1294_v1  ;;  %v1132_v53 = vadd.f32 %v3828_v8, %v3827_v50  ;;  %v3838_v55 = vld [vmem:[#allocation16_spill] sm:$0xff]  ;;  %v3840_v7 = vld [vmem:[#allocation30_spill] sm:$0xff] }
 0x17d   : > { %v1727_v48 = vpop.f32.mrf.mxu1  ;;  %v1628_v63 = vadd.f32 %v3824_v19, %v1459_v12  ;;  %v3839_v19 = vld [vmem:[#allocation25_spill] sm:$0xff]  ;;  %v3843_v50 = vld [vmem:[#allocation18_spill] sm:$0xff] }
 0x17e   : > { %v1958_v17 = vadd.f32 %v2769_v9, %v1792_v14  ;;  %v1790_v32 = vadd.f32 %v1727_v48, %v1624_v30  ;;  %v2770_v35 = vpop.f32.mrf.mxu0  ;;  %v1631_v48 = vadd.f32 %v3829_v57, %v1462_v62 }
 0x17f   : > { %v2752_v60 = vpop.f32.mrf.mxu1 }
 0x180   : > { %v2053_v27 = vadd.f32 %v2958_v4, %v1958_v17  ;;  %v1956_v58 = vadd.f32 %v1893_v29, %v1790_v32  ;;  %v1793_v34 = vadd.f32 %v2752_v60, %v1627_v24  ;;  %v1896_v20 = vpop.f32.mrf.mxu0  ;;  %v3826_v29 = vld [vmem:[#allocation8_spill] sm:$0xff]  ;;  %v3830_v24 = vld [vmem:[#allocation26_spill] sm:$0xff]  ;;  %v3831_v60 = vld [vmem:[#allocation9_spill] sm:$0xff] }
 0x181   : > { %v1730_v36 = vpop.f32.mrf.mxu1  ;;  %v1297_v42 = vadd.f32 %v3826_v29, %v1131_v56  ;;  %v1465_v17 = vadd.f32 %v3830_v24, %v1299_v61  ;;  %v3835_v56 = vld [vmem:[#allocation28_spill] sm:$0xff]  ;;  %v3837_v61 = vld [vmem:[#allocation5_spill] sm:$0xff] }
 0x182   : > { %v2069_v11 = vadd.f32 %v2053_v27, %v3559_v0  ;;  %v2051_v22 = vadd.f32 %v2958_v4, %v1956_v58  ;;  %v1959_v41 = vadd.f32 %v2770_v35, %v1793_v34  ;;  %v1791_v9 = vadd.f32 %v1730_v36, %v1625_v49  ;;  %v2773_v43 = vpop.f32.mrf.mxu0  ;;  %v3832_v27 = vld [vmem:[#allocation4_spill] sm:$0xff]  ;;  %v3833_v58 = vld [vmem:[#allocation14_spill] sm:$0xff] }
 0x183   : > { %v2755_v37 = vpop.f32.mrf.mxu1  ;;  %v1300_v49 = vadd.f32 %v3831_v60, %v1134_v59  ;;  %v1137_v34 = vadd.f32 %v3833_v58, %v3832_v27  ;;  %v1135_v59 = vadd.f32 %v3838_v55, %v3837_v61  ;;  %v3848_v27 = vld [vmem:[#allocation20_spill] sm:$0xff] }
 0x184   : > { %2085 = vst.msk [vmem:[%s2973_s28 + $0x10] sm:$0xff] %vm554_vm4, %v2069_v11  ;;  %v2067_v18 = vadd.f32 %v2051_v22, %v3564_v40  ;;  %v2054_v0 = vadd.f32 %v2958_v4, %v1959_v41  ;;  %v1957_v30 = vadd.f32 %v1896_v20, %v1791_v9  ;;  %v1796_v21 = vadd.f32 %v2755_v37, %v1630_v16  ;;  %v1909_v14 = vpop.f32.mrf.mxu0  ;;  %v3834_v20 = vld [vmem:[#allocation23_spill] sm:$0xff] }
 0x185   : > { %v1743_v32 = vpop.f32.mrf.mxu1  ;;  %v1629_v1 = vadd.f32 %v3834_v20, %v1460_v33  ;;  %v1463_v16 = vadd.f32 %v3835_v56, %v1297_v42  ;;  %v3836_v9 = vld [vmem:[#allocation11_spill] sm:$0xff]  ;;  %v1466_v33 = vadd.f32 %v3840_v7, %v1300_v49  ;;  %v3842_v42 = vld [vmem:[#allocation6_spill] sm:$0xff] }
 0x186   : > { %2083 = vst.msk [vmem:[%s2973_s28] sm:$0xff] %vm554_vm4, %v2067_v18  ;;  %v2070_v40 = vadd.f32 %v2054_v0, %v3577_v47  ;;  %v2052_v35 = vadd.f32 %v2958_v4, %v1957_v30  ;;  %v1962_v54 = vadd.f32 %v2773_v43, %v1796_v21  ;;  %v1794_v51 = vadd.f32 %v1743_v32, %v1628_v63  ;;  %v2774_v12 = vpop.f32.mrf.mxu0  ;;  %v3847_v49 = vld [vmem:[#allocation7_spill] sm:$0xff] }
 0x187   : > { %v2756_v62 = vpop.f32.mrf.mxu1  ;;  %v1298_v43 = vadd.f32 %v3836_v9, %v1132_v53  ;;  %v1634_v63 = vadd.f32 %v3839_v19, %v1465_v17  ;;  %v1138_v8 = vadd.f32 %v3843_v50, %v3842_v42  ;;  %v3844_v53 = vld [vmem:[#allocation27_spill] sm:$0xff]  ;;  %v1136_v58 = vadd.f32 %v3848_v27, %v3847_v49 }
 0x188   : > { %2086 = vst.msk [vmem:[%s2973_s28 + $0x18] sm:$0xff] %vm554_vm4, %v2070_v40  ;;  %v2068_v47 = vadd.f32 %v2052_v35, %v3592_v25  ;;  %v2057_v36 = vadd.f32 %v2958_v4, %v1962_v54  ;;  %v1960_v11 = vadd.f32 %v1909_v14, %v1794_v51  ;;  %v1797_v22 = vadd.f32 %v2756_v62, %v1631_v48  ;;  %v1912_v41 = vpop.f32.mrf.mxu0  ;;  %v3841_v14 = vld [vmem:[#allocation13_spill] sm:$0xff]  ;;  %v3845_v48 = vld [vmem:[#allocation32_spill] sm:$0xff]  ;;  %v2538_v51 = vld [vmem:[%s3515_s30 + $0x30] sm:$0xff]  }
 0x189   : > { %v1746_v37 = vpop.f32.mrf.mxu1  ;;  %v1303_v29 = vadd.f32 %v3841_v14, %v1137_v34  ;;  %v1632_v57 = vadd.f32 %v3844_v53, %v1463_v16  ;;  %v1464_v24 = vadd.f32 %v3845_v48, %v1298_v43  ;;  %v3849_v34 = vld [vmem:[#allocation29_spill] sm:$0xff]  ;;  %v3852_v9 = vld [vmem:[#allocation31_spill] sm:$0xff] }
 0x18a   : > { %2084 = vst.msk [vmem:[%s2973_s28 + $0x8] sm:$0xff] %vm554_vm4, %v2068_v47  ;;  %v2073_v25 = vadd.f32 %v2057_v36, %v3595_v10  ;;  %v2055_v18 = vadd.f32 %v2958_v4, %v1960_v11  ;;  %v1963_v0 = vadd.f32 %v2774_v12, %v1797_v22  ;;  %v1795_v30 = vadd.f32 %v1746_v37, %v1629_v1  ;;  %v2777_v21 = vpop.f32.mrf.mxu0  ;;  %v3846_v12 = vld [vmem:[#allocation15_spill] sm:$0xff]  ;;  %v3850_v1 = vld [vmem:[#allocation34_spill] sm:$0xff]  ;;  %v3851_v22 = vld [vmem:[#allocation17_spill] sm:$0xff] }
 0x18b   : > { %v2759_v17 = vpop.f32.mrf.mxu1  ;;  %v1301_v60 = vadd.f32 %v3846_v12, %v1135_v59  ;;  %v1635_v20 = vadd.f32 %v3849_v34, %v1466_v33  ;;  %v1469_v56 = vadd.f32 %v3850_v1, %v1303_v29  ;;  %v1633_v43 = vadd.f32 %v3852_v9, %v1464_v24  ;;  %v3853_v37 = vld [vmem:[#allocation19_spill] sm:$0xff] }
 0x18c   : > { %2089 = vst.msk [vmem:[%s2973_s28 + $0x30] sm:$0xff] %vm554_vm4, %v2073_v25  ;;  %v2071_v10 = vadd.f32 %v2055_v18, %v3603_v15  ;;  %v2058_v32 = vadd.f32 %v2958_v4, %v1963_v0  ;;  %v1961_v40 = vadd.f32 %v1912_v41, %v1795_v30  ;;  %v1800_v35 = vadd.f32 %v2759_v17, %v1634_v63  ;;  %v1925_v54 = vpop.f32.mrf.mxu0  ;;  %v3854_v18 = vld [vmem:[#allocation33_spill] sm:$0xff] }
 0x18d   : > { %v1759_v16 = vpop.f32.mrf.mxu1  ;;  %v1304_v41 = vadd.f32 %v3851_v22, %v1138_v8  ;;  %v1467_v61 = vadd.f32 %v3574_v52, %v1301_v60  ;;  %v2512_v59 = vunpack.c.l.bf16 %v2538_v51  ;;  %v1302_v25 = vadd.f32 %v3853_v37, %v1136_v58  ;;  %v3855_v8 = vld [vmem:[#allocation35_spill] sm:$0xff] }
 0x18e   : > { %2087 = vst.msk [vmem:[%s2973_s28 + $0x20] sm:$0xff] %vm554_vm4, %v2071_v10  ;;  %v2074_v15 = vadd.f32 %v2058_v32, %v3614_v38  ;;  %v2056_v62 = vadd.f32 %v2958_v4, %v1961_v40  ;;  %v1966_v47 = vadd.f32 %v2777_v21, %v1800_v35  ;;  %v1798_v36 = vadd.f32 %v1759_v16, %v1632_v57  ;;  %v2778_v11 = vpop.f32.mrf.mxu0 }
 0x18f   : > { %v2760_v55 = vpop.f32.mrf.mxu1  ;;  %v1638_v0 = vadd.f32 %v3854_v18, %v1469_v56  ;;  %v1470_v30 = vadd.f32 %v3589_v28, %v1304_v41  ;;  %v2517_v52 = vunpack.c.h.bf16 %v3607_v31  ;;  %v1636_v53 = vadd.f32 %v3855_v8, %v1467_v61 }
 0x190   : > { %2090 = vst.msk [vmem:[%s2973_s28 + $0x38] sm:$0xff] %vm554_vm4, %v2074_v15  ;;  %v2072_v19 = vadd.f32 %v2056_v62, %v3617_v45  ;;  %v2061_v38 = vadd.f32 %v2958_v4, %v1966_v47  ;;  %v1964_v63 = vadd.f32 %v1925_v54, %v1798_v36  ;;  %v1801_v7 = vadd.f32 %v2760_v55, %v1635_v20  ;;  %v1928_v33 = vpop.f32.mrf.mxu0 }
 0x191   : > { %v1762_v21 = vpop.f32.mrf.mxu1  ;;  %v1468_v57 = vadd.f32 %v3611_v23, %v1302_v25  ;;  %v2023_v28 = vmul.f32 %v2512_v59, %v2948_v2  ;;  %v2513_v24 = vunpack.c.h.bf16 %v2538_v51  ;;  %v1639_v40 = vadd.f32 %v3585_v5, %v1470_v30 }
 0x192   : > { %2088 = vst.msk [vmem:[%s2973_s28 + $0x28] sm:$0xff] %vm554_vm4, %v2072_v19  ;;  %v2077_v14 = vadd.f32 %v2061_v38, %v3628_v26  ;;  %v2059_v45 = vadd.f32 %v2958_v4, %v1964_v63  ;;  %v1967_v29 = vadd.f32 %v2778_v11, %v1801_v7  ;;  %v1799_v42 = vadd.f32 %v1762_v21, %v1633_v43  ;;  %v2781_v50 = vpop.f32.mrf.mxu0 }
 0x193   : > { %v2763_v48 = vpop.f32.mrf.mxu1  ;;  %v2045_v35 = vadd.f32 %v2953_v3, %v3652_v6  ;;  %v2026_v54 = vmul.f32 %v2517_v52, %v2948_v2  ;;  %v1637_v49 = vadd.f32 %v3600_v13, %v1468_v57  ;;  %v2043_v27 = vadd.f32 %v2953_v3, %v2023_v28 }
 0x194   : > { %2093 = vst.msk [vmem:[%s2973_s28 + $0x50] sm:$0xff] %vm554_vm4, %v2077_v14  ;;  %v2075_v31 = vadd.f32 %v2059_v45, %v3634_v39  ;;  %v2062_v26 = vadd.f32 %v2958_v4, %v1967_v29  ;;  %v1965_v17 = vadd.f32 %v1928_v33, %v1799_v42  ;;  %v1804_v10 = vadd.f32 %v2763_v48, %v1638_v0  ;;  %v1941_v32 = vpop.f32.mrf.mxu0 }
 0x195   : > { %v1775_v23 = vpop.f32.mrf.mxu1  ;;  %v2024_v6 = vmul.f32 %v2513_v24, %v2948_v2  ;;  %v2046_v56 = vadd.f32 %v2953_v3, %v2026_v54 }
 0x196   : > { %2091 = vst.msk [vmem:[%s2973_s28 + $0x40] sm:$0xff] %vm554_vm4, %v2075_v31  ;;  %v2078_v51 = vadd.f32 %v2062_v26, %v3641_v46  ;;  %v2060_v39 = vadd.f32 %v2958_v4, %v1965_v17  ;;  %v1970_v12 = vadd.f32 %v2781_v50, %v1804_v10  ;;  %v1802_v60 = vadd.f32 %v1775_v23, %v1636_v53  ;;  %v2782_v58 = vpop.f32.mrf.mxu0 }
 0x197   : > { %v2764_v5 = vpop.f32.mrf.mxu1  ;;  %v2044_v22 = vadd.f32 %v2953_v3, %v2024_v6 }
 0x198   : > { %2094 = vst.msk [vmem:[%s2973_s28 + $0x58] sm:$0xff] %vm554_vm4, %v2078_v51  ;;  %v2076_v34 = vadd.f32 %v2060_v39, %v3645_v44  ;;  %v2065_v46 = vadd.f32 %v2958_v4, %v1970_v12  ;;  %v1968_v20 = vadd.f32 %v1941_v32, %v1802_v60  ;;  %v1805_v1 = vadd.f32 %v2764_v5, %v1639_v40  ;;  %v1944_v47 = vpop.f32.mrf.mxu0 }
 0x199   : > { %v1778_v13 = vpop.f32.mrf.mxu1 }
 0x19a   : > { %2092 = vst.msk [vmem:[%s2973_s28 + $0x48] sm:$0xff] %vm554_vm4, %v2076_v34  ;;  %v2081_v16 = vadd.f32 %v2065_v46, %v2045_v35  ;;  %v2063_v15 = vadd.f32 %v2958_v4, %v1968_v20  ;;  %v1971_v2 = vadd.f32 %v2782_v58, %v1805_v1  ;;  %v1803_v62 = vadd.f32 %v1778_v13, %v1637_v49 }
 0x19c   : > { %2097 = vst.msk [vmem:[%s2973_s28 + $0x70] sm:$0xff] %vm554_vm4, %v2081_v16  ;;  %v2079_v44 = vadd.f32 %v2063_v15, %v2043_v27  ;;  %v2066_v36 = vadd.f32 %v2958_v4, %v1971_v2  ;;  %v1969_v11 = vadd.f32 %v1944_v47, %v1803_v62 }
 0x19e   : > { %2095 = vst.msk [vmem:[%s2973_s28 + $0x60] sm:$0xff] %vm554_vm4, %v2079_v44  ;;  %v2082_v41 = vadd.f32 %v2066_v36, %v2046_v56  ;;  %v2064_v9 = vadd.f32 %v2958_v4, %v1969_v11 }
 0x1a0   : > { %2098 = vst.msk [vmem:[%s2973_s28 + $0x78] sm:$0xff] %vm554_vm4, %v2082_v41  ;;  %v2080_v43 = vadd.f32 %v2064_v9, %v2044_v22 }
 0x1a2   : > { %2096 = vst.msk [vmem:[%s2973_s28 + $0x68] sm:$0xff] %vm554_vm4, %v2080_v43 }
 0x1a3 PF: > { %s14_s19 = sadd.s32 1, %s2874_s19   ;;  %s3856_s15 = smov %s2866_s17 }
 0x1a4   : > { %p11_p8 = scmp.ge.s32.totalorder %s14_s19, 6   ;;  %s3857_s16 = smov %s2870_s18 }
 0x1a5   : > { %s3858_s17 = smov %s3861_s20  ;;  %s3859_s18 = smov %s3865_s21 }
 0x1a6   :  { %13 = sbr.rel (!%p11_p8) target bundleno = 3 (0x3), region = 87 }

// kernel: residual_conv_forward.2
= control target key start
LH: loop header
LB: loop body
LE: loop exit
PB: predicated region body
PF: predicated region fallthrough
CT: control target
= control target key end

     0   :  { %s5170_s21 = smov 0   ;;  %s5172_s22 = smov 0   ;;  %s6915_s0 = inlined_call_operand.vmem [shape: f32[2,16,16,4], index: 0, kind: input, shape index: {}]   ;;  %s6916_s1 = inlined_call_operand.vmem [shape: f32[2,4], index: 1, kind: input, shape index: {}]   ;;  %s6917_s2 = inlined_call_operand.vmem [shape: bf16[9,4,8], index: 2, kind: input, shape index: {}]   ;;  %s6918_s3 = inlined_call_operand.vmem [shape: bf16[9,4,8], index: 3, kind: input, shape index: {}]   ;;  %s6919_s4 = inlined_call_operand.vmem [shape: bf16[2,16,16,8], index: 4, kind: output, shape index: {0}]   ;;  %s6920_s5 = inlined_call_operand.vmem [shape: bf16[2,16,16,8], index: 5, kind: output, shape index: {1}]   ;;  %s6921_s6 = inlined_call_operand.vmem [shape: f32[2,4,8], index: 6, kind: output, shape index: {2}]  }
   0x1   :  { %s5174_s23 = smov 0   ;;  %s5176_s24 = smov 0  }
   0x2   :  { %s5178_s25 = smov 0  }
   0x3 LB: > { %s26_s26 = sadd.s32 1, %s5124_s23  ;;  %s29_s27 = sadd.s32 1, %s5128_s24  ;;  %s5132_s25 = sphi %s5178_s25, %s17_s25   ;;  %s5128_s24 = sphi %s5176_s24, %s6991_s24   ;;  %s5124_s23 = sphi %s5174_s23, %s6990_s23   ;;  %s5120_s22 = sphi %s5172_s22, %s6989_s22   ;;  %s5116_s21 = sphi %s5170_s21, %s6988_s21  }
   0x4   : > { %p27_p0 = scmp.ge.s32.totalorder %s26_s26, 2  ;;  %p4105_p1 = scmp.ge.s32.totalorder %s5132_s25, 1 }
   0x5   : > { %p233_p2 = scmp.lt.s32.totalorder %s5132_s25, 5 }
   0x6   : > { %s6993_s26 = smov (%p27_p0, %s26_s26), 0  ;;  %s6995_s27 = smov (!%p27_p0, %s29_s27), %s5128_s24 }
   0x7   : > { %p234_p3 = pnand %p4105_p1, %p233_p2  ;;  %p31_p4 = scmp.ge.s32.totalorder %s6995_s27, 2 }
   0x9   : > { %s6997_s27 = smov (%p31_p4, %s6995_s27), 0  ;;  %237 = sbr.rel (%p234_p3) target bundleno = 621 (0x26d), region = 36 }
   0xa   : > { %6922 = sst [smem:[#allocation4_spill]] %s6997_s27 }
   0xe   : > { %p282_p5 = scmp.lt.s32.totalorder %s5120_s22, 1  ;;  %s4108_s28 = sshll.u32 %s5116_s21, 3 }
   0xf   : > { %p290_p6 = scmp.lt.s32.totalorder %s4108_s28, 15  ;;  %p4117_p7 = scmp.ne.s32.totalorder %s5116_s21, 0 }
  0x10   : > { %s6999_s22 = smov (!%p282_p5, %s5120_s22), 1 }
  0x11   : > { %s7001_s28 = smov (!%p290_p6, %s4108_s28), 15  ;;  %s4516_s29 = sshll.u32 %s6999_s22, 8 }
  0x12   : > { %s4110_s30 = sshll.u32 %s6999_s22, 5  ;;  %s5206_s9 = scalar_lea.vmem %s6915_s0, %s4516_s29 }
  0x13   : > { %s4109_s10 = sshll.u32 %s7001_s28, 1  ;;  %s4116_s12 = sshll.u32 %s6999_s22, 2 }
  0x14   : > { %s294_s11 = sadd.s32 %s4110_s30, %s4109_s10  ;;  %s5211_s16 = scalar_lea.vmem %s6921_s6, %s4116_s12 }
  0x15   : > { %s4111_s13 = sshll.u32 %s294_s11, 2  ;;  %317 = sbr.rel (%p4117_p7) target bundleno = 102 (0x66), region = 40 }
  0x16   : > { %s5216_s19 = scalar_lea.vmem %s6919_s4, %s4111_s13  ;;  %s5221_s7 = scalar_lea.vmem %s6920_s5, %s4111_s13 }
  0x1a   : > { %vm350_vm0 = vcmask 31744   ;;  %vm353_vm1 = vcmask 25600   ;;  %vm359_vm2 = vcmask 24576   ;;  %v5225_v0 = vld [vmem:[%s5206_s9] sm:$0xff]  ;;  %v5228_v1 = vld [vmem:[%s5206_s9 + $0x8] sm:$0xff]  ;;  %v5134_v2 = vmov 0.0  }
  0x1b   : > { %351 = vst.msk [vmem:[#allocation2] sm:$0xff] %vm350_vm0, %v5134_v2  ;;  %352 = vst.msk [vmem:[#allocation2 + $0x8] sm:$0xff] %vm350_vm0, %v5134_v2  ;;  %v5387_v3 = vld [vmem:[%s6916_s1] ss:$0 sm:$0xff]  ;;  %v320_v4 = vld [vmem:[%s5206_s9 + $0x10] sm:$0xff]  ;;  %vm611_vm3 = vcmask 60416  }
  0x1c   : > { %356 = vst.msk [vmem:[#allocation2 + $0x198] sm:$0xff] %vm350_vm0, %v5134_v2  ;;  %357 = vst.msk [vmem:[#allocation2 + $0x1a0] sm:$0xff] %vm350_vm0, %v5134_v2  ;;  %v321_v5 = vld [vmem:[%s5206_s9 + $0x18] sm:$0xff]  ;;  %v322_v6 = vld [vmem:[%s5206_s9 + $0x20] sm:$0xff]  ;;  %v5424_v12 = vmul.f32 %v5387_v3, %v5225_v0  ;;  %v5428_v13 = vmul.f32 %v5387_v3, %v5228_v1  ;;  %v5431_v14 = vmul.f32 %v5387_v3, %v320_v4 }
  0x1d   : > { %535 = vst.msk [vmem:[#allocation3] sm:$0xff] %vm350_vm0, %v5134_v2  ;;  %536 = vst.msk [vmem:[#allocation3 + $0x8] sm:$0xff] %vm350_vm0, %v5134_v2  ;;  %v323_v7 = vld [vmem:[%s5206_s9 + $0x28] sm:$0xff]  ;;  %v324_v8 = vld [vmem:[%s5206_s9 + $0x30] sm:$0xff]  ;;  %v5440_v18 = vmul.f32 %v5387_v3, %v321_v5  ;;  %v5443_v19 = vmul.f32 %v5387_v3, %v322_v6 }
  0x1e   : > { %539 = vst.msk [vmem:[#allocation3 + $0x198] sm:$0xff] %vm350_vm0, %v5134_v2  ;;  %540 = vst.msk [vmem:[#allocation3 + $0x1a0] sm:$0xff] %vm350_vm0, %v5134_v2  ;;  %v325_v9 = vld [vmem:[%s5206_s9 + $0x38] sm:$0xff]  ;;  %v326_v10 = vld [vmem:[%s5206_s9 + $0x40] sm:$0xff]  ;;  %v5446_v20 = vmul.f32 %v5387_v3, %v323_v7  ;;  %v5449_v21 = vmul.f32 %v5387_v3, %v324_v8 }
  0x1f   : > { %354 = vst.msk [vmem:[#allocation2 + $0x10] sm:$0x3] %vm353_vm1, %v5134_v2  ;;  %358 = vst.msk [vmem:[#allocation2 + $0x1a8] sm:$0x3] %vm353_vm1, %v5134_v2  ;;  %v327_v11 = vld [vmem:[%s5206_s9 + $0x48] sm:$0xff]  ;;  %v328_v15 = vld [vmem:[%s5206_s9 + $0x50] sm:$0xff]  ;;  %v5458_v25 = vmul.f32 %v5387_v3, %v325_v9  ;;  %v5461_v26 = vmul.f32 %v5387_v3, %v326_v10 }
  0x20   : > { %537 = vst.msk [vmem:[#allocation3 + $0x10] sm:$0x3] %vm353_vm1, %v5134_v2  ;;  %541 = vst.msk [vmem:[#allocation3 + $0x1a8] sm:$0x3] %vm353_vm1, %v5134_v2  ;;  %v329_v16 = vld [vmem:[%s5206_s9 + $0x58] sm:$0xff]  ;;  %v330_v17 = vld [vmem:[%s5206_s9 + $0x60] sm:$0xff]  ;;  %v5464_v27 = vmul.f32 %v5387_v3, %v327_v11  ;;  %v5467_v28 = vmul.f32 %v5387_v3, %v328_v15 }
  0x21   : > { %361 = vst.msk [vmem:[#allocation2 + $0x18] sm:$0x1] %vm359_vm2, %v5134_v2  ;;  %362 = vst.msk [vmem:[#allocation2 + $0x30] sm:$0x1] %vm359_vm2, %v5134_v2  ;;  %v331_v22 = vld [vmem:[%s5206_s9 + $0x68] sm:$0xff]  ;;  %v332_v23 = vld [vmem:[%s5206_s9 + $0x70] sm:$0xff]  ;;  %v5476_v32 = vmul.f32 %v5387_v3, %v329_v16  ;;  %v5479_v33 = vmul.f32 %v5387_v3, %v330_v17 }
  0x22   : > { %363 = vst.msk [vmem:[#allocation2 + $0x48] sm:$0x1] %vm359_vm2, %v5134_v2  ;;  %364 = vst.msk [vmem:[#allocation2 + $0x60] sm:$0x1] %vm359_vm2, %v5134_v2  ;;  %v333_v24 = vld [vmem:[%s5206_s9 + $0x78] sm:$0xff]  ;;  %v334_v29 = vld [vmem:[%s5206_s9 + $0x80] sm:$0xff]  ;;  %v5482_v34 = vmul.f32 %v5387_v3, %v331_v22  ;;  %v5485_v35 = vmul.f32 %v5387_v3, %v332_v23 }
  0x23   : > { %365 = vst.msk [vmem:[#allocation2 + $0x78] sm:$0x1] %vm359_vm2, %v5134_v2  ;;  %366 = vst.msk [vmem:[#allocation2 + $0x90] sm:$0x1] %vm359_vm2, %v5134_v2  ;;  %v335_v30 = vld [vmem:[%s5206_s9 + $0x88] sm:$0xff]  ;;  %v336_v31 = vld [vmem:[%s5206_s9 + $0x90] sm:$0xff]  ;;  %v5494_v39 = vmul.f32 %v5387_v3, %v333_v24  ;;  %v5497_v40 = vmul.f32 %v5387_v3, %v334_v29 }
  0x24   : > { %367 = vst.msk [vmem:[#allocation2 + $0xa8] sm:$0x1] %vm359_vm2, %v5134_v2  ;;  %368 = vst.msk [vmem:[#allocation2 + $0xc0] sm:$0x1] %vm359_vm2, %v5134_v2  ;;  %v337_v36 = vld [vmem:[%s5206_s9 + $0x98] sm:$0xff]  ;;  %v338_v37 = vld [vmem:[%s5206_s9 + $0xa0] sm:$0xff]  ;;  %v5500_v41 = vmul.f32 %v5387_v3, %v335_v30  ;;  %v5503_v42 = vmul.f32 %v5387_v3, %v336_v31 }
  0x25   : > { %369 = vst.msk [vmem:[#allocation2 + $0xd8] sm:$0x1] %vm359_vm2, %v5134_v2  ;;  %370 = vst.msk [vmem:[#allocation2 + $0xf0] sm:$0x1] %vm359_vm2, %v5134_v2  ;;  %v339_v38 = vld [vmem:[%s5206_s9 + $0xa8] sm:$0xff]  ;;  %v340_v43 = vld [vmem:[%s5206_s9 + $0xb0] sm:$0xff]  ;;  %v5512_v46 = vmul.f32 %v5387_v3, %v337_v36  ;;  %v5515_v47 = vmul.f32 %v5387_v3, %v338_v37 }
  0x26   : > { %371 = vst.msk [vmem:[#allocation2 + $0x108] sm:$0x1] %vm359_vm2, %v5134_v2  ;;  %372 = vst.msk [vmem:[#allocation2 + $0x120] sm:$0x1] %vm359_vm2, %v5134_v2  ;;  %v341_v44 = vld [vmem:[%s5206_s9 + $0xb8] sm:$0xff]  ;;  %v342_v45 = vld [vmem:[%s5206_s9 + $0xc0] sm:$0xff]  ;;  %v5518_v48 = vmul.f32 %v5387_v3, %v339_v38  ;;  %v5522_v49 = vmul.f32 %v5387_v3, %v340_v43 }
  0x27   : > { %373 = vst.msk [vmem:[#allocation2 + $0x138] sm:$0x1] %vm359_vm2, %v5134_v2  ;;  %374 = vst.msk [vmem:[#allocation2 + $0x150] sm:$0x1] %vm359_vm2, %v5134_v2  ;;  %v343_v50 = vld [vmem:[%s5206_s9 + $0xc8] sm:$0xff]  ;;  %v344_v51 = vld [vmem:[%s5206_s9 + $0xd0] sm:$0xff]  ;;  %v5530_v53 = vmul.f32 %v5387_v3, %v341_v44  ;;  %v5533_v54 = vmul.f32 %v5387_v3, %v342_v45 }
  0x28   : > { %375 = vst.msk [vmem:[#allocation2 + $0x168] sm:$0x1] %vm359_vm2, %v5134_v2  ;;  %376 = vst.msk [vmem:[#allocation2 + $0x180] sm:$0x1] %vm359_vm2, %v5134_v2  ;;  %v345_v52 = vld [vmem:[%s5206_s9 + $0xd8] sm:$0xff]  ;;  %v5537_v55 = vmul.f32 %v5387_v3, %v343_v50  ;;  %v5541_v56 = vmul.f32 %v5387_v3, %v344_v51  ;;  %v346_v57 = vld [vmem:[%s5206_s9 + $0xe0] sm:$0xff] }
  0x29   : > { %379 = vst.msk [vmem:[#allocation2 + $0x29] sm:$0x1] %vm359_vm2, %v5134_v2  ;;  %380 = vst.msk [vmem:[#allocation2 + $0x41] sm:$0x1] %vm359_vm2, %v5134_v2  ;;  %v347_v58 = vld [vmem:[%s5206_s9 + $0xe8] sm:$0xff]  ;;  %v348_v59 = vld [vmem:[%s5206_s9 + $0xf0] sm:$0xff]  ;;  %v5548_v60 = vmul.f32 %v5387_v3, %v345_v52  ;;  %v5552_v61 = vmul.f32 %v5387_v3, %v346_v57 }
  0x2a   : > { %381 = vst.msk [vmem:[#allocation2 + $0x59] sm:$0x1] %vm359_vm2, %v5134_v2  ;;  %382 = vst.msk [vmem:[#allocation2 + $0x71] sm:$0x1] %vm359_vm2, %v5134_v2  ;;  %v5556_v62 = vmul.f32 %v5387_v3, %v347_v58  ;;  %v5560_v63 = vmul.f32 %v5387_v3, %v348_v59 }
  0x2b   : > { %383 = vst.msk [vmem:[#allocation2 + $0x89] sm:$0x1] %vm359_vm2, %v5134_v2  ;;  %384 = vst.msk [vmem:[#allocation2 + $0xa1] sm:$0x1] %vm359_vm2, %v5134_v2 }
  0x2c   : > { %385 = vst.msk [vmem:[#allocation2 + $0xb9] sm:$0x1] %vm359_vm2, %v5134_v2  ;;  %386 = vst.msk [vmem:[#allocation2 + $0xd1] sm:$0x1] %vm359_vm2, %v5134_v2 }
  0x2d   : > { %387 = vst.msk [vmem:[#allocation2 + $0xe9] sm:$0x1] %vm359_vm2, %v5134_v2  ;;  %388 = vst.msk [vmem:[#allocation2 + $0x101] sm:$0x1] %vm359_vm2, %v5134_v2 }
  0x2e   : > { %389 = vst.msk [vmem:[#allocation2 + $0x119] sm:$0x1] %vm359_vm2, %v5134_v2  ;;  %390 = vst.msk [vmem:[#allocation2 + $0x131] sm:$0x1] %vm359_vm2, %v5134_v2 }
  0x2f   : > { %391 = vst.msk [vmem:[#allocation2 + $0x149] sm:$0x1] %vm359_vm2, %v5134_v2  ;;  %392 = vst.msk [vmem:[#allocation2 + $0x161] sm:$0x1] %vm359_vm2, %v5134_v2 }
  0x30   : > { %393 = vst.msk [vmem:[#allocation2 + $0x179] sm:$0x1] %vm359_vm2, %v5134_v2  ;;  %394 = vst.msk [vmem:[#allocation2 + $0x191] sm:$0x1] %vm359_vm2, %v5134_v2 }
  0x31   : > { %543 = vst.msk [vmem:[#allocation3 + $0x18] sm:$0x1] %vm359_vm2, %v5134_v2  ;;  %544 = vst.msk [vmem:[#allocation3 + $0x30] sm:$0x1] %vm359_vm2, %v5134_v2 }
  0x32   : > { %545 = vst.msk [vmem:[#allocation3 + $0x48] sm:$0x1] %vm359_vm2, %v5134_v2  ;;  %546 = vst.msk [vmem:[#allocation3 + $0x60] sm:$0x1] %vm359_vm2, %v5134_v2 }
  0x33   : > { %547 = vst.msk [vmem:[#allocation3 + $0x78] sm:$0x1] %vm359_vm2, %v5134_v2  ;;  %548 = vst.msk [vmem:[#allocation3 + $0x90] sm:$0x1] %vm359_vm2, %v5134_v2 }
  0x34   : > { %549 = vst.msk [vmem:[#allocation3 + $0xa8] sm:$0x1] %vm359_vm2, %v5134_v2  ;;  %550 = vst.msk [vmem:[#allocation3 + $0xc0] sm:$0x1] %vm359_vm2, %v5134_v2 }
  0x35   : > { %551 = vst.msk [vmem:[#allocation3 + $0xd8] sm:$0x1] %vm359_vm2, %v5134_v2  ;;  %552 = vst.msk [vmem:[#allocation3 + $0xf0] sm:$0x1] %vm359_vm2, %v5134_v2 }
  0x36   : > { %553 = vst.msk [vmem:[#allocation3 + $0x108] sm:$0x1] %vm359_vm2, %v5134_v2  ;;  %554 = vst.msk [vmem:[#allocation3 + $0x120] sm:$0x1] %vm359_vm2, %v5134_v2 }
  0x37   : > { %555 = vst.msk [vmem:[#allocation3 + $0x138] sm:$0x1] %vm359_vm2, %v5134_v2  ;;  %556 = vst.msk [vmem:[#allocation3 + $0x150] sm:$0x1] %vm359_vm2, %v5134_v2 }
  0x38   : > { %557 = vst.msk [vmem:[#allocation3 + $0x168] sm:$0x1] %vm359_vm2, %v5134_v2  ;;  %558 = vst.msk [vmem:[#allocation3 + $0x180] sm:$0x1] %vm359_vm2, %v5134_v2 }
  0x39   : > { %561 = vst.msk [vmem:[#allocation3 + $0x29] sm:$0x1] %vm359_vm2, %v5134_v2  ;;  %562 = vst.msk [vmem:[#allocation3 + $0x41] sm:$0x1] %vm359_vm2, %v5134_v2 }
  0x3a   : > { %563 = vst.msk [vmem:[#allocation3 + $0x59] sm:$0x1] %vm359_vm2, %v5134_v2  ;;  %564 = vst.msk [vmem:[#allocation3 + $0x71] sm:$0x1] %vm359_vm2, %v5134_v2 }
  0x3b   : > { %565 = vst.msk [vmem:[#allocation3 + $0x89] sm:$0x1] %vm359_vm2, %v5134_v2  ;;  %566 = vst.msk [vmem:[#allocation3 + $0xa1] sm:$0x1] %vm359_vm2, %v5134_v2 }
  0x3c   : > { %567 = vst.msk [vmem:[#allocation3 + $0xb9] sm:$0x1] %vm359_vm2, %v5134_v2  ;;  %568 = vst.msk [vmem:[#allocation3 + $0xd1] sm:$0x1] %vm359_vm2, %v5134_v2 }
  0x3d   : > { %569 = vst.msk [vmem:[#allocation3 + $0xe9] sm:$0x1] %vm359_vm2, %v5134_v2  ;;  %570 = vst.msk [vmem:[#allocation3 + $0x101] sm:$0x1] %vm359_vm2, %v5134_v2 }
  0x3e   : > { %571 = vst.msk [vmem:[#allocation3 + $0x119] sm:$0x1] %vm359_vm2, %v5134_v2  ;;  %572 = vst.msk [vmem:[#allocation3 + $0x131] sm:$0x1] %vm359_vm2, %v5134_v2 }
  0x3f   : > { %573 = vst.msk [vmem:[#allocation3 + $0x149] sm:$0x1] %vm359_vm2, %v5134_v2  ;;  %574 = vst.msk [vmem:[#allocation3 + $0x161] sm:$0x1] %vm359_vm2, %v5134_v2 }
  0x40   : > { %575 = vst.msk [vmem:[#allocation3 + $0x179] sm:$0x1] %vm359_vm2, %v5134_v2  ;;  %576 = vst.msk [vmem:[#allocation3 + $0x191] sm:$0x1] %vm359_vm2, %v5134_v2 }
  0x41   : > { %397 = vst.msk [vmem:[#allocation2 + $0x19] sm:$0xff] %vm350_vm0, %v5225_v0  ;;  %398 = vst.msk [vmem:[#allocation2 + $0x21] sm:$0xff] %vm350_vm0, %v5228_v1  ;;  %v349_v0 = vld [vmem:[%s5206_s9 + $0xf8] sm:$0xff]  ;;  %v5566_v1 = vld [vmem:[%s6916_s1 + $0x1] ss:$0 sm:$0xff] }
  0x42   : > { %360 = vst.msk [vmem:[#allocation2] sm:$0x1] %vm359_vm2, %v5134_v2  ;;  %377 = vst.msk [vmem:[#allocation2 + $0x198] sm:$0x1] %vm359_vm2, %v5134_v2 }
  0x43   : > { %378 = vst.msk [vmem:[#allocation2 + $0x11] sm:$0x1] %vm359_vm2, %v5134_v2  ;;  %395 = vst.msk [vmem:[#allocation2 + $0x1a9] sm:$0x1] %vm359_vm2, %v5134_v2 }
  0x44   : > { %542 = vst.msk [vmem:[#allocation3] sm:$0x1] %vm359_vm2, %v5134_v2  ;;  %559 = vst.msk [vmem:[#allocation3 + $0x198] sm:$0x1] %vm359_vm2, %v5134_v2 }
  0x45   : > { %560 = vst.msk [vmem:[#allocation3 + $0x11] sm:$0x1] %vm359_vm2, %v5134_v2  ;;  %577 = vst.msk [vmem:[#allocation3 + $0x1a9] sm:$0x1] %vm359_vm2, %v5134_v2 }
  0x46   : > { %399 = vst.msk [vmem:[#allocation2 + $0x31] sm:$0xff] %vm350_vm0, %v320_v4  ;;  %400 = vst.msk [vmem:[#allocation2 + $0x39] sm:$0xff] %vm350_vm0, %v321_v5  ;;  %v471_v4 = vadd.f32 %v5566_v1, %v5424_v12  ;;  %v472_v5 = vadd.f32 %v5566_v1, %v5428_v13  ;;  %v478_v13 = vadd.f32 %v5566_v1, %v5458_v25 }
  0x47   : > { %612 = vst.msk [vmem:[%s5211_s16] sm:$0xf] %vm611_vm3, %v5134_v2  ;;  %v5570_v2 = vmul.f32 %v5387_v3, %v349_v0  ;;  %v477_v3 = vadd.f32 %v5566_v1, %v5449_v21  ;;  %v481_v21 = vadd.f32 %v5566_v1, %v5467_v28  ;;  %v485_v25 = vadd.f32 %v5566_v1, %v5485_v35 }
  0x48   : > { %401 = vst.msk [vmem:[#allocation2 + $0x49] sm:$0xff] %vm350_vm0, %v322_v6  ;;  %402 = vst.msk [vmem:[#allocation2 + $0x51] sm:$0xff] %vm350_vm0, %v323_v7  ;;  %v473_v6 = vadd.f32 %v5566_v1, %v5431_v14  ;;  %v474_v7 = vadd.f32 %v5566_v1, %v5440_v18  ;;  %v510_v18 = vmax.f32 %v478_v13, 0.0  ;;  %v488_v35 = vadd.f32 %v5566_v1, %v5500_v41 }
  0x49   : > { %403 = vst.msk [vmem:[#allocation2 + $0x61] sm:$0xff] %vm350_vm0, %v324_v8  ;;  %404 = vst.msk [vmem:[#allocation2 + $0x69] sm:$0xff] %vm350_vm0, %v325_v9  ;;  %v475_v8 = vadd.f32 %v5566_v1, %v5443_v19  ;;  %v476_v9 = vadd.f32 %v5566_v1, %v5446_v20  ;;  %v479_v19 = vadd.f32 %v5566_v1, %v5461_v26  ;;  %v513_v28 = vmax.f32 %v481_v21, 0.0 }
  0x4a   : > { %405 = vst.msk [vmem:[#allocation2 + $0x79] sm:$0xff] %vm350_vm0, %v326_v10  ;;  %406 = vst.msk [vmem:[#allocation2 + $0x81] sm:$0xff] %vm350_vm0, %v327_v11  ;;  %v503_v10 = vmax.f32 %v471_v4, 0.0  ;;  %v504_v11 = vmax.f32 %v472_v5, 0.0  ;;  %v505_v12 = vmax.f32 %v473_v6, 0.0  ;;  %v480_v20 = vadd.f32 %v5566_v1, %v5464_v27 }
  0x4b   : > { %407 = vst.msk [vmem:[#allocation2 + $0x91] sm:$0xff] %vm350_vm0, %v328_v15  ;;  %408 = vst.msk [vmem:[#allocation2 + $0x99] sm:$0xff] %vm350_vm0, %v329_v16  ;;  %v506_v15 = vmax.f32 %v474_v7, 0.0  ;;  %v507_v14 = vmax.f32 %v475_v8, 0.0  ;;  %v508_v16 = vmax.f32 %v476_v9, 0.0  ;;  %v511_v26 = vmax.f32 %v479_v19, 0.0 }
  0x4c   : > { %409 = vst.msk [vmem:[#allocation2 + $0xa9] sm:$0xff] %vm350_vm0, %v330_v17  ;;  %410 = vst.msk [vmem:[#allocation2 + $0xb1] sm:$0xff] %vm350_vm0, %v331_v22  ;;  %v509_v17 = vmax.f32 %v477_v3, 0.0  ;;  %v482_v22 = vadd.f32 %v5566_v1, %v5476_v32  ;;  %v512_v27 = vmax.f32 %v480_v20, 0.0  ;;  %v493_v41 = vadd.f32 %v5566_v1, %v5522_v49 }
  0x4d   : > { %411 = vst.msk [vmem:[#allocation2 + $0xc1] sm:$0xff] %vm350_vm0, %v332_v23  ;;  %412 = vst.msk [vmem:[#allocation2 + $0xc9] sm:$0xff] %vm350_vm0, %v333_v24  ;;  %v483_v23 = vadd.f32 %v5566_v1, %v5479_v33  ;;  %v484_v24 = vadd.f32 %v5566_v1, %v5482_v34  ;;  %v487_v34 = vadd.f32 %v5566_v1, %v5497_v40 }
  0x4e   : > { %413 = vst.msk [vmem:[#allocation2 + $0xd9] sm:$0xff] %vm350_vm0, %v334_v29  ;;  %414 = vst.msk [vmem:[#allocation2 + $0xe1] sm:$0xff] %vm350_vm0, %v335_v30  ;;  %v486_v29 = vadd.f32 %v5566_v1, %v5494_v39  ;;  %v514_v30 = vmax.f32 %v482_v22, 0.0  ;;  %v491_v39 = vadd.f32 %v5566_v1, %v5515_v47  ;;  %v492_v40 = vadd.f32 %v5566_v1, %v5518_v48 }
  0x4f   : > { %415 = vst.msk [vmem:[#allocation2 + $0xf1] sm:$0xff] %vm350_vm0, %v336_v31  ;;  %416 = vst.msk [vmem:[#allocation2 + $0xf9] sm:$0xff] %vm350_vm0, %v337_v36  ;;  %v515_v31 = vmax.f32 %v483_v23, 0.0  ;;  %v516_v32 = vmax.f32 %v484_v24, 0.0  ;;  %v517_v36 = vmax.f32 %v485_v25, 0.0  ;;  %v495_v48 = vadd.f32 %v5566_v1, %v5533_v54 }
  0x50   : > { %417 = vst.msk [vmem:[#allocation2 + $0x109] sm:$0xff] %vm350_vm0, %v338_v37  ;;  %418 = vst.msk [vmem:[#allocation2 + $0x111] sm:$0xff] %vm350_vm0, %v339_v38  ;;  %v518_v33 = vmax.f32 %v486_v29, 0.0  ;;  %v489_v37 = vadd.f32 %v5566_v1, %v5503_v42  ;;  %v490_v38 = vadd.f32 %v5566_v1, %v5512_v46  ;;  %v519_v42 = vmax.f32 %v487_v34, 0.0 }
  0x51   : > { %419 = vst.msk [vmem:[#allocation2 + $0x121] sm:$0xff] %vm350_vm0, %v340_v43  ;;  %420 = vst.msk [vmem:[#allocation2 + $0x129] sm:$0xff] %vm350_vm0, %v341_v44  ;;  %v520_v43 = vmax.f32 %v488_v35, 0.0  ;;  %v524_v46 = vmax.f32 %v492_v40, 0.0  ;;  %v496_v49 = vadd.f32 %v5566_v1, %v5537_v55  ;;  %v499_v54 = vadd.f32 %v5566_v1, %v5552_v61 }
  0x52   : > { %421 = vst.msk [vmem:[#allocation2 + $0x139] sm:$0xff] %vm350_vm0, %v342_v45  ;;  %422 = vst.msk [vmem:[#allocation2 + $0x141] sm:$0xff] %vm350_vm0, %v343_v50  ;;  %v521_v44 = vmax.f32 %v489_v37, 0.0  ;;  %v494_v45 = vadd.f32 %v5566_v1, %v5530_v53  ;;  %v522_v50 = vmax.f32 %v490_v38, 0.0  ;;  %v497_v53 = vadd.f32 %v5566_v1, %v5541_v56 }
  0x53   : > { %423 = vst.msk [vmem:[#allocation2 + $0x151] sm:$0xff] %vm350_vm0, %v344_v51  ;;  %424 = vst.msk [vmem:[#allocation2 + $0x159] sm:$0xff] %vm350_vm0, %v345_v52  ;;  %v523_v51 = vmax.f32 %v491_v39, 0.0  ;;  %v525_v52 = vmax.f32 %v493_v41, 0.0  ;;  %v500_v55 = vadd.f32 %v5566_v1, %v5556_v62  ;;  %v501_v56 = vadd.f32 %v5566_v1, %v5560_v63 }
  0x54   : > { %425 = vst.msk [vmem:[#allocation2 + $0x169] sm:$0xff] %vm350_vm0, %v346_v57  ;;  %426 = vst.msk [vmem:[#allocation2 + $0x171] sm:$0xff] %vm350_vm0, %v347_v58  ;;  %v526_v47 = vmax.f32 %v494_v45, 0.0  ;;  %v498_v57 = vadd.f32 %v5566_v1, %v5548_v60  ;;  %v527_v58 = vmax.f32 %v495_v48, 0.0  ;;  %v502_v4 = vadd.f32 %v5566_v1, %v5570_v2 }
  0x55   : > { %427 = vst.msk [vmem:[#allocation2 + $0x181] sm:$0xff] %vm350_vm0, %v348_v59  ;;  %428 = vst.msk [vmem:[#allocation2 + $0x189] sm:$0xff] %vm350_vm0, %v349_v0  ;;  %v528_v59 = vmax.f32 %v496_v49, 0.0  ;;  %v529_v0 = vmax.f32 %v497_v53, 0.0  ;;  %v531_v6 = vmax.f32 %v499_v54, 0.0  ;;  %v532_v60 = vmax.f32 %v500_v55, 0.0 }
  0x56   : > { %579 = vst.msk [vmem:[#allocation3 + $0x19] sm:$0xff] %vm350_vm0, %v503_v10  ;;  %580 = vst.msk [vmem:[#allocation3 + $0x21] sm:$0xff] %vm350_vm0, %v504_v11  ;;  %v530_v5 = vmax.f32 %v498_v57, 0.0  ;;  %v533_v7 = vmax.f32 %v501_v56, 0.0  ;;  %v534_v61 = vmax.f32 %v502_v4, 0.0 }
  0x57   : > { %581 = vst.msk [vmem:[#allocation3 + $0x31] sm:$0xff] %vm350_vm0, %v505_v12  ;;  %582 = vst.msk [vmem:[#allocation3 + $0x39] sm:$0xff] %vm350_vm0, %v506_v15 }
  0x58   : > { %583 = vst.msk [vmem:[#allocation3 + $0x49] sm:$0xff] %vm350_vm0, %v507_v14  ;;  %584 = vst.msk [vmem:[#allocation3 + $0x51] sm:$0xff] %vm350_vm0, %v508_v16 }
  0x59   : > { %585 = vst.msk [vmem:[#allocation3 + $0x61] sm:$0xff] %vm350_vm0, %v509_v17  ;;  %586 = vst.msk [vmem:[#allocation3 + $0x69] sm:$0xff] %vm350_vm0, %v510_v18 }
  0x5a   : > { %587 = vst.msk [vmem:[#allocation3 + $0x79] sm:$0xff] %vm350_vm0, %v511_v26  ;;  %588 = vst.msk [vmem:[#allocation3 + $0x81] sm:$0xff] %vm350_vm0, %v512_v27 }
  0x5b   : > { %589 = vst.msk [vmem:[#allocation3 + $0x91] sm:$0xff] %vm350_vm0, %v513_v28  ;;  %590 = vst.msk [vmem:[#allocation3 + $0x99] sm:$0xff] %vm350_vm0, %v514_v30 }
  0x5c   : > { %591 = vst.msk [vmem:[#allocation3 + $0xa9] sm:$0xff] %vm350_vm0, %v515_v31  ;;  %592 = vst.msk [vmem:[#allocation3 + $0xb1] sm:$0xff] %vm350_vm0, %v516_v32 }
  0x5d   : > { %593 = vst.msk [vmem:[#allocation3 + $0xc1] sm:$0xff] %vm350_vm0, %v517_v36  ;;  %594 = vst.msk [vmem:[#allocation3 + $0xc9] sm:$0xff] %vm350_vm0, %v518_v33 }
  0x5e   : > { %595 = vst.msk [vmem:[#allocation3 + $0xd9] sm:$0xff] %vm350_vm0, %v519_v42  ;;  %596 = vst.msk [vmem:[#allocation3 + $0xe1] sm:$0xff] %vm350_vm0, %v520_v43 }
  0x5f   : > { %597 = vst.msk [vmem:[#allocation3 + $0xf1] sm:$0xff] %vm350_vm0, %v521_v44  ;;  %598 = vst.msk [vmem:[#allocation3 + $0xf9] sm:$0xff] %vm350_vm0, %v522_v50 }
  0x60   : > { %599 = vst.msk [vmem:[#allocation3 + $0x109] sm:$0xff] %vm350_vm0, %v523_v51  ;;  %600 = vst.msk [vmem:[#allocation3 + $0x111] sm:$0xff] %vm350_vm0, %v524_v46 }
  0x61   : > { %601 = vst.msk [vmem:[#allocation3 + $0x121] sm:$0xff] %vm350_vm0, %v525_v52  ;;  %602 = vst.msk [vmem:[#allocation3 + $0x129] sm:$0xff] %vm350_vm0, %v526_v47 }
  0x62   : > { %603 = vst.msk [vmem:[#allocation3 + $0x139] sm:$0xff] %vm350_vm0, %v527_v58  ;;  %604 = vst.msk [vmem:[#allocation3 + $0x141] sm:$0xff] %vm350_vm0, %v528_v59 }
  0x63   : > { %605 = vst.msk [vmem:[#allocation3 + $0x151] sm:$0xff] %vm350_vm0, %v529_v0  ;;  %606 = vst.msk [vmem:[#allocation3 + $0x159] sm:$0xff] %vm350_vm0, %v530_v5 }
  0x64   : > { %607 = vst.msk [vmem:[#allocation3 + $0x169] sm:$0xff] %vm350_vm0, %v531_v6  ;;  %608 = vst.msk [vmem:[#allocation3 + $0x171] sm:$0xff] %vm350_vm0, %v532_v60 }
  0x65   : > { %609 = vst.msk [vmem:[#allocation3 + $0x181] sm:$0xff] %vm350_vm0, %v533_v7  ;;  %610 = vst.msk [vmem:[#allocation3 + $0x189] sm:$0xff] %vm350_vm0, %v534_v61 }
  0x66 PF: > { %v4122_v62 = vld [vmem:[%s6917_s2 + $0x2] sm:$0x3]  ;;  %vm692_vm4 = vcmask 1041408   ;;  %v640_v63 = vld [vmem:[%s6917_s2] sm:$0x3]  ;;  %s4121_s11 = smul.u32 192, %s5116_s21 }
  0x67   : > { %5035 = vmatprep.subr.msk.bf16.mxu0 %vm692_vm4, %v4122_v62  ;;  %v694_v1 = vsel %vm692_vm4, %v4122_v62, 0  ;;  %5036 = vmatprep.subr.msk.bf16.mxu1 %vm692_vm4, %v640_v63  ;;  %v818_v2 = vsel %vm692_vm4, %v640_v63, 0  ;;  %v4139_v8 = vld [vmem:[%s6917_s2 + $0x4] sm:$0x3]  ;;  %v4166_v9 = vld [vmem:[%s6917_s2 + $0x6] sm:$0x3] }
  0x68   : > { %4712 = vmatpush3.bf16.msra.mxu0 %v694_v1  ;;  %4730 = vmatpush3.bf16.msra.mxu1 %v818_v2  ;;  %s5687_s17 = scalar_lea.vmem [#allocation3], %s4121_s11  ;;  %vm667_vm5 = vcmask 31744   ;;  %v968_v20 = vsel %vm692_vm4, %v4139_v8, 0  ;;  %v1137_v23 = vsel %vm692_vm4, %v4166_v9, 0  ;;  %v4191_v41 = vld [vmem:[%s6917_s2 + $0x8] sm:$0x3] }
  0x69   : > { %5037 = vmatprep.subr.msk.bf16.mxu0 %vm692_vm4, %v4139_v8  ;;  %5038 = vmatprep.subr.msk.bf16.mxu1 %vm692_vm4, %v4166_v9  ;;  %v4216_v42 = vld [vmem:[%s6917_s2 + $0xa] sm:$0x3]  ;;  %v1303_v1 = vsel %vm692_vm4, %v4191_v41, 0  ;;  %v4243_v9 = vld [vmem:[%s6917_s2 + $0xc] sm:$0x3]  ;;  %s5948_s22 = scalar_lea.vmem [#allocation2], %s4121_s11 }
  0x6a   : > { %v1469_v8 = vsel %vm692_vm4, %v4216_v42, 0  ;;  %vm3613_vm6 = vcmask 60416   ;;  %vm3711_vm7 = vcmask 64512   ;;  %vm3750_vm8 = vcmask 57344  }
  0x6c   : > { %v641_v3 = vld [vmem:[%s5687_s17 + $0x1] sm:$0xff]  ;;  %v642_v10 = vld [vmem:[%s5687_s17 + $0x9] sm:$0xff]  ;;  %v643_v15 = vld [vmem:[%s5687_s17 + $0x19] sm:$0xff] }
  0x6d   : > { %v616_v11 = vld [vmem:[%s5687_s17] sm:$0xff]  ;;  %v657_v12 = vpack.c.bf16 %v642_v10, %v641_v3  ;;  %v617_v13 = vld [vmem:[%s5687_s17 + $0x8] sm:$0xff]  ;;  %v618_v18 = vld [vmem:[%s5687_s17 + $0x18] sm:$0xff] }
  0x6e   : > { %v644_v14 = vld [vmem:[%s5687_s17 + $0x21] sm:$0xff]  ;;  %v632_v16 = vpack.c.bf16 %v617_v13, %v616_v11  ;;  %v645_v21 = vld [vmem:[%s5687_s17 + $0x31] sm:$0xff]  ;;  %v646_v24 = vld [vmem:[%s5687_s17 + $0x39] sm:$0xff] }
  0x6f   : > { %v5697_v17 = vpack.c.bf16 %v644_v14, %v643_v15  ;;  %v619_v19 = vld [vmem:[%s5687_s17 + $0x20] sm:$0xff]  ;;  %4713 = vmatprep.mubr.msk.bf16.mxu0 %vm667_vm5, %v657_v12  ;;  %v620_v25 = vld [vmem:[%s5687_s17 + $0x30] sm:$0xff]  ;;  %v621_v26 = vld [vmem:[%s5687_s17 + $0x38] sm:$0xff]  ;;  %v5713_v27 = vpack.c.bf16 %v646_v24, %v645_v21 }
  0x70   : > { %v5704_v22 = vpack.c.bf16 %v619_v19, %v618_v18  ;;  %4731 = vmatprep.mubr.msk.bf16.mxu1 %vm667_vm5, %v632_v16  ;;  %v5715_v28 = vpack.c.bf16 %v621_v26, %v620_v25  ;;  %v647_v29 = vld [vmem:[%s5687_s17 + $0x49] sm:$0xff]  ;;  %v648_v30 = vld [vmem:[%s5687_s17 + $0x51] sm:$0xff]  ;;  %v649_v36 = vld [vmem:[%s5687_s17 + $0x61] sm:$0xff] }
  0x71   : > { %4714 = vmatmul.mubr.msk.bf16.vlgmr.msra.gmra.mxu0 %vm667_vm5, %v5697_v17  ;;  %v622_v31 = vld [vmem:[%s5687_s17 + $0x48] sm:$0xff]  ;;  %v623_v32 = vld [vmem:[%s5687_s17 + $0x50] sm:$0xff]  ;;  %v624_v34 = vld [vmem:[%s5687_s17 + $0x60] sm:$0xff]  ;;  %v5731_v37 = vpack.c.bf16 %v648_v30, %v647_v29 }
  0x72   : > { %4732 = vmatmul.mubr.msk.bf16.vlgmr.msra.gmra.mxu1 %vm667_vm5, %v5704_v22  ;;  %4748 = vmatpush3.bf16.msra.mxu0 %v968_v20  ;;  %v650_v33 = vld [vmem:[%s5687_s17 + $0x69] sm:$0xff]  ;;  %v5733_v38 = vpack.c.bf16 %v623_v32, %v622_v31  ;;  %v651_v43 = vld [vmem:[%s5687_s17 + $0x79] sm:$0xff]  ;;  %v652_v44 = vld [vmem:[%s5687_s17 + $0x81] sm:$0xff]  ;;  %v1638_v31 = vsel %vm692_vm4, %v4243_v9, 0 }
  0x73   : > { %4766 = vmatpush3.bf16.msra.mxu1 %v1137_v23  ;;  %4717 = vmatprep.mubr.msk.bf16.mxu0 %vm667_vm5, %v5713_v27  ;;  %v625_v35 = vld [vmem:[%s5687_s17 + $0x68] sm:$0xff]  ;;  %v5735_v39 = vpack.c.bf16 %v650_v33, %v649_v36  ;;  %v626_v45 = vld [vmem:[%s5687_s17 + $0x78] sm:$0xff]  ;;  %v627_v50 = vld [vmem:[%s5687_s17 + $0x80] sm:$0xff]  ;;  %v5763_v48 = vpack.c.bf16 %v652_v44, %v651_v43 }
  0x74   : > { %4735 = vmatprep.mubr.msk.bf16.mxu1 %vm667_vm5, %v5715_v28  ;;  %v5737_v40 = vpack.c.bf16 %v625_v35, %v624_v34  ;;  %5039 = vmatprep.subr.msk.bf16.mxu0 %vm692_vm4, %v4191_v41  ;;  %v653_v51 = vld [vmem:[%s5687_s17 + $0x91] sm:$0xff]  ;;  %v654_v46 = vld [vmem:[%s5687_s17 + $0x99] sm:$0xff]  ;;  %v5765_v49 = vpack.c.bf16 %v627_v50, %v626_v45  ;;  %v655_v54 = vld [vmem:[%s5687_s17 + $0xa9] sm:$0xff] }
  0x75   : > { %5040 = vmatprep.subr.msk.bf16.mxu1 %vm692_vm4, %v4216_v42  ;;  %v628_v52 = vld [vmem:[%s5687_s17 + $0x90] sm:$0xff]  ;;  %v629_v47 = vld [vmem:[%s5687_s17 + $0x98] sm:$0xff]  ;;  %v5767_v53 = vpack.c.bf16 %v654_v46, %v653_v51  ;;  %v630_v56 = vld [vmem:[%s5687_s17 + $0xa8] sm:$0xff] }
  0x76   : > { %v5769_v57 = vpack.c.bf16 %v629_v47, %v628_v52  ;;  %v656_v55 = vld [vmem:[%s5687_s17 + $0xb1] sm:$0xff]  ;;  %v917_v59 = vld [vmem:[%s5687_s17 + $0x2] sm:$0xff]  ;;  %v919_v60 = vld [vmem:[%s5687_s17 + $0x1a] sm:$0xff] }
  0x77   : > { %v631_v58 = vld [vmem:[%s5687_s17 + $0xb0] sm:$0xff]  ;;  %v5785_v4 = vpack.c.bf16 %v656_v55, %v655_v54  ;;  %v920_v7 = vld [vmem:[%s5687_s17 + $0x22] sm:$0xff]  ;;  %v922_v62 = vld [vmem:[%s5687_s17 + $0x3a] sm:$0xff] }
  0x78   : > { %v918_v0 = vld [vmem:[%s5687_s17 + $0xa] sm:$0xff]  ;;  %v5787_v5 = vpack.c.bf16 %v631_v58, %v630_v56  ;;  %v921_v61 = vld [vmem:[%s5687_s17 + $0x32] sm:$0xff]  ;;  %v934_v63 = vpack.c.bf16 %v920_v7, %v919_v60  ;;  %v925_v12 = vld [vmem:[%s5687_s17 + $0x62] sm:$0xff] }
  0x79   : > { %4718 = vmatmul.mubr.msk.bf16.gmra.mxu0 %vm667_vm5, %v5731_v37  ;;  %v933_v6 = vpack.c.bf16 %v918_v0, %v917_v59  ;;  %v5801_v2 = vpack.c.bf16 %v922_v62, %v921_v61  ;;  %v923_v3 = vld [vmem:[%s5687_s17 + $0x4a] sm:$0xff]  ;;  %v924_v10 = vld [vmem:[%s5687_s17 + $0x52] sm:$0xff]  ;;  %v927_v16 = vld [vmem:[%s5687_s17 + $0x7a] sm:$0xff] }
  0x7a   : > { %4736 = vmatmul.mubr.msk.bf16.gmra.mxu1 %vm667_vm5, %v5733_v38  ;;  %4721 = vmatprep.mubr.msk.bf16.mxu0 %vm667_vm5, %v5735_v39  ;;  %v4268_v11 = vld [vmem:[%s6917_s2 + $0xe] sm:$0x3]  ;;  %v5822_v15 = vpack.c.bf16 %v924_v10, %v923_v3  ;;  %v928_v18 = vld [vmem:[%s5687_s17 + $0x82] sm:$0xff]  ;;  %v929_v19 = vld [vmem:[%s5687_s17 + $0x92] sm:$0xff] }
  0x7b   : > { %4739 = vmatprep.mubr.msk.bf16.mxu1 %vm667_vm5, %v5737_v40  ;;  %v926_v13 = vld [vmem:[%s5687_s17 + $0x6a] sm:$0xff]  ;;  %v930_v20 = vld [vmem:[%s5687_s17 + $0x9a] sm:$0xff]  ;;  %v5839_v21 = vpack.c.bf16 %v928_v18, %v927_v16  ;;  %v932_v24 = vld [vmem:[%s5687_s17 + $0xb2] sm:$0xff]  ;;  %v1804_v32 = vsel %vm692_vm4, %v4268_v11, 0 }
  0x7c   : > { %v5825_v14 = vpack.c.bf16 %v926_v13, %v925_v12  ;;  %v931_v23 = vld [vmem:[%s5687_s17 + $0xaa] sm:$0xff]  ;;  %v4164_v25 = vld [vmem:[%s5687_s17 + $0xc0] sm:$0xff]  ;;  %v4371_v0 = vld [vmem:[%s6918_s3 + $0x8] sm:$0x3] }
  0x7d   : > { %v4165_v26 = vld [vmem:[%s5687_s17 + $0xc8] sm:$0xff]  ;;  %v5855_v29 = vpack.c.bf16 %v932_v24, %v931_v23  ;;  %v4293_v36 = vld [vmem:[%s6917_s2 + $0x10] sm:$0x3]  ;;  %v2110_v50 = vld [vmem:[%s6918_s3] sm:$0x3] }
  0x7e   : > { %v1109_v30 = vpack.c.bf16 %v4165_v26, %v4164_v25  ;;  %v4189_v33 = vld [vmem:[%s5687_s17 + $0xc1] sm:$0xff]  ;;  %v4190_v34 = vld [vmem:[%s5687_s17 + $0xc9] sm:$0xff]  ;;  %v1970_v44 = vsel %vm692_vm4, %v4293_v36, 0  ;;  %v2286_v55 = vsel %vm692_vm4, %v2110_v50, 0  ;;  %v2121_v62 = vld [vmem:[%s5948_s22 + $0x79] sm:$0xff] }
  0x7f   : > { %v4214_v35 = vld [vmem:[%s5687_s17 + $0xc2] sm:$0xff]  ;;  %v4215_v41 = vld [vmem:[%s5687_s17 + $0xca] sm:$0xff]  ;;  %v1275_v42 = vpack.c.bf16 %v4190_v34, %v4189_v33  ;;  %v4291_v3 = vld [vmem:[%s5687_s17 + $0xda] sm:$0xff]  ;;  %v2769_v34 = vsel %vm692_vm4, %v4371_v0, 0 }
  0x80   : > { %v5901_v43 = vpack.c.bf16 %v4215_v41, %v4214_v35  ;;  %v2112_v51 = vld [vmem:[%s5948_s22 + $0x9] sm:$0xff]  ;;  %v4346_v59 = vld [vmem:[%s6918_s3 + $0x6] sm:$0x3]  ;;  %v2126_v12 = vld [vmem:[%s5948_s22 + $0xb1] sm:$0xff] }
  0x81   : > { %4722 = vmatmul.mubr.msk.bf16.gmra.mxu0 %vm667_vm5, %v5763_v48  ;;  %v2120_v60 = vld [vmem:[%s5948_s22 + $0x69] sm:$0xff]  ;;  %v2086_v13 = vld [vmem:[%s5948_s22] sm:$0xff] }
  0x82   : > { %4740 = vmatmul.mubr.msk.bf16.gmra.mxu1 %vm667_vm5, %v5765_v49  ;;  %4725 = vmatprep.mubr.msk.bf16.mxu0 %vm667_vm5, %v5767_v53  ;;  %v4292_v10 = vld [vmem:[%s5687_s17 + $0xe2] sm:$0xff]  ;;  %v2386_v16 = vld [vmem:[%s5948_s22 + $0xa] sm:$0xff]  ;;  %v2387_v24 = vld [vmem:[%s5948_s22 + $0x1a] sm:$0xff] }
  0x83   : > { %4743 = vmatprep.mubr.msk.bf16.mxu1 %vm667_vm5, %v5769_v57  ;;  %v1942_v18 = vpack.c.bf16 %v4292_v10, %v4291_v3  ;;  %v2089_v23 = vld [vmem:[%s5948_s22 + $0x20] sm:$0xff]  ;;  %v2090_v26 = vld [vmem:[%s5948_s22 + $0x30] sm:$0xff]  ;;  %v2092_v41 = vld [vmem:[%s5948_s22 + $0x48] sm:$0xff] }
  0x84   : > { %v2388_v25 = vld [vmem:[%s5948_s22 + $0x22] sm:$0xff] }
  0x89   : > { %4726 = vmatmul.mubr.msk.bf16.gmra.mxu0 %vm667_vm5, %v5785_v4 }
  0x8a   : > { %4744 = vmatmul.mubr.msk.bf16.gmra.mxu1 %vm667_vm5, %v5787_v5  ;;  %4749 = vmatprep.mubr.msk.bf16.mxu0 %vm667_vm5, %v933_v6  ;;  %v2119_v6 = vld [vmem:[%s5948_s22 + $0x61] sm:$0xff] }
  0x8b   : > { %4767 = vmatprep.mubr.msk.bf16.mxu1 %vm667_vm5, %v5704_v22  ;;  %v5841_v22 = vpack.c.bf16 %v930_v20, %v929_v19  ;;  %v5989_v61 = vpack.c.bf16 %v2120_v60, %v2119_v6  ;;  %v2100_v6 = vld [vmem:[%s5948_s22 + $0xa8] sm:$0xff]  ;;  %v2101_v60 = vld [vmem:[%s5948_s22 + $0xb0] sm:$0xff] }
  0x91   : > { %4750 = vmatmul.mubr.msk.bf16.vlgmr.msra.gmra.mxu0 %vm667_vm5, %v934_v63 }
  0x92   : > { %4768 = vmatmul.mubr.msk.bf16.vlgmr.msra.gmra.mxu1 %vm667_vm5, %v5715_v28  ;;  %4784 = vmatpush3.bf16.msra.mxu0 %v1303_v1  ;;  %v2123_v1 = vld [vmem:[%s5948_s22 + $0x91] sm:$0xff] }
  0x93   : > { %4802 = vmatpush3.bf16.msra.mxu1 %v1469_v8  ;;  %4753 = vmatprep.mubr.msk.bf16.mxu0 %vm667_vm5, %v5801_v2 }
  0x94   : > { %4771 = vmatprep.mubr.msk.bf16.mxu1 %vm667_vm5, %v5733_v38  ;;  %5041 = vmatprep.subr.msk.bf16.mxu0 %vm692_vm4, %v4243_v9 }
  0x95   : > { %5042 = vmatprep.subr.msk.bf16.mxu1 %vm692_vm4, %v4268_v11  ;;  %v2125_v11 = vld [vmem:[%s5948_s22 + $0xa9] sm:$0xff] }
  0x96   : > { %v6023_v19 = vpack.c.bf16 %v2126_v12, %v2125_v11  ;;  %v6131_v12 = vld [vmem:[%s6918_s3 + $0xe] sm:$0x3] }
  0x99   : > { %4754 = vmatmul.mubr.msk.bf16.gmra.mxu0 %vm667_vm5, %v5822_v15 }
  0x9a   : > { %4772 = vmatmul.mubr.msk.bf16.gmra.mxu1 %vm667_vm5, %v5737_v40  ;;  %4757 = vmatprep.mubr.msk.bf16.mxu0 %vm667_vm5, %v5825_v14 }
  0x9b   : > { %4775 = vmatprep.mubr.msk.bf16.mxu1 %vm667_vm5, %v5765_v49 }
  0xa1   : > { %4758 = vmatmul.mubr.msk.bf16.gmra.mxu0 %vm667_vm5, %v5839_v21 }
  0xa2   : > { %4776 = vmatmul.mubr.msk.bf16.gmra.mxu1 %vm667_vm5, %v5769_v57  ;;  %4761 = vmatprep.mubr.msk.bf16.mxu0 %vm667_vm5, %v5841_v22 }
  0xa3   : > { %4779 = vmatprep.mubr.msk.bf16.mxu1 %vm667_vm5, %v5787_v5 }
  0xa9   : > { %4762 = vmatmul.mubr.msk.bf16.gmra.mxu0 %vm667_vm5, %v5855_v29 }
  0xaa   : > { %4780 = vmatmul.mubr.msk.bf16.gmra.mxu1 %vm667_vm5, %v1109_v30  ;;  %4785 = vmatprep.mubr.msk.bf16.mxu0 %vm667_vm5, %v5697_v17  ;;  %v4302_v17 = vld [vmem:[%s6918_s3 + $0x2] sm:$0x3] }
  0xab   : > { %4803 = vmatprep.mubr.msk.bf16.mxu1 %vm667_vm5, %v934_v63  ;;  %v2162_v45 = vsel %vm692_vm4, %v4302_v17, 0  ;;  %v2122_v63 = vld [vmem:[%s5948_s22 + $0x81] sm:$0xff] }
  0xac   : > { %v6003_v8 = vpack.c.bf16 %v2122_v63, %v2121_v62  ;;  %v2399_v62 = vld [vmem:[%s5948_s22 + $0xaa] sm:$0xff]  ;;  %v2400_v63 = vld [vmem:[%s5948_s22 + $0xb2] sm:$0xff] }
  0xb1   : > { %4786 = vmatmul.mubr.msk.bf16.vlgmr.msra.gmra.mxu0 %vm667_vm5, %v5713_v27 }
  0xb2   : > { %4804 = vmatmul.mubr.msk.bf16.vlgmr.msra.gmra.mxu1 %vm667_vm5, %v5801_v2  ;;  %4820 = vmatpush3.bf16.msra.mxu0 %v1638_v31  ;;  %v2389_v31 = vld [vmem:[%s5948_s22 + $0x32] sm:$0xff] }
  0xb3   : > { %4838 = vmatpush3.bf16.msra.mxu1 %v1804_v32  ;;  %4789 = vmatprep.mubr.msk.bf16.mxu0 %vm667_vm5, %v5731_v37  ;;  %v2390_v32 = vld [vmem:[%s5948_s22 + $0x3a] sm:$0xff] }
  0xb4   : > { %4807 = vmatprep.mubr.msk.bf16.mxu1 %vm667_vm5, %v5822_v15  ;;  %5043 = vmatprep.subr.msk.bf16.mxu0 %vm692_vm4, %v4293_v36  ;;  %v6038_v36 = vpack.c.bf16 %v2388_v25, %v2387_v24  ;;  %v6044_v35 = vpack.c.bf16 %v2390_v32, %v2389_v31 }
  0xb5   : > { %5044 = vmatprep.subr.msk.bf16.mxu1 %vm692_vm4, %v4302_v17  ;;  %v2603_v17 = vsel %vm692_vm4, %v4346_v59, 0 }
  0xb9   : > { %4790 = vmatmul.mubr.msk.bf16.gmra.mxu0 %vm667_vm5, %v5735_v39 }
  0xba   : > { %4808 = vmatmul.mubr.msk.bf16.gmra.mxu1 %vm667_vm5, %v5825_v14  ;;  %4793 = vmatprep.mubr.msk.bf16.mxu0 %vm667_vm5, %v5763_v48 }
  0xbb   : > { %4811 = vmatprep.mubr.msk.bf16.mxu1 %vm667_vm5, %v5839_v21 }
  0xc1   : > { %4794 = vmatmul.mubr.msk.bf16.gmra.mxu0 %vm667_vm5, %v5767_v53 }
  0xc2   : > { %4812 = vmatmul.mubr.msk.bf16.gmra.mxu1 %vm667_vm5, %v5841_v22  ;;  %4797 = vmatprep.mubr.msk.bf16.mxu0 %vm667_vm5, %v5785_v4 }
  0xc3   : > { %4815 = vmatprep.mubr.msk.bf16.mxu1 %vm667_vm5, %v5855_v29 }
  0xc9   : > { %4798 = vmatmul.mubr.msk.bf16.gmra.mxu0 %vm667_vm5, %v1275_v42 }
  0xca   : > { %4816 = vmatmul.mubr.msk.bf16.gmra.mxu1 %vm667_vm5, %v5901_v43  ;;  %4821 = vmatprep.mubr.msk.bf16.mxu0 %vm667_vm5, %v5715_v28  ;;  %v4241_v28 = vld [vmem:[%s5687_s17 + $0xd8] sm:$0xff] }
  0xcb   : > { %4839 = vmatprep.mubr.msk.bf16.mxu1 %vm667_vm5, %v5713_v27  ;;  %v4319_v27 = vld [vmem:[%s6918_s3 + $0x4] sm:$0x3] }
  0xcc   : > { %v2436_v56 = vsel %vm692_vm4, %v4319_v27, 0 }
  0xd1   : > { %4822 = vmatmul.mubr.msk.bf16.vlgmr.msra.gmra.mxu0 %vm667_vm5, %v5733_v38  ;;  %v4266_v38 = vld [vmem:[%s5687_s17 + $0xd9] sm:$0xff] }
  0xd2   : > { %4840 = vmatmul.mubr.msk.bf16.vlgmr.msra.gmra.mxu1 %vm667_vm5, %v5731_v37  ;;  %4856 = vmatpush3.bf16.msra.mxu0 %v1970_v44  ;;  %v4242_v37 = vld [vmem:[%s5687_s17 + $0xe0] sm:$0xff]  ;;  %v2391_v44 = vld [vmem:[%s5948_s22 + $0x4a] sm:$0xff] }
  0xd3   : > { %4874 = vmatpush3.bf16.msra.mxu1 %v2162_v45  ;;  %4825 = vmatprep.mubr.msk.bf16.mxu0 %vm667_vm5, %v5737_v40  ;;  %v2111_v40 = vld [vmem:[%s5948_s22 + $0x1] sm:$0xff]  ;;  %v1610_v46 = vpack.c.bf16 %v4242_v37, %v4241_v28  ;;  %v4423_v45 = vld [vmem:[%s6918_s3 + $0xc] sm:$0x3] }
  0xd4   : > { %4843 = vmatprep.mubr.msk.bf16.mxu1 %vm667_vm5, %v5735_v39  ;;  %5045 = vmatprep.subr.msk.bf16.mxu0 %vm692_vm4, %v2110_v50  ;;  %v4267_v39 = vld [vmem:[%s5687_s17 + $0xe1] sm:$0xff]  ;;  %v2127_v47 = vpack.c.bf16 %v2112_v51, %v2111_v40  ;;  %v2392_v50 = vld [vmem:[%s5948_s22 + $0x52] sm:$0xff]  ;;  %v3102_v10 = vsel %vm692_vm4, %v4423_v45, 0 }
  0xd5   : > { %5046 = vmatprep.subr.msk.bf16.mxu1 %vm692_vm4, %v4319_v27  ;;  %v1776_v52 = vpack.c.bf16 %v4267_v39, %v4266_v38  ;;  %v2094_v27 = vld [vmem:[%s5948_s22 + $0x60] sm:$0xff]  ;;  %v2095_v28 = vld [vmem:[%s5948_s22 + $0x68] sm:$0xff]  ;;  %v6071_v40 = vpack.c.bf16 %v2392_v50, %v2391_v44 }
  0xd6   : > { %v2393_v37 = vld [vmem:[%s5948_s22 + $0x62] sm:$0xff]  ;;  %v2394_v38 = vld [vmem:[%s5948_s22 + $0x6a] sm:$0xff]  ;;  %v6073_v51 = vpack.c.bf16 %v2095_v28, %v2094_v27 }
  0xd7   : > { %v4344_v28 = vld [vmem:[%s5948_s22 + $0xc0] sm:$0xff] }
  0xd9   : > { %4826 = vmatmul.mubr.msk.bf16.gmra.mxu0 %vm667_vm5, %v5765_v49  ;;  %v2114_v49 = vld [vmem:[%s5948_s22 + $0x21] sm:$0xff] }
  0xda   : > { %4844 = vmatmul.mubr.msk.bf16.gmra.mxu1 %vm667_vm5, %v5763_v48  ;;  %4829 = vmatprep.mubr.msk.bf16.mxu0 %vm667_vm5, %v5769_v57  ;;  %v2113_v48 = vld [vmem:[%s5948_s22 + $0x19] sm:$0xff] }
  0xdb   : > { %4847 = vmatprep.mubr.msk.bf16.mxu1 %vm667_vm5, %v5767_v53  ;;  %v2115_v53 = vld [vmem:[%s5948_s22 + $0x31] sm:$0xff]  ;;  %v2116_v57 = vld [vmem:[%s5948_s22 + $0x39] sm:$0xff]  ;;  %v5961_v54 = vpack.c.bf16 %v2114_v49, %v2113_v48  ;;  %v2396_v49 = vld [vmem:[%s5948_s22 + $0x82] sm:$0xff] }
  0xdc   : > { %v5965_v58 = vpack.c.bf16 %v2116_v57, %v2115_v53  ;;  %v2395_v48 = vld [vmem:[%s5948_s22 + $0x7a] sm:$0xff]  ;;  %v2098_v53 = vld [vmem:[%s5948_s22 + $0x90] sm:$0xff] }
  0xdd   : > { %v2099_v57 = vld [vmem:[%s5948_s22 + $0x98] sm:$0xff] }
  0xe1   : > { %4830 = vmatmul.mubr.msk.bf16.gmra.mxu0 %vm667_vm5, %v5787_v5  ;;  %v2118_v5 = vld [vmem:[%s5948_s22 + $0x51] sm:$0xff] }
  0xe2   : > { %4848 = vmatmul.mubr.msk.bf16.gmra.mxu1 %vm667_vm5, %v5785_v4  ;;  %4833 = vmatprep.mubr.msk.bf16.mxu0 %vm667_vm5, %v1109_v30  ;;  %v2117_v4 = vld [vmem:[%s5948_s22 + $0x49] sm:$0xff] }
  0xe3   : > { %4851 = vmatprep.mubr.msk.bf16.mxu1 %vm667_vm5, %v1275_v42  ;;  %v5987_v7 = vpack.c.bf16 %v2118_v5, %v2117_v4  ;;  %v4396_v42 = vld [vmem:[%s6918_s3 + $0xa] sm:$0x3]  ;;  %v6097_v4 = vpack.c.bf16 %v2099_v57, %v2098_v53 }
  0xe4   : > { %v2935_v3 = vsel %vm692_vm4, %v4396_v42, 0 }
  0xe9   : > { %4834 = vmatmul.mubr.msk.bf16.gmra.mxu0 %vm667_vm5, %v1610_v46  ;;  %v6075_v46 = vpack.c.bf16 %v2394_v38, %v2393_v37  ;;  %v4345_v37 = vld [vmem:[%s5948_s22 + $0xc8] sm:$0xff] }
  0xea   : > { %4852 = vmatmul.mubr.msk.bf16.gmra.mxu1 %vm667_vm5, %v1776_v52  ;;  %4857 = vmatprep.mubr.msk.bf16.mxu0 %vm667_vm5, %v5801_v2  ;;  %v2124_v2 = vld [vmem:[%s5948_s22 + $0x99] sm:$0xff] }
  0xeb   : > { %4875 = vmatprep.mubr.msk.bf16.mxu1 %vm667_vm5, %v2127_v47  ;;  %v6005_v9 = vpack.c.bf16 %v2124_v2, %v2123_v1  ;;  %v2096_v52 = vld [vmem:[%s5948_s22 + $0x78] sm:$0xff]  ;;  %v2097_v47 = vld [vmem:[%s5948_s22 + $0x80] sm:$0xff]  ;;  %v6113_v1 = vpack.c.bf16 %v2101_v60, %v2100_v6  ;;  %v6115_v2 = vpack.c.bf16 %v2400_v63, %v2399_v62 }
  0xf1   : > { %4858 = vmatmul.mubr.msk.bf16.vlgmr.msra.gmra.mxu0 %vm667_vm5, %v5822_v15  ;;  %v2087_v15 = vld [vmem:[%s5948_s22 + $0x8] sm:$0xff] }
  0xf2   : > { %4876 = vmatmul.mubr.msk.bf16.vlgmr.msra.gmra.mxu1 %vm667_vm5, %v5961_v54  ;;  %4892 = vmatpush3.bf16.msra.mxu0 %v2286_v55  ;;  %v2102_v20 = vpack.c.bf16 %v2087_v15, %v2086_v13  ;;  %v2397_v55 = vld [vmem:[%s5948_s22 + $0x92] sm:$0xff] }
  0xf3   : > { %4910 = vmatpush3.bf16.msra.mxu1 %v2436_v56  ;;  %4861 = vmatprep.mubr.msk.bf16.mxu0 %vm667_vm5, %v5825_v14  ;;  %v2385_v14 = vld [vmem:[%s5948_s22 + $0x2] sm:$0xff]  ;;  %v2398_v56 = vld [vmem:[%s5948_s22 + $0x9a] sm:$0xff] }
  0xf4   : > { %4879 = vmatprep.mubr.msk.bf16.mxu1 %vm667_vm5, %v5965_v58  ;;  %5047 = vmatprep.subr.msk.bf16.mxu0 %vm692_vm4, %v4346_v59  ;;  %v6093_v59 = vpack.c.bf16 %v2097_v47, %v2096_v52  ;;  %v6099_v5 = vpack.c.bf16 %v2398_v56, %v2397_v55  ;;  %v4369_v47 = vld [vmem:[%s5948_s22 + $0xc1] sm:$0xff]  ;;  %v6188_v55 = vpack.c.bf16 %v4345_v37, %v4344_v28 }
  0xf5   : > { %5048 = vmatprep.subr.msk.bf16.mxu1 %vm692_vm4, %v4371_v0  ;;  %v6095_v0 = vpack.c.bf16 %v2396_v49, %v2395_v48  ;;  %v4370_v48 = vld [vmem:[%s5948_s22 + $0xc9] sm:$0xff] }
  0xf6   : > { %v6190_v6 = vpack.c.bf16 %v4370_v48, %v4369_v47 }
  0xf9   : > { %4862 = vmatmul.mubr.msk.bf16.gmra.mxu0 %vm667_vm5, %v5839_v21  ;;  %v2401_v21 = vpack.c.bf16 %v2386_v16, %v2385_v14 }
  0xfa   : > { %4880 = vmatmul.mubr.msk.bf16.gmra.mxu1 %vm667_vm5, %v5987_v7  ;;  %4865 = vmatprep.mubr.msk.bf16.mxu0 %vm667_vm5, %v5841_v22  ;;  %v2088_v22 = vld [vmem:[%s5948_s22 + $0x18] sm:$0xff] }
  0xfb   : > { %4883 = vmatprep.mubr.msk.bf16.mxu1 %vm667_vm5, %v5989_v61  ;;  %v2103_v30 = vpack.c.bf16 %v2089_v23, %v2088_v22 }
 0x101   : > { %4866 = vmatmul.mubr.msk.bf16.gmra.mxu0 %vm667_vm5, %v5855_v29  ;;  %v2091_v29 = vld [vmem:[%s5948_s22 + $0x38] sm:$0xff] }
 0x102   : > { %4884 = vmatmul.mubr.msk.bf16.gmra.mxu1 %vm667_vm5, %v6003_v8  ;;  %4869 = vmatprep.mubr.msk.bf16.mxu0 %vm667_vm5, %v5901_v43  ;;  %v6041_v33 = vpack.c.bf16 %v2091_v29, %v2090_v26  ;;  %v2093_v43 = vld [vmem:[%s5948_s22 + $0x50] sm:$0xff] }
 0x103   : > { %4887 = vmatprep.mubr.msk.bf16.mxu1 %vm667_vm5, %v6005_v9  ;;  %v6068_v39 = vpack.c.bf16 %v2093_v43, %v2092_v41 }
 0x109   : > { %4870 = vmatmul.mubr.msk.bf16.gmra.mxu0 %vm667_vm5, %v1942_v18 }
 0x10a   : > { %4888 = vmatmul.mubr.msk.bf16.gmra.mxu1 %vm667_vm5, %v6023_v19  ;;  %4893 = vmatprep.mubr.msk.bf16.mxu0 %vm667_vm5, %v2102_v20 }
 0x10b   : > { %4911 = vmatprep.mubr.msk.bf16.mxu1 %vm667_vm5, %v2401_v21 }
 0x111   : > { %4894 = vmatmul.mubr.msk.bf16.vlgmr.msra.gmra.mxu0 %vm667_vm5, %v2103_v30 }
 0x112   : > { %4912 = vmatmul.mubr.msk.bf16.vlgmr.msra.gmra.mxu1 %vm667_vm5, %v6038_v36  ;;  %4928 = vmatpush3.bf16.msra.mxu0 %v2603_v17 }
 0x113   : > { %4946 = vmatpush3.bf16.msra.mxu1 %v2769_v34  ;;  %4897 = vmatprep.mubr.msk.bf16.mxu0 %vm667_vm5, %v6041_v33 }
 0x114   : > { %4915 = vmatprep.mubr.msk.bf16.mxu1 %vm667_vm5, %v6044_v35  ;;  %5049 = vmatprep.subr.msk.bf16.mxu0 %vm692_vm4, %v4396_v42 }
 0x115   : > { %5050 = vmatprep.subr.msk.bf16.mxu1 %vm692_vm4, %v4423_v45 }
 0x119   : > { %4898 = vmatmul.mubr.msk.bf16.gmra.mxu0 %vm667_vm5, %v6068_v39 }
 0x11a   : > { %4916 = vmatmul.mubr.msk.bf16.gmra.mxu1 %vm667_vm5, %v6071_v40  ;;  %4901 = vmatprep.mubr.msk.bf16.mxu0 %vm667_vm5, %v6073_v51 }
 0x11b   : > { %4919 = vmatprep.mubr.msk.bf16.mxu1 %vm667_vm5, %v6075_v46 }
 0x121   : > { %4902 = vmatmul.mubr.msk.bf16.gmra.mxu0 %vm667_vm5, %v6093_v59 }
 0x122   : > { %4920 = vmatmul.mubr.msk.bf16.gmra.mxu1 %vm667_vm5, %v6095_v0  ;;  %4905 = vmatprep.mubr.msk.bf16.mxu0 %vm667_vm5, %v6097_v4 }
 0x123   : > { %4923 = vmatprep.mubr.msk.bf16.mxu1 %vm667_vm5, %v6099_v5 }
 0x129   : > { %4906 = vmatmul.mubr.msk.bf16.gmra.mxu0 %vm667_vm5, %v6113_v1 }
 0x12a   : > { %4924 = vmatmul.mubr.msk.bf16.gmra.mxu1 %vm667_vm5, %v6115_v2  ;;  %4929 = vmatprep.mubr.msk.bf16.mxu0 %vm667_vm5, %v2103_v30 }
 0x12b   : > { %4947 = vmatprep.mubr.msk.bf16.mxu1 %vm667_vm5, %v5961_v54  ;;  %v6138_v54 = vld [vmem:[%s6918_s3 + $0x10] sm:$0x3] }
 0x131   : > { %v4715_v11 = vpop.f32.mrf.mxu0  ;;  %4930 = vmatmul.mubr.msk.bf16.vlgmr.msra.gmra.mxu0 %vm667_vm5, %v6041_v33 }
 0x132   : > { %v4733_v13 = vpop.f32.mrf.mxu1  ;;  %4948 = vmatmul.mubr.msk.bf16.vlgmr.msra.gmra.mxu1 %vm667_vm5, %v5965_v58  ;;  %4964 = vmatpush3.bf16.msra.mxu0 %v2935_v3 }
 0x133   : > { %v6140_v15 = vadd.f32 %v4733_v13, %v4715_v11  ;;  %v730_v14 = vpop.f32.mrf.mxu0  ;;  %4982 = vmatpush3.bf16.msra.mxu1 %v3102_v10  ;;  %4933 = vmatprep.mubr.msk.bf16.mxu0 %vm667_vm5, %v6068_v39 }
 0x134   : > { %v854_v16 = vpop.f32.mrf.mxu1  ;;  %4951 = vmatprep.mubr.msk.bf16.mxu1 %vm667_vm5, %v5987_v7  ;;  %5051 = vmatprep.subr.msk.bf16.mxu0 %vm692_vm4, %v6131_v12 }
 0x135   : > { %v6148_v18 = vadd.f32 %v854_v16, %v730_v14  ;;  %v4716_v20 = vpop.f32.mrf.mxu0  ;;  %5052 = vmatprep.subr.msk.bf16.mxu1 %vm692_vm4, %v6138_v54 }
 0x136   : > { %v4734_v21 = vpop.f32.mrf.mxu1 }
 0x137   : > { %v6152_v22 = vadd.f32 %v4734_v21, %v4716_v20  ;;  %v733_v23 = vpop.f32.mrf.mxu0 }
 0x138   : > { %v857_v24 = vpop.f32.mrf.mxu1 }
 0x139   : > { %v6154_v25 = vadd.f32 %v857_v24, %v733_v23  ;;  %v4719_v26 = vpop.f32.mrf.mxu0  ;;  %4934 = vmatmul.mubr.msk.bf16.gmra.mxu0 %vm667_vm5, %v6073_v51 }
 0x13a   : > { %v4737_v29 = vpop.f32.mrf.mxu1  ;;  %4952 = vmatmul.mubr.msk.bf16.gmra.mxu1 %vm667_vm5, %v5989_v61  ;;  %4937 = vmatprep.mubr.msk.bf16.mxu0 %vm667_vm5, %v6093_v59 }
 0x13b   : > { %v6162_v30 = vadd.f32 %v4737_v29, %v4719_v26  ;;  %v746_v31 = vpop.f32.mrf.mxu0  ;;  %4955 = vmatprep.mubr.msk.bf16.mxu1 %vm667_vm5, %v6003_v8  ;;  %v3268_v29 = vsel %vm692_vm4, %v6131_v12, 0 }
 0x13c   : > { %v870_v32 = vpop.f32.mrf.mxu1 }
 0x13d   : > { %v6166_v17 = vadd.f32 %v870_v32, %v746_v31  ;;  %v4720_v34 = vpop.f32.mrf.mxu0 }
 0x13e   : > { %v4738_v41 = vpop.f32.mrf.mxu1 }
 0x13f   : > { %v6168_v42 = vadd.f32 %v4738_v41, %v4720_v34  ;;  %v749_v43 = vpop.f32.mrf.mxu0 }
 0x140   : > { %v873_v44 = vpop.f32.mrf.mxu1 }
 0x141   : > { %v6170_v45 = vadd.f32 %v873_v44, %v749_v43  ;;  %v4723_v50 = vpop.f32.mrf.mxu0  ;;  %4938 = vmatmul.mubr.msk.bf16.gmra.mxu0 %vm667_vm5, %v6097_v4 }
 0x142   : > { %v4741_v27 = vpop.f32.mrf.mxu1  ;;  %4956 = vmatmul.mubr.msk.bf16.gmra.mxu1 %vm667_vm5, %v6005_v9  ;;  %4941 = vmatprep.mubr.msk.bf16.mxu0 %vm667_vm5, %v6113_v1 }
 0x143   : > { %v6180_v38 = vadd.f32 %v4741_v27, %v4723_v50  ;;  %v762_v52 = vpop.f32.mrf.mxu0  ;;  %4959 = vmatprep.mubr.msk.bf16.mxu1 %vm667_vm5, %v6023_v19 }
 0x144   : > { %v886_v49 = vpop.f32.mrf.mxu1 }
 0x145   : > { %v6186_v53 = vadd.f32 %v886_v49, %v762_v52  ;;  %v4724_v57 = vpop.f32.mrf.mxu0 }
 0x146   : > { %v4742_v56 = vpop.f32.mrf.mxu1 }
 0x147   : > { %v6192_v60 = vadd.f32 %v4742_v56, %v4724_v57  ;;  %v765_v62 = vpop.f32.mrf.mxu0 }
 0x148   : > { %v889_v63 = vpop.f32.mrf.mxu1 }
 0x149   : > { %v6194_v3 = vadd.f32 %v889_v63, %v765_v62  ;;  %v4727_v10 = vpop.f32.mrf.mxu0  ;;  %4942 = vmatmul.mubr.msk.bf16.gmra.mxu0 %vm667_vm5, %v6188_v55 }
 0x14a   : > { %v4745_v11 = vpop.f32.mrf.mxu1  ;;  %4960 = vmatmul.mubr.msk.bf16.gmra.mxu1 %vm667_vm5, %v6190_v6  ;;  %4965 = vmatprep.mubr.msk.bf16.mxu0 %vm667_vm5, %v6038_v36  ;;  %v3434_v36 = vsel %vm692_vm4, %v6138_v54, 0 }
 0x14b   : > { %v6202_v13 = vadd.f32 %v4745_v11, %v4727_v10  ;;  %v778_v14 = vpop.f32.mrf.mxu0  ;;  %4983 = vmatprep.mubr.msk.bf16.mxu1 %vm667_vm5, %v6041_v33 }
 0x14c   : > { %v902_v16 = vpop.f32.mrf.mxu1 }
 0x14d   : > { %v6206_v20 = vadd.f32 %v902_v16, %v778_v14  ;;  %v4728_v21 = vpop.f32.mrf.mxu0 }
 0x14e   : > { %v4746_v23 = vpop.f32.mrf.mxu1 }
 0x14f   : > { %v6208_v24 = vadd.f32 %v4746_v23, %v4728_v21  ;;  %v781_v26 = vpop.f32.mrf.mxu0 }
 0x150   : > { %v905_v31 = vpop.f32.mrf.mxu1 }
 0x151   : > { %v6214_v32 = vadd.f32 %v905_v31, %v781_v26  ;;  %v4751_v34 = vpop.f32.mrf.mxu0  ;;  %4966 = vmatmul.mubr.msk.bf16.vlgmr.msra.gmra.mxu0 %vm667_vm5, %v6044_v35  ;;  %v4395_v26 = vld [vmem:[%s5948_s22 + $0xca] sm:$0xff]  ;;  %v4422_v31 = vld [vmem:[%s5948_s22 + $0xe0] sm:$0xff] }
 0x152   : > { %v1069_v33 = vadd.f32 %v4751_v34, %v6140_v15  ;;  %v4769_v41 = vpop.f32.mrf.mxu1  ;;  %4984 = vmatmul.mubr.msk.bf16.vlgmr.msra.gmra.mxu1 %vm667_vm5, %v6068_v39  ;;  %5000 = vmatpush3.bf16.msra.mxu0 %v3268_v29 }
 0x153   : > { %v1004_v43 = vpop.f32.mrf.mxu0  ;;  %5018 = vmatpush3.bf16.msra.mxu1 %v3434_v36  ;;  %4969 = vmatprep.mubr.msk.bf16.mxu0 %vm667_vm5, %v6071_v40 }
 0x154   : > { %v6223_v12 = vadd.f32 %v4769_v41, %v1069_v33  ;;  %v1067_v54 = vadd.f32 %v1004_v43, %v6148_v18  ;;  %v1173_v44 = vpop.f32.mrf.mxu1  ;;  %4987 = vmatprep.mubr.msk.bf16.mxu1 %vm667_vm5, %v6073_v51 }
 0x155   : > { %v4752_v50 = vpop.f32.mrf.mxu0 }
 0x156   : > { %v6228_v15 = vadd.f32 %v1173_v44, %v1067_v54  ;;  %v1070_v27 = vadd.f32 %v4752_v50, %v6152_v22  ;;  %v4770_v39 = vpop.f32.mrf.mxu1 }
 0x157   : > { %v1007_v28 = vpop.f32.mrf.mxu0 }
 0x158   : > { %v6231_v37 = vadd.f32 %v4770_v39, %v1070_v27  ;;  %v1068_v52 = vadd.f32 %v1007_v28, %v6154_v25  ;;  %v1176_v47 = vpop.f32.mrf.mxu1 }
 0x159   : > { %v4755_v48 = vpop.f32.mrf.mxu0  ;;  %4970 = vmatmul.mubr.msk.bf16.gmra.mxu0 %vm667_vm5, %v6075_v46 }
 0x15a   : > { %v6236_v18 = vadd.f32 %v1176_v47, %v1068_v52  ;;  %v1073_v51 = vadd.f32 %v4755_v48, %v6162_v30  ;;  %v4773_v49 = vpop.f32.mrf.mxu1  ;;  %4988 = vmatmul.mubr.msk.bf16.gmra.mxu1 %vm667_vm5, %v6093_v59  ;;  %4973 = vmatprep.mubr.msk.bf16.mxu0 %vm667_vm5, %v6095_v0 }
 0x15b   : > { %v1020_v22 = vpop.f32.mrf.mxu0  ;;  %4991 = vmatprep.mubr.msk.bf16.mxu1 %vm667_vm5, %v6097_v4 }
 0x15c   : > { %v6245_v25 = vadd.f32 %v4773_v49, %v1073_v51  ;;  %v1071_v57 = vadd.f32 %v1020_v22, %v6166_v17  ;;  %v1189_v56 = vpop.f32.mrf.mxu1 }
 0x15d   : > { %v4756_v62 = vpop.f32.mrf.mxu0 }
 0x15e   : > { %v6248_v30 = vadd.f32 %v1189_v56, %v1071_v57  ;;  %v1074_v63 = vadd.f32 %v4756_v62, %v6168_v42  ;;  %v4774_v59 = vpop.f32.mrf.mxu1  ;;  %v4394_v42 = vld [vmem:[%s5948_s22 + $0xc2] sm:$0xff] }
 0x15f   : > { %v1023_v10 = vpop.f32.mrf.mxu0  ;;  %v2907_v41 = vpack.c.bf16 %v4395_v26, %v4394_v42  ;;  %v4447_v26 = vld [vmem:[%s5948_s22 + $0xe1] sm:$0xff] }
 0x160   : > { %v6251_v11 = vadd.f32 %v4774_v59, %v1074_v63  ;;  %v1072_v4 = vadd.f32 %v1023_v10, %v6170_v45  ;;  %v1192_v14 = vpop.f32.mrf.mxu1  ;;  %v4421_v45 = vld [vmem:[%s5948_s22 + $0xd8] sm:$0xff] }
 0x161   : > { %v4759_v16 = vpop.f32.mrf.mxu0  ;;  %4974 = vmatmul.mubr.msk.bf16.gmra.mxu0 %vm667_vm5, %v6099_v5  ;;  %v3074_v44 = vpack.c.bf16 %v4422_v31, %v4421_v45  ;;  %v4471_v45 = vld [vmem:[%s5948_s22 + $0xda] sm:$0xff]  ;;  %v4472_v31 = vld [vmem:[%s5948_s22 + $0xe2] sm:$0xff] }
 0x162   : > { %v6256_v17 = vadd.f32 %v1192_v14, %v1072_v4  ;;  %v1077_v21 = vadd.f32 %v4759_v16, %v6180_v38  ;;  %v4777_v23 = vpop.f32.mrf.mxu1  ;;  %4992 = vmatmul.mubr.msk.bf16.gmra.mxu1 %vm667_vm5, %v6113_v1  ;;  %4977 = vmatprep.mubr.msk.bf16.mxu0 %vm667_vm5, %v6115_v2 }
 0x163   : > { %v1036_v29 = vpop.f32.mrf.mxu0  ;;  %4995 = vmatprep.mubr.msk.bf16.mxu1 %vm667_vm5, %v6188_v55 }
 0x164   : > { %v6269_v36 = vadd.f32 %v4777_v23, %v1077_v21  ;;  %v1075_v34 = vadd.f32 %v1036_v29, %v6186_v53  ;;  %v1205_v38 = vpop.f32.mrf.mxu1 }
 0x165   : > { %v4760_v33 = vpop.f32.mrf.mxu0 }
 0x166   : > { %v6272_v43 = vadd.f32 %v1205_v38, %v1075_v34  ;;  %v1078_v1 = vadd.f32 %v4760_v33, %v6192_v60  ;;  %v4778_v54 = vpop.f32.mrf.mxu1 }
 0x167   : > { %v1039_v50 = vpop.f32.mrf.mxu0 }
 0x168   : > { %v6275_v27 = vadd.f32 %v4778_v54, %v1078_v1  ;;  %v1076_v55 = vadd.f32 %v1039_v50, %v6194_v3  ;;  %v1208_v39 = vpop.f32.mrf.mxu1  ;;  %v3406_v1 = vpack.c.bf16 %v4472_v31, %v4471_v45 }
 0x169   : > { %v4763_v28 = vpop.f32.mrf.mxu0  ;;  %4978 = vmatmul.mubr.msk.bf16.gmra.mxu0 %vm667_vm5, %v2907_v41 }
 0x16a   : > { %v6279_v52 = vadd.f32 %v1208_v39, %v1076_v55  ;;  %v1081_v53 = vadd.f32 %v4763_v28, %v6202_v13  ;;  %v4781_v47 = vpop.f32.mrf.mxu1  ;;  %4996 = vmatmul.mubr.msk.bf16.gmra.mxu1 %vm667_vm5, %v3074_v44  ;;  %5001 = vmatprep.mubr.msk.bf16.mxu0 %vm667_vm5, %v5965_v58 }
 0x16b   : > { %v1052_v60 = vpop.f32.mrf.mxu0  ;;  %5019 = vmatprep.mubr.msk.bf16.mxu1 %vm667_vm5, %v6044_v35 }
 0x16c   : > { %v6287_v48 = vadd.f32 %v4781_v47, %v1081_v53  ;;  %v1079_v3 = vadd.f32 %v1052_v60, %v6206_v20  ;;  %v1221_v51 = vpop.f32.mrf.mxu1 }
 0x16d   : > { %v4764_v49 = vpop.f32.mrf.mxu0 }
 0x16e   : > { %v6290_v22 = vadd.f32 %v1221_v51, %v1079_v3  ;;  %v1082_v13 = vadd.f32 %v4764_v49, %v6208_v24  ;;  %v4782_v57 = vpop.f32.mrf.mxu1 }
 0x16f   : > { %v1055_v56 = vpop.f32.mrf.mxu0 }
 0x170   : > { %v6293_v62 = vadd.f32 %v4782_v57, %v1082_v13  ;;  %v1080_v58 = vadd.f32 %v1055_v56, %v6214_v32  ;;  %v1224_v63 = vpop.f32.mrf.mxu1 }
 0x171   : > { %v6296_v59 = vpop.f32.mrf.mxu0  ;;  %5002 = vmatmul.mubr.msk.bf16.vlgmr.msra.gmra.mxu0 %vm667_vm5, %v5987_v7 }
 0x172   : > { %v6300_v35 = vadd.f32 %v1224_v63, %v1080_v58  ;;  %v6302_v20 = vpop.f32.mrf.mxu1  ;;  %5020 = vmatmul.mubr.msk.bf16.vlgmr.msra.gmra.mxu1 %vm667_vm5, %v6071_v40  ;;  %5005 = vmatprep.mubr.msk.bf16.mxu0 %vm667_vm5, %v5989_v61 }
 0x173   : > { %v6308_v24 = vpop.f32.mrf.mxu0  ;;  %5023 = vmatprep.mubr.msk.bf16.mxu1 %vm667_vm5, %v6075_v46 }
 0x174   : > { %v6312_v32 = vpop.f32.mrf.mxu1 }
 0x175   : > { %v6314_v10 = vpop.f32.mrf.mxu0 }
 0x176   : > { %v6316_v7 = vpop.f32.mrf.mxu1 }
 0x177   : > { %v6318_v4 = vpop.f32.mrf.mxu0 }
 0x178   : > { %v6320_v14 = vpop.f32.mrf.mxu1 }
 0x179   : > { %v6322_v16 = vpop.f32.mrf.mxu0  ;;  %5006 = vmatmul.mubr.msk.bf16.gmra.mxu0 %vm667_vm5, %v6003_v8 }
 0x17a   : > { %v6326_v61 = vpop.f32.mrf.mxu1  ;;  %5024 = vmatmul.mubr.msk.bf16.gmra.mxu1 %vm667_vm5, %v6095_v0  ;;  %5009 = vmatprep.mubr.msk.bf16.mxu0 %vm667_vm5, %v6005_v9 }
 0x17b   : > { %v6332_v40 = vpop.f32.mrf.mxu0  ;;  %5027 = vmatprep.mubr.msk.bf16.mxu1 %vm667_vm5, %v6099_v5  ;;  %v4446_v5 = vld [vmem:[%s5948_s22 + $0xd9] sm:$0xff] }
 0x17c   : > { %v6336_v46 = vpop.f32.mrf.mxu1 }
 0x17d   : > { %v6338_v8 = vpop.f32.mrf.mxu0 }
 0x17e   : > { %v6340_v21 = vpop.f32.mrf.mxu1 }
 0x17f   : > { %v6342_v23 = vpop.f32.mrf.mxu0 }
 0x180   : > { %v6344_v42 = vpop.f32.mrf.mxu1 }
 0x181   : > { %v6346_v0 = vpop.f32.mrf.mxu0  ;;  %5010 = vmatmul.mubr.msk.bf16.gmra.mxu0 %vm667_vm5, %v6023_v19  ;;  %v3240_v19 = vpack.c.bf16 %v4447_v26, %v4446_v5 }
 0x182   : > { %v6350_v9 = vpop.f32.mrf.mxu1  ;;  %5028 = vmatmul.mubr.msk.bf16.gmra.mxu1 %vm667_vm5, %v6115_v2  ;;  %5013 = vmatprep.mubr.msk.bf16.mxu0 %vm667_vm5, %v6190_v6 }
 0x183   : > { %v6358_v29 = vpop.f32.mrf.mxu0  ;;  %5031 = vmatprep.mubr.msk.bf16.mxu1 %vm667_vm5, %v2907_v41 }
 0x184   : > { %v6363_v34 = vpop.f32.mrf.mxu1 }
 0x185   : > { %v6365_v38 = vpop.f32.mrf.mxu0 }
 0x186   : > { %v6367_v33 = vpop.f32.mrf.mxu1 }
 0x187   : > { %v1374_v2 = vpop.f32.mrf.mxu0 }
 0x188   : > { %v6369_v54 = vpop.f32.mrf.mxu1 }
 0x189   : > { %v6371_v6 = vpop.f32.mrf.mxu0  ;;  %5014 = vmatmul.mubr.msk.bf16.gmra.mxu0 %vm667_vm5, %v3240_v19 }
 0x18a   : > { %v6374_v44 = vpop.f32.mrf.mxu1  ;;  %5032 = vmatmul.mubr.msk.bf16.gmra.mxu1 %vm667_vm5, %v3406_v1 }
 0x18b   : > { %v6377_v41 = vpop.f32.mrf.mxu0 }
 0x18c   : > { %v6379_v50 = vpop.f32.mrf.mxu1 }
 0x18d   : > { %6923 = vst [vmem:[#allocation5_spill] sm:$0xff] %v6379_v50  ;;  %v6381_v55 = vpop.f32.mrf.mxu0 }
 0x18e   : > { %v6383_v39 = vpop.f32.mrf.mxu1 }
 0x18f   : > { %6924 = vst [vmem:[#allocation6_spill] sm:$0xff] %v6383_v39  ;;  %v6385_v28 = vpop.f32.mrf.mxu0 }
 0x190   : > { %v6387_v53 = vpop.f32.mrf.mxu1 }
 0x191   : > { %6925 = vst [vmem:[#allocation7_spill] sm:$0xff] %v6387_v53  ;;  %v4823_v47 = vpop.f32.mrf.mxu0 }
 0x192   : > { %v4841_v60 = vpop.f32.mrf.mxu1 }
 0x193   : > { %v1674_v3 = vpop.f32.mrf.mxu0 }
 0x194   : > { %v1840_v51 = vpop.f32.mrf.mxu1 }
 0x195   : > { %v4824_v49 = vpop.f32.mrf.mxu0 }
 0x196   : > { %v6389_v13 = vpop.f32.mrf.mxu1 }
 0x197   : > { %6926 = vst [vmem:[#allocation8_spill] sm:$0xff] %v6389_v13  ;;  %v1677_v57 = vpop.f32.mrf.mxu0 }
 0x198   : > { %v6391_v56 = vpop.f32.mrf.mxu1 }
 0x199   : > { %6927 = vst [vmem:[#allocation9_spill] sm:$0xff] %v6391_v56  ;;  %v6393_v58 = vpop.f32.mrf.mxu0 }
 0x19a   : > { %v6395_v63 = vpop.f32.mrf.mxu1 }
 0x19b   : > { %6928 = vst [vmem:[#allocation10_spill] sm:$0xff] %v6395_v63  ;;  %v6397_v5 = vpop.f32.mrf.mxu0 }
 0x19c   : > { %v6399_v26 = vpop.f32.mrf.mxu1 }
 0x19d   : > { %6929 = vst [vmem:[#allocation11_spill] sm:$0xff] %v6399_v26  ;;  %v4828_v45 = vpop.f32.mrf.mxu0  ;;  %v1404_v26 = vadd.f32 %v6296_v59, %v6223_v12  ;;  %v1408_v12 = vadd.f32 %v6322_v16, %v6245_v25 }
 0x19e   : > { %v6401_v31 = vpop.f32.mrf.mxu1 }
 0x19f   : > { %6930 = vst [vmem:[#allocation12_spill] sm:$0xff] %v6401_v31  ;;  %v6403_v19 = vpop.f32.mrf.mxu0  ;;  %v1402_v31 = vadd.f32 %v6308_v24, %v6228_v15  ;;  %v1406_v24 = vadd.f32 %v6332_v40, %v6248_v30  ;;  %v1574_v16 = vadd.f32 %v6326_v61, %v1408_v12 }
 0x1a0   : > { %6931 = vst [vmem:[#allocation13_spill] sm:$0xff] %v6403_v19  ;;  %v6405_v1 = vpop.f32.mrf.mxu1 }
 0x1a1   : > { %6932 = vst [vmem:[#allocation14_spill] sm:$0xff] %v6405_v1  ;;  %v6407_v53 = vpop.f32.mrf.mxu0  ;;  %v1568_v15 = vadd.f32 %v6312_v32, %v1402_v31  ;;  %v6943_v31 = vld [vmem:[#allocation9_spill] sm:$0xff] }
 0x1a2   : > { %6933 = vst [vmem:[#allocation15_spill] sm:$0xff] %v6407_v53  ;;  %v6409_v39 = vpop.f32.mrf.mxu1 }
 0x1a3   : > { %6934 = vst [vmem:[#allocation16_spill] sm:$0xff] %v6409_v39  ;;  %v6411_v56 = vpop.f32.mrf.mxu0  ;;  %v1570_v39 = vadd.f32 %v6302_v20, %v1404_v26  ;;  %v1409_v20 = vadd.f32 %v6338_v8, %v6251_v11  ;;  %v1737_v40 = vadd.f32 %v1674_v3, %v1568_v15  ;;  %v1413_v8 = vadd.f32 %v6365_v38, %v6275_v27 }
 0x1a4   : > { %v6413_v13 = vpop.f32.mrf.mxu1  ;;  %v1414_v27 = vadd.f32 %v6377_v41, %v6290_v22  ;;  %v1743_v22 = vadd.f32 %v6393_v58, %v1574_v16  ;;  %v6941_v58 = vld [vmem:[#allocation6_spill] sm:$0xff]  ;;  %v6946_v16 = vld [vmem:[#allocation11_spill] sm:$0xff] }
 0x1a5   : > { %6935 = vst [vmem:[#allocation17_spill] sm:$0xff] %v6413_v13  ;;  %v6415_v63 = vpop.f32.mrf.mxu0  ;;  %v1405_v13 = vadd.f32 %v6314_v10, %v6231_v37  ;;  %v1407_v37 = vadd.f32 %v6342_v23, %v6256_v17  ;;  %v1739_v10 = vadd.f32 %v4823_v47, %v1570_v39  ;;  %v1572_v17 = vadd.f32 %v6336_v46, %v1406_v24  ;;  %v6944_v24 = vld [vmem:[#allocation10_spill] sm:$0xff] }
 0x1a6   : > { %6936 = vst [vmem:[#allocation18_spill] sm:$0xff] %v6415_v63  ;;  %v6419_v50 = vpop.f32.mrf.mxu1  ;;  %v1403_v63 = vadd.f32 %v6318_v4, %v6236_v18  ;;  %v1412_v18 = vadd.f32 %v6346_v0, %v6269_v36  ;;  %v1410_v36 = vadd.f32 %v6358_v29, %v6272_v43  ;;  %v1411_v23 = vadd.f32 %v1374_v2, %v6279_v52 }
 0x1a7   : > { %v6423_v19 = vpop.f32.mrf.mxu0  ;;  %v1571_v32 = vadd.f32 %v6316_v7, %v1405_v13  ;;  %v1575_v7 = vadd.f32 %v6340_v21, %v1409_v20  ;;  %v1905_v39 = vadd.f32 %v4841_v60, %v1739_v10  ;;  %v1416_v43 = vadd.f32 %v6371_v6, %v6287_v48 }
 0x1a8   : > { %v6425_v1 = vpop.f32.mrf.mxu1  ;;  %v1569_v30 = vadd.f32 %v6320_v14, %v1403_v63  ;;  %v1573_v14 = vadd.f32 %v6344_v42, %v1407_v37  ;;  %v1578_v61 = vadd.f32 %v6350_v9, %v1412_v18  ;;  %v1417_v52 = vadd.f32 %v6381_v55, %v6293_v62 }
 0x1a9   : > { %6937 = vst [vmem:[#allocation19_spill] sm:$0xff] %v6425_v1  ;;  %v6427_v53 = vpop.f32.mrf.mxu0  ;;  %v1740_v46 = vadd.f32 %v4824_v49, %v1571_v32  ;;  %v1415_v21 = vadd.f32 %v6385_v28, %v6300_v35  ;;  %v1903_v42 = vadd.f32 %v1840_v51, %v1737_v40  ;;  %v1576_v60 = vadd.f32 %v6363_v34, %v1410_v36  ;;  %v6938_v49 = vld [vmem:[#allocation5_spill] sm:$0xff]  ;;  %v6939_v34 = vld [vmem:[#allocation8_spill] sm:$0xff]  ;;  %v6945_v37 = vld [vmem:[#allocation15_spill] sm:$0xff] }
 0x1aa   : > { %v6436_v59 = vpop.f32.mrf.mxu1  ;;  %v1738_v9 = vadd.f32 %v1677_v57, %v1569_v30  ;;  %v1579_v48 = vadd.f32 %v6367_v33, %v1413_v8  ;;  %v1577_v6 = vadd.f32 %v6369_v54, %v1411_v23  ;;  %v1741_v41 = vadd.f32 %v6397_v5, %v1572_v17  ;;  %v6940_v57 = vld [vmem:[#allocation13_spill] sm:$0xff]  ;;  %v6942_v5 = vld [vmem:[#allocation7_spill] sm:$0xff]  ;;  %v6947_v17 = vld [vmem:[#allocation12_spill] sm:$0xff] }
 0x1ab   : > { %v6441_v1 = vpop.f32.mrf.mxu0  ;;  %v1744_v55 = vadd.f32 %v4828_v45, %v1575_v7  ;;  %v1582_v51 = vadd.f32 %v6374_v44, %v1416_v43  ;;  %v6490_v13 = vadd.f32 %v6938_v49, %v1414_v27  ;;  %v1906_v33 = vadd.f32 %v6939_v34, %v1740_v46 }
 0x1ac   : > { %v6449_v25 = vpop.f32.mrf.mxu1  ;;  %v1742_v54 = vadd.f32 %v6940_v57, %v1573_v14  ;;  %v6495_v26 = vadd.f32 %v6941_v58, %v1417_v52  ;;  %v6498_v45 = vadd.f32 %v6942_v5, %v1415_v21  ;;  %v1904_v12 = vadd.f32 %v6943_v31, %v1738_v9  ;;  %v6948_v14 = vld [vmem:[#allocation14_spill] sm:$0xff]  ;;  %v6949_v9 = vld [vmem:[#allocation16_spill] sm:$0xff] }
 0x1ad   : > { %v6451_v4 = vpop.f32.mrf.mxu0  ;;  %v1909_v20 = vadd.f32 %v6944_v24, %v1743_v22  ;;  %v1747_v18 = vadd.f32 %v6945_v37, %v1578_v61  ;;  %v1745_v10 = vadd.f32 %v6411_v56, %v1576_v60  ;;  %v1907_v40 = vadd.f32 %v6946_v16, %v1741_v41  ;;  %v6950_v22 = vld [vmem:[#allocation17_spill] sm:$0xff] }
 0x1ae   : > { %v6456_v11 = vpop.f32.mrf.mxu1  ;;  %v1910_v36 = vadd.f32 %v6947_v17, %v1744_v55 }
 0x1af   : > { %v6464_v0 = vpop.f32.mrf.mxu0  ;;  %v1913_v60 = vadd.f32 %v6949_v9, %v1747_v18  ;;  %v1751_v18 = vadd.f32 %v6427_v53, %v1582_v51 }
 0x1b0   : > { %v6469_v47 = vpop.f32.mrf.mxu1  ;;  %v6952_v9 = vld [vmem:[#allocation19_spill] sm:$0xff] }
 0x1b1   : > { %v4859_v29 = vpop.f32.mrf.mxu0 }
 0x1b2   : > { %v2071_v38 = vadd.f32 %v4859_v29, %v1905_v39  ;;  %v6479_v2 = vpop.f32.mrf.mxu1  ;;  %v1908_v39 = vadd.f32 %v6948_v14, %v1742_v54  ;;  %v6951_v54 = vld [vmem:[#allocation18_spill] sm:$0xff]  ;;  %v1749_v14 = vadd.f32 %v6441_v1, %v6490_v13  ;;  %v1917_v1 = vadd.f32 %v6436_v59, %v1751_v18 }
 0x1b3   : > { %v2006_v62 = vpop.f32.mrf.mxu0 }
 0x1b4   : > { %v4519_v3 = vpack.c.bf16 %v2071_v38, %v2071_v38  ;;  %v2069_v35 = vadd.f32 %v2006_v62, %v1903_v42  ;;  %v6486_v28 = vpop.f32.mrf.mxu1  ;;  %v3755_v43 = vmul.f32 %v2071_v38, %v2071_v38  ;;  %v1911_v62 = vadd.f32 %v6950_v22, %v1745_v10 }
 0x1b5   : > { %v4860_v63 = vpop.f32.mrf.mxu0  ;;  %v3715_v41 = vsel %vm3711_vm7, %v2071_v38, 0.0 }
 0x1b6   : > { %3616 = vst.msk [vmem:[%s5216_s19 + $0x8] sm:$0xf] %vm3613_vm6, %v4519_v3  ;;  %v4517_v44 = vpack.c.bf16 %v2069_v35, %v2069_v35  ;;  %v6503_v15 = vpop.f32.mrf.mxu1  ;;  %v2072_v32 = vadd.f32 %v4860_v63, %v1906_v33  ;;  %v3753_v8 = vmul.f32 %v2069_v35, %v2069_v35  ;;  %v3712_v61 = vsel %vm3711_vm7, %v2069_v35, 0.0 }
 0x1b7   : > { %v2009_v30 = vpop.f32.mrf.mxu0  ;;  %v1748_v63 = vadd.f32 %v6951_v54, %v1579_v48 }
 0x1b8   : > { %3614 = vst.msk [vmem:[%s5216_s19] sm:$0xf] %vm3613_vm6, %v4517_v44  ;;  %v2070_v23 = vadd.f32 %v2009_v30, %v1904_v12  ;;  %v6512_v7 = vpop.f32.mrf.mxu1  ;;  %v4520_v56 = vpack.c.bf16 %v2072_v32, %v2072_v32  ;;  %v3769_v35 = vsel %vm3711_vm7, %v3753_v8, 0.0  ;;  %v3756_v49 = vmul.f32 %v2072_v32, %v2072_v32 }
 0x1b9   : > { %v4863_v27 = vpop.f32.mrf.mxu0  ;;  %v1746_v12 = vadd.f32 %v6423_v19, %v1577_v6  ;;  %v3772_v44 = vsel %vm3711_vm7, %v3755_v43, 0.0  ;;  %v3717_v24 = vsel %vm3711_vm7, %v2072_v32, 0.0  ;;  %v1914_v32 = vadd.f32 %v6419_v50, %v1748_v63 }
 0x1ba   : > { %v4518_v52 = vpack.c.bf16 %v2070_v23, %v2070_v23  ;;  %v3713_v46 = vsel %vm3711_vm7, %v2070_v23, 0.0  ;;  %v3754_v29 = vmul.f32 %v2070_v23, %v2070_v23  ;;  %v2075_v21 = vadd.f32 %v4863_v27, %v1909_v20  ;;  %v6517_v42 = vpop.f32.mrf.mxu1  ;;  %3617 = vst.msk [vmem:[%s5216_s19 + $0xc] sm:$0xf] %vm3613_vm6, %v4520_v56 }
 0x1bb   : > { %v3714_v55 = vadd.f32 %v3713_v46, %v3712_v61  ;;  %v2022_v3 = vpop.f32.mrf.mxu0  ;;  %v1912_v22 = vadd.f32 %v6952_v9, %v1746_v12 }
 0x1bc   : > { %3615 = vst.msk [vmem:[%s5216_s19 + $0x4] sm:$0xf] %vm3613_vm6, %v4518_v52  ;;  %v3770_v34 = vsel %vm3711_vm7, %v3754_v29, 0.0  ;;  %v4523_v33 = vpack.c.bf16 %v2075_v21, %v2075_v21  ;;  %v6528_v57 = vpop.f32.mrf.mxu1  ;;  %v2073_v38 = vadd.f32 %v2022_v3, %v1907_v40  ;;  %v3774_v40 = vsel %vm3711_vm7, %v3756_v49, 0.0 }
 0x1bd   : > { %v3716_v58 = vadd.f32 %v3715_v41, %v3714_v55  ;;  %v3771_v5 = vadd.f32 %v3770_v34, %v3769_v35  ;;  %v4864_v31 = vpop.f32.mrf.mxu0  ;;  %v3759_v43 = vmul.f32 %v2075_v21, %v2075_v21  ;;  %v3723_v3 = vsel %vm3711_vm7, %v2075_v21, 0.0 }
 0x1be   : > { %3620 = vst.msk [vmem:[%s5216_s19 + $0x18] sm:$0xf] %vm3613_vm6, %v4523_v33  ;;  %v2076_v20 = vadd.f32 %v4864_v31, %v1910_v36  ;;  %v6536_v37 = vpop.f32.mrf.mxu1  ;;  %v4521_v48 = vpack.c.bf16 %v2073_v38, %v2073_v38  ;;  %v3719_v19 = vsel %vm3711_vm7, %v2073_v38, 0.0  ;;  %v3757_v6 = vmul.f32 %v2073_v38, %v2073_v38 }
 0x1bf   : > { %v3773_v10 = vadd.f32 %v3772_v44, %v3771_v5  ;;  %v3718_v30 = vadd.f32 %v3717_v24, %v3716_v58  ;;  %v2025_v16 = vpop.f32.mrf.mxu0  ;;  %v1915_v33 = vadd.f32 %v6449_v25, %v1749_v14  ;;  %v3780_v5 = vsel %vm3711_vm7, %v3759_v43, 0.0 }
 0x1c0   : > { %v4524_v17 = vpack.c.bf16 %v2076_v20, %v2076_v20  ;;  %v6541_v8 = vpop.f32.mrf.mxu1  ;;  %3618 = vst.msk [vmem:[%s5216_s19 + $0x10] sm:$0xf] %vm3613_vm6, %v4521_v48  ;;  %v2074_v53 = vadd.f32 %v2025_v16, %v1908_v39  ;;  %v3776_v61 = vsel %vm3711_vm7, %v3757_v6, 0.0  ;;  %v3725_v21 = vsel %vm3711_vm7, %v2076_v20, 0.0 }
 0x1c1   : > { %v3720_v36 = vadd.f32 %v3719_v19, %v3718_v30  ;;  %v3775_v23 = vadd.f32 %v3774_v40, %v3773_v10  ;;  %v4867_v51 = vpop.f32.mrf.mxu0  ;;  %v1750_v10 = vadd.f32 %v6464_v0, %v6498_v45 }
 0x1c2   : > { %3621 = vst.msk [vmem:[%s5216_s19 + $0x1c] sm:$0xf] %vm3613_vm6, %v4524_v17  ;;  %v2079_v56 = vadd.f32 %v4867_v51, %v1913_v60  ;;  %v6551_v27 = vpop.f32.mrf.mxu1  ;;  %v4522_v50 = vpack.c.bf16 %v2074_v53, %v2074_v53  ;;  %v3721_v46 = vsel %vm3711_vm7, %v2074_v53, 0.0  ;;  %v3758_v29 = vmul.f32 %v2074_v53, %v2074_v53 }
 0x1c3   : > { %v3777_v52 = vadd.f32 %v3776_v61, %v3775_v23  ;;  %v2038_v39 = vpop.f32.mrf.mxu0  ;;  %v3722_v13 = vadd.f32 %v3721_v46, %v3720_v36  ;;  %v3760_v60 = vmul.f32 %v2076_v20, %v2076_v20 }
 0x1c4   : > { %v4527_v41 = vpack.c.bf16 %v2079_v56, %v2079_v56  ;;  %v6556_v55 = vpop.f32.mrf.mxu1  ;;  %3619 = vst.msk [vmem:[%s5216_s19 + $0x14] sm:$0xf] %vm3613_vm6, %v4522_v50  ;;  %v3778_v35 = vsel %vm3711_vm7, %v3758_v29, 0.0  ;;  %v2077_v49 = vadd.f32 %v2038_v39, %v1911_v62  ;;  %v1752_v62 = vadd.f32 %v6451_v4, %v6495_v26 }
 0x1c5   : > { %v4868_v34 = vpop.f32.mrf.mxu0  ;;  %v3724_v54 = vadd.f32 %v3723_v3, %v3722_v13  ;;  %v3779_v63 = vadd.f32 %v3778_v35, %v3777_v52  ;;  %v3782_v48 = vsel %vm3711_vm7, %v3760_v60, 0.0  ;;  %v3763_v40 = vmul.f32 %v2079_v56, %v2079_v56 }
 0x1c6   : > { %3624 = vst.msk [vmem:[%s5216_s19 + $0x28] sm:$0xf] %vm3613_vm6, %v4527_v41  ;;  %v2080_v59 = vadd.f32 %v4868_v34, %v1914_v32  ;;  %v6565_v58 = vpop.f32.mrf.mxu1  ;;  %v4525_v38 = vpack.c.bf16 %v2077_v49, %v2077_v49  ;;  %v3761_v31 = vmul.f32 %v2077_v49, %v2077_v49  ;;  %v3727_v20 = vsel %vm3711_vm7, %v2077_v49, 0.0 }
 0x1c7   : > { %v2041_v12 = vpop.f32.mrf.mxu0  ;;  %v3781_v25 = vadd.f32 %v3780_v5, %v3779_v63  ;;  %v3726_v44 = vadd.f32 %v3725_v21, %v3724_v54  ;;  %v1918_v23 = vadd.f32 %v6456_v11, %v1752_v62  ;;  %v3731_v61 = vsel %vm3711_vm7, %v2079_v56, 0.0 }
 0x1c8   : > { %v4528_v24 = vpack.c.bf16 %v2080_v59, %v2080_v59  ;;  %v6571_v18 = vpop.f32.mrf.mxu1  ;;  %3622 = vst.msk [vmem:[%s5216_s19 + $0x20] sm:$0xf] %vm3613_vm6, %v4525_v38  ;;  %v2078_v30 = vadd.f32 %v2041_v12, %v1912_v22  ;;  %v3784_v17 = vsel %vm3711_vm7, %v3761_v31, 0.0  ;;  %v3764_v52 = vmul.f32 %v2080_v59, %v2080_v59 }
 0x1c9   : > { %v4871_v16 = vpop.f32.mrf.mxu0  ;;  %v3728_v19 = vadd.f32 %v3727_v20, %v3726_v44  ;;  %v3783_v6 = vadd.f32 %v3782_v48, %v3781_v25  ;;  %v1916_v39 = vadd.f32 %v6469_v47, %v1750_v10  ;;  %v3788_v13 = vsel %vm3711_vm7, %v3763_v40, 0.0 }
 0x1ca   : > { %3625 = vst.msk [vmem:[%s5216_s19 + $0x2c] sm:$0xf] %vm3613_vm6, %v4528_v24  ;;  %v2083_v4 = vadd.f32 %v4871_v16, %v1917_v1  ;;  %v6581_v26 = vpop.f32.mrf.mxu1  ;;  %v4526_v0 = vpack.c.bf16 %v2078_v30, %v2078_v30  ;;  %v3729_v45 = vsel %vm3711_vm7, %v2078_v30, 0.0  ;;  %v3762_v32 = vmul.f32 %v2078_v30, %v2078_v30 }
 0x1cb   : > { %v2054_v36 = vpop.f32.mrf.mxu0  ;;  %v3785_v53 = vadd.f32 %v3784_v17, %v3783_v6  ;;  %v3730_v51 = vadd.f32 %v3729_v45, %v3728_v19  ;;  %v3733_v56 = vsel %vm3711_vm7, %v2080_v59, 0.0 }
 0x1cc   : > { %v4531_v14 = vpack.c.bf16 %v2083_v4, %v2083_v4  ;;  %v6586_v43 = vpop.f32.mrf.mxu1  ;;  %3623 = vst.msk [vmem:[%s5216_s19 + $0x24] sm:$0xf] %vm3613_vm6, %v4526_v0  ;;  %v3786_v50 = vsel %vm3711_vm7, %v3762_v32, 0.0  ;;  %v2081_v46 = vadd.f32 %v2054_v36, %v1915_v33  ;;  %v3790_v33 = vsel %vm3711_vm7, %v3764_v52, 0.0 }
 0x1cd   : > { %v4872_v29 = vpop.f32.mrf.mxu0  ;;  %v3732_v9 = vadd.f32 %v3731_v61, %v3730_v51  ;;  %v3787_v22 = vadd.f32 %v3786_v50, %v3785_v53  ;;  %v3767_v21 = vmul.f32 %v2083_v4, %v2083_v4  ;;  %v3739_v19 = vsel %vm3711_vm7, %v2083_v4, 0.0 }
 0x1ce   : > { %3628 = vst.msk [vmem:[%s5216_s19 + $0x38] sm:$0xf] %vm3613_vm6, %v4531_v14  ;;  %v2084_v11 = vadd.f32 %v4872_v29, %v1918_v23  ;;  %v6595_v1 = vpop.f32.mrf.mxu1  ;;  %v4529_v41 = vpack.c.bf16 %v2081_v46, %v2081_v46  ;;  %v3765_v3 = vmul.f32 %v2081_v46, %v2081_v46  ;;  %v3735_v54 = vsel %vm3711_vm7, %v2081_v46, 0.0 }
 0x1cf   : > { %v2057_v60 = vpop.f32.mrf.mxu0  ;;  %v3789_v35 = vadd.f32 %v3788_v13, %v3787_v22  ;;  %v3734_v49 = vadd.f32 %v3733_v56, %v3732_v9  ;;  %v3796_v53 = vsel %vm3711_vm7, %v3767_v21, 0.0 }
 0x1d0   : > { %v4532_v34 = vpack.c.bf16 %v2084_v11, %v2084_v11  ;;  %v6599_v47 = vpop.f32.mrf.mxu1  ;;  %3626 = vst.msk [vmem:[%s5216_s19 + $0x30] sm:$0xf] %vm3613_vm6, %v4529_v41  ;;  %v2082_v63 = vadd.f32 %v2057_v60, %v1916_v39  ;;  %v3792_v62 = vsel %vm3711_vm7, %v3765_v3, 0.0  ;;  %v3768_v6 = vmul.f32 %v2084_v11, %v2084_v11 }
 0x1d1   : > { %v4895_v5 = vpop.f32.mrf.mxu0  ;;  %v3736_v38 = vadd.f32 %v3735_v54, %v3734_v49  ;;  %v3791_v59 = vadd.f32 %v3790_v33, %v3789_v35 }
 0x1d2   : > { %3629 = vst.msk [vmem:[%s5216_s19 + $0x3c] sm:$0xf] %vm3613_vm6, %v4532_v34  ;;  %v2331_v31 = vadd.f32 %v4895_v5, %v6479_v2  ;;  %v4913_v12 = vpop.f32.mrf.mxu1  ;;  %v4530_v25 = vpack.c.bf16 %v2082_v63, %v2082_v63  ;;  %v3737_v44 = vsel %vm3711_vm7, %v2082_v63, 0.0  ;;  %v3766_v24 = vmul.f32 %v2082_v63, %v2082_v63 }
 0x1d3   : > { %v2322_v10 = vpop.f32.mrf.mxu0  ;;  %v3793_v48 = vadd.f32 %v3792_v62, %v3791_v59  ;;  %v3738_v20 = vadd.f32 %v3737_v44, %v3736_v38  ;;  %v3798_v46 = vsel %vm3711_vm7, %v3768_v6, 0.0 }
 0x1d4   : > { %v6610_v30 = vadd.f32 %v4913_v12, %v2331_v31  ;;  %v2323_v16 = vadd.f32 %v2322_v10, %v6486_v28  ;;  %v2472_v40 = vpop.f32.mrf.mxu1  ;;  %3627 = vst.msk [vmem:[%s5216_s19 + $0x34] sm:$0xf] %vm3613_vm6, %v4530_v25  ;;  %v3794_v2 = vsel %vm3711_vm7, %v3766_v24, 0.0  ;;  %v3741_v28 = vsel %vm3711_vm7, %v2084_v11, 0.0  ;;  %v3710_v10 = vld [vmem:[%s5211_s16] sm:$0x1] }
 0x1d5   : > { %v4896_v17 = vpop.f32.mrf.mxu0  ;;  %v3740_v0 = vadd.f32 %v3739_v19, %v3738_v20  ;;  %v3795_v45 = vadd.f32 %v3794_v2, %v3793_v48  ;;  %v3752_v19 = vld [vmem:[%s5211_s16 + $0x1] sm:$0x1] }
 0x1d6   : > { %v6617_v32 = vadd.f32 %v2472_v40, %v2323_v16  ;;  %v2334_v36 = vadd.f32 %v4896_v17, %v6503_v15  ;;  %v4914_v23 = vpop.f32.mrf.mxu1 }
 0x1d7   : > { %v2325_v51 = vpop.f32.mrf.mxu0  ;;  %v3742_v14 = vadd.f32 %v3741_v28, %v3740_v0  ;;  %v3797_v4 = vadd.f32 %v3796_v53, %v3795_v45 }
 0x1d8   : > { %v6622_v61 = vadd.f32 %v4914_v23, %v2334_v36  ;;  %v2326_v52 = vadd.f32 %v2325_v51, %v6512_v7  ;;  %v2475_v50 = vpop.f32.mrf.mxu1 }
 0x1d9   : > { %v4899_v29 = vpop.f32.mrf.mxu0  ;;  %v3743_v39 = vrot.slane %v3742_v14, 4  ;;  %v3799_v9 = vadd.f32 %v3798_v46, %v3797_v4 }
 0x1da   : > { %v6626_v22 = vadd.f32 %v2475_v50, %v2326_v52  ;;  %v2347_v15 = vadd.f32 %v4899_v29, %v6517_v42  ;;  %v4917_v13 = vpop.f32.mrf.mxu1 }
 0x1db   : > { %v2338_v56 = vpop.f32.mrf.mxu0  ;;  %v3744_v11 = vadd.f32 %v3743_v39, %v3742_v14  ;;  %v3800_v41 = vrot.slane %v3799_v9, 4 }
 0x1dc   : > { %v6629_v3 = vadd.f32 %v4917_v13, %v2347_v15  ;;  %v2339_v60 = vadd.f32 %v2338_v56, %v6528_v57  ;;  %v2488_v35 = vpop.f32.mrf.mxu1 }
 0x1dd   : > { %v4900_v7 = vpop.f32.mrf.mxu0  ;;  %v3745_v49 = vrot.slane %v3744_v11, 2  ;;  %v3801_v34 = vadd.f32 %v3800_v41, %v3799_v9 }
 0x1de   : > { %v6632_v33 = vadd.f32 %v2488_v35, %v2339_v60  ;;  %v2350_v54 = vadd.f32 %v4900_v7, %v6536_v37  ;;  %v4918_v63 = vpop.f32.mrf.mxu1 }
 0x1df   : > { %v2341_v5 = vpop.f32.mrf.mxu0  ;;  %v3746_v42 = vadd.f32 %v3745_v49, %v3744_v11  ;;  %v3802_v21 = vrot.slane %v3801_v34, 2 }
 0x1e0   : > { %v6635_v38 = vadd.f32 %v4918_v63, %v2350_v54  ;;  %v2342_v59 = vadd.f32 %v2341_v5, %v6541_v8  ;;  %v2491_v31 = vpop.f32.mrf.mxu1 }
 0x1e1   : > { %v4903_v57 = vpop.f32.mrf.mxu0  ;;  %v3747_v12 = vrot.slane %v3746_v42, 1  ;;  %v3803_v62 = vadd.f32 %v3802_v21, %v3801_v34 }
 0x1e2   : > { %v6638_v25 = vadd.f32 %v2491_v31, %v2342_v59  ;;  %v2363_v44 = vadd.f32 %v4903_v57, %v6551_v27  ;;  %v4921_v24 = vpop.f32.mrf.mxu1 }
 0x1e3   : > { %v2354_v37 = vpop.f32.mrf.mxu0  ;;  %v3748_v48 = vadd.f32 %v3747_v12, %v3746_v42  ;;  %v3804_v20 = vrot.slane %v3803_v62, 1 }
 0x1e4   : > { %v6642_v16 = vadd.f32 %v4921_v24, %v2363_v44  ;;  %v2355_v40 = vadd.f32 %v2354_v37, %v6556_v55  ;;  %v2504_v8 = vpop.f32.mrf.mxu1 }
 0x1e5   : > { %v4904_v6 = vpop.f32.mrf.mxu0  ;;  %v3749_v2 = vadd.f32 %v3748_v48, %v3710_v10  ;;  %v3805_v17 = vadd.f32 %v3804_v20, %v3803_v62 }
 0x1e6   : > { %v6646_v0 = vadd.f32 %v2504_v8, %v2355_v40  ;;  %v2366_v27 = vadd.f32 %v4904_v6, %v6565_v58  ;;  %v4922_v45 = vpop.f32.mrf.mxu1 }
 0x1e7   : > { %v2357_v36 = vpop.f32.mrf.mxu0  ;;  %3751 = vst.msk [vmem:[%s5211_s16] sm:$0x1] %vm3750_vm8, %v3749_v2  ;;  %v3806_v23 = vadd.f32 %v3805_v17, %v3752_v19 }
 0x1e8   : > { %v6651_v53 = vadd.f32 %v4922_v45, %v2366_v27  ;;  %v2358_v55 = vadd.f32 %v2357_v36, %v6571_v18  ;;  %v2507_v28 = vpop.f32.mrf.mxu1 }
 0x1e9   : > { %v4907_v51 = vpop.f32.mrf.mxu0  ;;  %3807 = vst.msk [vmem:[%s5211_s16 + $0x1] sm:$0x1] %vm3750_vm8, %v3806_v23 }
 0x1ea   : > { %v6656_v14 = vadd.f32 %v2507_v28, %v2358_v55  ;;  %v2379_v4 = vadd.f32 %v4907_v51, %v6581_v26  ;;  %v4925_v52 = vpop.f32.mrf.mxu1 }
 0x1eb   : > { %v2370_v50 = vpop.f32.mrf.mxu0 }
 0x1ec   : > { %v6659_v58 = vadd.f32 %v4925_v52, %v2379_v4  ;;  %v2371_v46 = vadd.f32 %v2370_v50, %v6586_v43  ;;  %v2520_v29 = vpop.f32.mrf.mxu1 }
 0x1ed   : > { %v4908_v39 = vpop.f32.mrf.mxu0 }
 0x1ee   : > { %v6662_v9 = vadd.f32 %v2520_v29, %v2371_v46  ;;  %v2382_v18 = vadd.f32 %v4908_v39, %v6595_v1  ;;  %v4926_v15 = vpop.f32.mrf.mxu1 }
 0x1ef   : > { %v2373_v13 = vpop.f32.mrf.mxu0 }
 0x1f0   : > { %v6665_v56 = vadd.f32 %v4926_v15, %v2382_v18  ;;  %v2374_v11 = vadd.f32 %v2373_v13, %v6599_v47  ;;  %v2523_v41 = vpop.f32.mrf.mxu1 }
 0x1f1   : > { %v4931_v26 = vpop.f32.mrf.mxu0 }
 0x1f2   : > { %v6668_v60 = vadd.f32 %v2523_v41, %v2374_v11  ;;  %v4949_v35 = vpop.f32.mrf.mxu1 }
 0x1f3   : > { %v2639_v7 = vpop.f32.mrf.mxu0 }
 0x1f4   : > { %v2805_v49 = vpop.f32.mrf.mxu1 }
 0x1f5   : > { %v4932_v43 = vpop.f32.mrf.mxu0 }
 0x1f6   : > { %v6670_v34 = vpop.f32.mrf.mxu1 }
 0x1f7   : > { %v2642_v54 = vpop.f32.mrf.mxu0 }
 0x1f8   : > { %v6672_v63 = vpop.f32.mrf.mxu1 }
 0x1f9   : > { %v4935_v1 = vpop.f32.mrf.mxu0 }
 0x1fa   : > { %v6674_v5 = vpop.f32.mrf.mxu1 }
 0x1fb   : > { %v2655_v42 = vpop.f32.mrf.mxu0 }
 0x1fc   : > { %v6676_v21 = vpop.f32.mrf.mxu1 }
 0x1fd   : > { %v4936_v47 = vpop.f32.mrf.mxu0 }
 0x1fe   : > { %v6678_v59 = vpop.f32.mrf.mxu1 }
 0x1ff   : > { %v2658_v31 = vpop.f32.mrf.mxu0 }
 0x200   : > { %v6680_v57 = vpop.f32.mrf.mxu1 }
 0x201   : > { %v4939_v12 = vpop.f32.mrf.mxu0 }
 0x202   : > { %v6682_v62 = vpop.f32.mrf.mxu1 }
 0x203   : > { %v2671_v44 = vpop.f32.mrf.mxu0 }
 0x204   : > { %v6684_v24 = vpop.f32.mrf.mxu1 }
 0x205   : > { %v4940_v10 = vpop.f32.mrf.mxu0 }
 0x206   : > { %v6686_v37 = vpop.f32.mrf.mxu1 }
 0x207   : > { %v2674_v48 = vpop.f32.mrf.mxu0 }
 0x208   : > { %v6688_v20 = vpop.f32.mrf.mxu1 }
 0x209   : > { %v4943_v40 = vpop.f32.mrf.mxu0 }
 0x20a   : > { %v6690_v8 = vpop.f32.mrf.mxu1 }
 0x20b   : > { %v2687_v19 = vpop.f32.mrf.mxu0 }
 0x20c   : > { %v6692_v6 = vpop.f32.mrf.mxu1 }
 0x20d   : > { %v4944_v2 = vpop.f32.mrf.mxu0 }
 0x20e   : > { %v6694_v17 = vpop.f32.mrf.mxu1 }
 0x20f   : > { %v2690_v27 = vpop.f32.mrf.mxu0 }
 0x210   : > { %v6696_v45 = vpop.f32.mrf.mxu1 }
 0x211   : > { %6953 = vst [vmem:[#allocation5_spill] sm:$0xff] %v6696_v45  ;;  %v4967_v36 = vpop.f32.mrf.mxu0 }
 0x212   : > { %v4985_v23 = vpop.f32.mrf.mxu1 }
 0x213   : > { %v2971_v55 = vpop.f32.mrf.mxu0 }
 0x214   : > { %v6698_v28 = vpop.f32.mrf.mxu1 }
 0x215   : > { %v4968_v51 = vpop.f32.mrf.mxu0 }
 0x216   : > { %v6700_v4 = vpop.f32.mrf.mxu1 }
 0x217   : > { %6954 = vst [vmem:[#allocation8_spill] sm:$0xff] %v6700_v4  ;;  %v2974_v52 = vpop.f32.mrf.mxu0 }
 0x218   : > { %v6702_v50 = vpop.f32.mrf.mxu1 }
 0x219   : > { %6955 = vst [vmem:[#allocation13_spill] sm:$0xff] %v6702_v50  ;;  %v6704_v46 = vpop.f32.mrf.mxu0 }
 0x21a   : > { %6956 = vst [vmem:[#allocation6_spill] sm:$0xff] %v6704_v46  ;;  %v6706_v29 = vpop.f32.mrf.mxu1 }
 0x21b   : > { %6957 = vst [vmem:[#allocation7_spill] sm:$0xff] %v6706_v29  ;;  %v6708_v39 = vpop.f32.mrf.mxu0 }
 0x21c   : > { %6958 = vst [vmem:[#allocation9_spill] sm:$0xff] %v6708_v39  ;;  %v6710_v18 = vpop.f32.mrf.mxu1 }
 0x21d   : > { %6959 = vst [vmem:[#allocation10_spill] sm:$0xff] %v6710_v18  ;;  %v6712_v15 = vpop.f32.mrf.mxu0  ;;  %v2704_v18 = vadd.f32 %v4931_v26, %v6610_v30  ;;  %v2706_v26 = vadd.f32 %v2655_v42, %v6632_v33 }
 0x21e   : > { %6960 = vst [vmem:[#allocation15_spill] sm:$0xff] %v6712_v15  ;;  %v6714_v13 = vpop.f32.mrf.mxu1 }
 0x21f   : > { %6961 = vst [vmem:[#allocation11_spill] sm:$0xff] %v6714_v13  ;;  %v6716_v11 = vpop.f32.mrf.mxu0  ;;  %v2702_v13 = vadd.f32 %v2639_v7, %v6617_v32  ;;  %v2709_v32 = vadd.f32 %v4936_v47, %v6635_v38  ;;  %v2707_v7 = vadd.f32 %v2658_v31, %v6638_v25  ;;  %v2711_v38 = vadd.f32 %v2674_v48, %v6656_v14 }
 0x220   : > { %6962 = vst [vmem:[#allocation12_spill] sm:$0xff] %v6716_v11  ;;  %v6718_v41 = vpop.f32.mrf.mxu1  ;;  %v2716_v25 = vadd.f32 %v4943_v40, %v6659_v58  ;;  %v2872_v47 = vadd.f32 %v6676_v21, %v2706_v26 }
 0x221   : > { %6963 = vst [vmem:[#allocation14_spill] sm:$0xff] %v6718_v41  ;;  %v6720_v4 = vpop.f32.mrf.mxu0  ;;  %v2705_v41 = vadd.f32 %v4932_v43, %v6622_v61  ;;  %v2868_v30 = vadd.f32 %v2805_v49, %v2702_v13  ;;  %v2712_v61 = vadd.f32 %v4939_v12, %v6642_v16  ;;  %v2713_v49 = vadd.f32 %v4940_v10, %v6651_v53 }
 0x222   : > { %6964 = vst [vmem:[#allocation16_spill] sm:$0xff] %v6720_v4  ;;  %v6722_v45 = vpop.f32.mrf.mxu1  ;;  %v2875_v31 = vadd.f32 %v6678_v59, %v2709_v32  ;;  %v2882_v48 = vadd.f32 %v6690_v8, %v2716_v25 }
 0x223   : > { %6965 = vst [vmem:[#allocation17_spill] sm:$0xff] %v6722_v45  ;;  %v6724_v50 = vpop.f32.mrf.mxu0  ;;  %v2703_v45 = vadd.f32 %v2642_v54, %v6626_v22  ;;  %v2710_v54 = vadd.f32 %v2671_v44, %v6646_v0  ;;  %v3034_v16 = vadd.f32 %v2971_v55, %v2868_v30  ;;  %v2715_v0 = vadd.f32 %v2690_v27, %v6668_v60 }
 0x224   : > { %6966 = vst [vmem:[#allocation18_spill] sm:$0xff] %v6724_v50  ;;  %v6726_v46 = vpop.f32.mrf.mxu1  ;;  %v2870_v50 = vadd.f32 %v4949_v35, %v2704_v18  ;;  %v2871_v35 = vadd.f32 %v6670_v34, %v2705_v41  ;;  %v2714_v34 = vadd.f32 %v2687_v19, %v6662_v9  ;;  %v2878_v14 = vadd.f32 %v6682_v62, %v2712_v61 }
 0x225   : > { %6967 = vst [vmem:[#allocation19_spill] sm:$0xff] %v6726_v46  ;;  %v6728_v29 = vpop.f32.mrf.mxu0  ;;  %v2708_v46 = vadd.f32 %v4935_v1, %v6629_v3  ;;  %v2869_v3 = vadd.f32 %v6672_v63, %v2703_v45  ;;  %v2717_v63 = vadd.f32 %v4944_v2, %v6665_v56  ;;  %v2876_v44 = vadd.f32 %v6684_v24, %v2710_v54  ;;  %v6970_v2 = vld [vmem:[#allocation5_spill] sm:$0xff]  ;;  %v6980_v54 = vld [vmem:[#allocation7_spill] sm:$0xff] }
 0x226   : > { %6968 = vst [vmem:[#allocation20_spill] sm:$0xff] %v6728_v29  ;;  %v6731_v39 = vpop.f32.mrf.mxu1  ;;  %v3036_v43 = vadd.f32 %v4967_v36, %v2870_v50  ;;  %v2879_v21 = vadd.f32 %v6686_v37, %v2713_v49  ;;  %v3037_v9 = vadd.f32 %v4968_v51, %v2871_v35  ;;  %v2877_v60 = vadd.f32 %v6688_v20, %v2711_v38  ;;  %v6971_v37 = vld [vmem:[#allocation6_spill] sm:$0xff]  ;;  %v6972_v36 = vld [vmem:[#allocation9_spill] sm:$0xff]  ;;  %v6973_v20 = vld [vmem:[#allocation15_spill] sm:$0xff] }
 0x227   : > { %6969 = vst [vmem:[#allocation21_spill] sm:$0xff] %v6731_v39  ;;  %v6734_v15 = vpop.f32.mrf.mxu0  ;;  %v2874_v1 = vadd.f32 %v6674_v5, %v2708_v46  ;;  %v2873_v5 = vadd.f32 %v6680_v57, %v2707_v7  ;;  %v3035_v10 = vadd.f32 %v2974_v52, %v2869_v3  ;;  %v3201_v59 = vadd.f32 %v6698_v28, %v3034_v16  ;;  %v6974_v52 = vld [vmem:[#allocation8_spill] sm:$0xff]  ;;  %v6975_v46 = vld [vmem:[#allocation13_spill] sm:$0xff] }
 0x228   : > { %v6736_v11 = vpop.f32.mrf.mxu1  ;;  %v3203_v58 = vadd.f32 %v4985_v23, %v3036_v43  ;;  %v2880_v62 = vadd.f32 %v6692_v6, %v2714_v34  ;;  %v6782_v19 = vadd.f32 %v6694_v17, %v2717_v63  ;;  %v6785_v24 = vadd.f32 %v6970_v2, %v2715_v0  ;;  %v6976_v18 = vld [vmem:[#allocation12_spill] sm:$0xff]  ;;  %v6982_v63 = vld [vmem:[#allocation11_spill] sm:$0xff] }
 0x229   : > { %v6740_v4 = vpop.f32.mrf.mxu0  ;;  %v3040_v27 = vadd.f32 %v6971_v37, %v2874_v1  ;;  %v3038_v23 = vadd.f32 %v6972_v36, %v2872_v47  ;;  %v3041_v55 = vadd.f32 %v6973_v20, %v2875_v31  ;;  %v3204_v50 = vadd.f32 %v6974_v52, %v3037_v9  ;;  %v6977_v13 = vld [vmem:[#allocation16_spill] sm:$0xff]  ;;  %v6981_v47 = vld [vmem:[#allocation10_spill] sm:$0xff] }
 0x22a   : > { %v6743_v29 = vpop.f32.mrf.mxu1  ;;  %v3202_v6 = vadd.f32 %v6975_v46, %v3035_v10  ;;  %v3039_v17 = vadd.f32 %v6976_v18, %v2873_v5  ;;  %v3044_v41 = vadd.f32 %v6977_v13, %v2878_v14  ;;  %v3043_v1 = vadd.f32 %v6734_v15, %v2877_v60 }
 0x22b   : > { %v6746_v39 = vpop.f32.mrf.mxu0  ;;  %v6978_v26 = vld [vmem:[#allocation18_spill] sm:$0xff]  ;;  %v3207_v49 = vadd.f32 %v6980_v54, %v3040_v27  ;;  %v3048_v38 = vadd.f32 %v6740_v4, %v2882_v48  ;;  %v3205_v34 = vadd.f32 %v6981_v47, %v3038_v23  ;;  %v3208_v0 = vadd.f32 %v6982_v63, %v3041_v55 }
 0x22c   : > { %v6751_v22 = vpop.f32.mrf.mxu1  ;;  %v3042_v32 = vadd.f32 %v6978_v26, %v2876_v44  ;;  %v3046_v31 = vadd.f32 %v6746_v39, %v2880_v62  ;;  %v6815_v62 = vadd.f32 %v6736_v11, %v3043_v1 }
 0x22d   : > { %v6757_v33 = vpop.f32.mrf.mxu0  ;;  %v6979_v7 = vld [vmem:[#allocation20_spill] sm:$0xff]  ;;  %v6818_v2 = vadd.f32 %v6743_v29, %v3048_v38 }
 0x22e   : > { %v6762_v42 = vpop.f32.mrf.mxu1  ;;  %v3045_v61 = vadd.f32 %v6979_v7, %v2879_v21  ;;  %v6984_v21 = vld [vmem:[#allocation17_spill] sm:$0xff]  ;;  %v6821_v36 = vadd.f32 %v6751_v22, %v3046_v31 }
 0x22f   : > { %v6768_v53 = vpop.f32.mrf.mxu0  ;;  %v3211_v9 = vadd.f32 %v6984_v21, %v3044_v41  ;;  %v6986_v48 = vld [vmem:[#allocation21_spill] sm:$0xff] }
 0x230   : > { %v6773_v12 = vpop.f32.mrf.mxu1 }
 0x231   : > { %v5003_v56 = vpop.f32.mrf.mxu0 }
 0x232   : > { %v3369_v40 = vadd.f32 %v5003_v56, %v3203_v58  ;;  %v5021_v57 = vpop.f32.mrf.mxu1  ;;  %v6983_v58 = vld [vmem:[#allocation14_spill] sm:$0xff]  ;;  %v6985_v56 = vld [vmem:[#allocation19_spill] sm:$0xff] }
 0x233   : > { %v3304_v45 = vpop.f32.mrf.mxu0  ;;  %v3206_v44 = vadd.f32 %v6983_v58, %v3039_v17  ;;  %v6807_v60 = vadd.f32 %v6985_v56, %v3042_v32 }
 0x234   : > { %v3535_v8 = vadd.f32 %v5021_v57, %v3369_v40  ;;  %v3367_v51 = vadd.f32 %v3304_v45, %v3201_v59  ;;  %v3470_v28 = vpop.f32.mrf.mxu1  ;;  %v6810_v59 = vadd.f32 %v6986_v48, %v3045_v61 }
 0x235   : > { %v5004_v30 = vpop.f32.mrf.mxu0 }
 0x236   : > { %v4535_v43 = vpack.c.bf16 %v3535_v8, %v3535_v8  ;;  %v3533_v35 = vadd.f32 %v3470_v28, %v3367_v51  ;;  %v5022_v3 = vpop.f32.mrf.mxu1  ;;  %v3370_v25 = vadd.f32 %v5004_v30, %v3204_v50  ;;  %v3851_v23 = vmul.f32 %v3535_v8, %v3535_v8 }
 0x237   : > { %v3307_v16 = vpop.f32.mrf.mxu0  ;;  %v3812_v46 = vsel %vm3711_vm7, %v3535_v8, 0.0 }
 0x238   : > { %3696 = vst.msk [vmem:[%s5221_s7 + $0x8] sm:$0xf] %vm3613_vm6, %v4535_v43  ;;  %v4533_v5 = vpack.c.bf16 %v3533_v35, %v3533_v35  ;;  %v3473_v14 = vpop.f32.mrf.mxu1  ;;  %v3536_v15 = vadd.f32 %v5022_v3, %v3370_v25  ;;  %v3368_v10 = vadd.f32 %v3307_v16, %v3202_v6  ;;  %v3849_v39 = vmul.f32 %v3533_v35, %v3533_v35 }
 0x239   : > { %v5007_v4 = vpop.f32.mrf.mxu0  ;;  %v3809_v28 = vsel %vm3711_vm7, %v3533_v35, 0.0  ;;  %v3868_v7 = vsel %vm3711_vm7, %v3851_v23, 0.0 }
 0x23a   : > { %3694 = vst.msk [vmem:[%s5221_s7] sm:$0xf] %vm3613_vm6, %v4533_v5  ;;  %v3373_v40 = vadd.f32 %v5007_v4, %v3207_v49  ;;  %v5025_v57 = vpop.f32.mrf.mxu1  ;;  %v4536_v37 = vpack.c.bf16 %v3536_v15, %v3536_v15  ;;  %v3534_v27 = vadd.f32 %v3473_v14, %v3368_v10  ;;  %v3865_v22 = vsel %vm3711_vm7, %v3849_v39, 0.0 }
 0x23b   : > { %v3320_v45 = vpop.f32.mrf.mxu0  ;;  %v3852_v13 = vmul.f32 %v3536_v15, %v3536_v15  ;;  %v3814_v3 = vsel %vm3711_vm7, %v3536_v15, 0.0 }
 0x23c   : > { %v3539_v20 = vadd.f32 %v5025_v57, %v3373_v40  ;;  %v3371_v55 = vadd.f32 %v3320_v45, %v3205_v34  ;;  %v3486_v51 = vpop.f32.mrf.mxu1  ;;  %3697 = vst.msk [vmem:[%s5221_s7 + $0xc] sm:$0xf] %vm3613_vm6, %v4536_v37  ;;  %v4534_v11 = vpack.c.bf16 %v3534_v27, %v3534_v27  ;;  %v3810_v52 = vsel %vm3711_vm7, %v3534_v27, 0.0 }
 0x23d   : > { %v3850_v29 = vmul.f32 %v3534_v27, %v3534_v27  ;;  %v5008_v50 = vpop.f32.mrf.mxu0  ;;  %v3811_v6 = vadd.f32 %v3810_v52, %v3809_v28  ;;  %v3049_v57 = vadd.f32 %v6757_v33, %v6782_v19  ;;  %v3047_v19 = vadd.f32 %v6768_v53, %v6785_v24 }
 0x23e   : > { %v4539_v18 = vpack.c.bf16 %v3539_v20, %v3539_v20  ;;  %v5026_v17 = vpop.f32.mrf.mxu1  ;;  %3695 = vst.msk [vmem:[%s5221_s7 + $0x4] sm:$0xf] %vm3613_vm6, %v4534_v11  ;;  %v3537_v30 = vadd.f32 %v3486_v51, %v3371_v55  ;;  %v3374_v26 = vadd.f32 %v5008_v50, %v3208_v0  ;;  %v3870_v0 = vsel %vm3711_vm7, %v3852_v13, 0.0 }
 0x23f   : > { %v3866_v41 = vsel %vm3711_vm7, %v3850_v29, 0.0  ;;  %v3323_v32 = vpop.f32.mrf.mxu0  ;;  %v3813_v61 = vadd.f32 %v3812_v46, %v3811_v6  ;;  %v3855_v31 = vmul.f32 %v3539_v20, %v3539_v20  ;;  %v3820_v55 = vsel %vm3711_vm7, %v3539_v20, 0.0 }
 0x240   : > { %v3867_v43 = vadd.f32 %v3866_v41, %v3865_v22  ;;  %3700 = vst.msk [vmem:[%s5221_s7 + $0x18] sm:$0xf] %vm3613_vm6, %v4539_v18  ;;  %v3372_v8 = vadd.f32 %v3323_v32, %v3206_v44  ;;  %v3489_v35 = vpop.f32.mrf.mxu1  ;;  %v4537_v54 = vpack.c.bf16 %v3537_v30, %v3537_v30  ;;  %v3853_v49 = vmul.f32 %v3537_v30, %v3537_v30 }
 0x241   : > { %v3540_v1 = vadd.f32 %v5026_v17, %v3374_v26  ;;  %v5011_v38 = vpop.f32.mrf.mxu0  ;;  %v3815_v16 = vadd.f32 %v3814_v3, %v3813_v61  ;;  %v3816_v5 = vsel %vm3711_vm7, %v3537_v30, 0.0  ;;  %v3876_v22 = vsel %vm3711_vm7, %v3855_v31, 0.0 }
 0x242   : > { %v3869_v25 = vadd.f32 %v3868_v7, %v3867_v43  ;;  %v3538_v47 = vadd.f32 %v3489_v35, %v3372_v8  ;;  %v3377_v34 = vadd.f32 %v5011_v38, %v3211_v9  ;;  %v5029_v63 = vpop.f32.mrf.mxu1  ;;  %3698 = vst.msk [vmem:[%s5221_s7 + $0x10] sm:$0xf] %vm3613_vm6, %v4537_v54  ;;  %v3872_v56 = vsel %vm3711_vm7, %v3853_v49, 0.0 }
 0x243   : > { %v4540_v14 = vpack.c.bf16 %v3540_v1, %v3540_v1  ;;  %v3336_v58 = vpop.f32.mrf.mxu0  ;;  %v3817_v44 = vadd.f32 %v3816_v5, %v3815_v16  ;;  %v3856_v51 = vmul.f32 %v3540_v1, %v3540_v1  ;;  %v3216_v18 = vadd.f32 %v6762_v42, %v3049_v57 }
 0x244   : > { %v3871_v21 = vadd.f32 %v3870_v0, %v3869_v25  ;;  %v4538_v15 = vpack.c.bf16 %v3538_v47, %v3538_v47  ;;  %v3818_v10 = vsel %vm3711_vm7, %v3538_v47, 0.0  ;;  %v3502_v4 = vpop.f32.mrf.mxu1  ;;  %v3854_v9 = vmul.f32 %v3538_v47, %v3538_v47 }
 0x245   : > { %3701 = vst.msk [vmem:[%s5221_s7 + $0x1c] sm:$0xf] %vm3613_vm6, %v4540_v14  ;;  %v3543_v48 = vadd.f32 %v5029_v63, %v3377_v34  ;;  %v3375_v39 = vadd.f32 %v3336_v58, %v6807_v60  ;;  %v5012_v40 = vpop.f32.mrf.mxu0  ;;  %v3819_v27 = vadd.f32 %v3818_v10, %v3817_v44  ;;  %v3878_v26 = vsel %vm3711_vm7, %v3856_v51, 0.0 }
 0x246   : > { %v3873_v37 = vadd.f32 %v3872_v56, %v3871_v21  ;;  %3699 = vst.msk [vmem:[%s5221_s7 + $0x14] sm:$0xf] %vm3613_vm6, %v4538_v15  ;;  %v3378_v45 = vadd.f32 %v5012_v40, %v6810_v59  ;;  %v5030_v23 = vpop.f32.mrf.mxu1  ;;  %v3874_v28 = vsel %vm3711_vm7, %v3854_v9, 0.0  ;;  %v3822_v59 = vsel %vm3711_vm7, %v3540_v1, 0.0 }
 0x247   : > { %v4543_v11 = vpack.c.bf16 %v3543_v48, %v3543_v48  ;;  %v3339_v52 = vpop.f32.mrf.mxu0  ;;  %v3821_v60 = vadd.f32 %v3820_v55, %v3819_v27  ;;  %v3541_v50 = vadd.f32 %v3502_v4, %v3375_v39  ;;  %v3214_v35 = vadd.f32 %v6773_v12, %v3047_v19 }
 0x248   : > { %v3875_v29 = vadd.f32 %v3874_v28, %v3873_v37  ;;  %v3544_v46 = vadd.f32 %v5030_v23, %v3378_v45  ;;  %v3505_v33 = vpop.f32.mrf.mxu1  ;;  %v3376_v20 = vadd.f32 %v3339_v52, %v6815_v62  ;;  %v3859_v3 = vmul.f32 %v3543_v48, %v3543_v48 }
 0x249   : > { %3704 = vst.msk [vmem:[%s5221_s7 + $0x28] sm:$0xf] %vm3613_vm6, %v4543_v11  ;;  %v5015_v6 = vpop.f32.mrf.mxu0  ;;  %v4541_v13 = vpack.c.bf16 %v3541_v50, %v3541_v50  ;;  %v3823_v41 = vadd.f32 %v3822_v59, %v3821_v60  ;;  %v3824_v53 = vsel %vm3711_vm7, %v3541_v50, 0.0  ;;  %v3857_v24 = vmul.f32 %v3541_v50, %v3541_v50 }
 0x24a   : > { %v3877_v17 = vadd.f32 %v3876_v22, %v3875_v29  ;;  %v5033_v30 = vpop.f32.mrf.mxu1  ;;  %v4544_v32 = vpack.c.bf16 %v3544_v46, %v3544_v46  ;;  %v3542_v62 = vadd.f32 %v3505_v33, %v3376_v20  ;;  %v3381_v8 = vadd.f32 %v5015_v6, %v6818_v2 }
 0x24b   : > { %v3352_v7 = vpop.f32.mrf.mxu0  ;;  %3702 = vst.msk [vmem:[%s5221_s7 + $0x20] sm:$0xf] %vm3613_vm6, %v4541_v13  ;;  %v3825_v61 = vadd.f32 %v3824_v53, %v3823_v41  ;;  %v3880_v54 = vsel %vm3711_vm7, %v3857_v24, 0.0  ;;  %v3828_v5 = vsel %vm3711_vm7, %v3543_v48, 0.0  ;;  %v3860_v14 = vmul.f32 %v3544_v46, %v3544_v46 }
 0x24c   : > { %v3879_v43 = vadd.f32 %v3878_v26, %v3877_v17  ;;  %v3518_v42 = vpop.f32.mrf.mxu1  ;;  %3705 = vst.msk [vmem:[%s5221_s7 + $0x2c] sm:$0xf] %vm3613_vm6, %v4544_v32  ;;  %v3379_v49 = vadd.f32 %v3352_v7, %v6821_v36  ;;  %v4542_v25 = vpack.c.bf16 %v3542_v62, %v3542_v62  ;;  %v3826_v16 = vsel %vm3711_vm7, %v3542_v62, 0.0 }
 0x24d   : > { %v5016_v1 = vpop.f32.mrf.mxu0  ;;  %v3858_v47 = vmul.f32 %v3542_v62, %v3542_v62  ;;  %v3827_v63 = vadd.f32 %v3826_v16, %v3825_v61  ;;  %v3547_v2 = vadd.f32 %v5033_v30, %v3381_v8  ;;  %v3884_v10 = vsel %vm3711_vm7, %v3859_v3, 0.0 }
 0x24e   : > { %v3881_v38 = vadd.f32 %v3880_v54, %v3879_v43  ;;  %v5034_v34 = vpop.f32.mrf.mxu1  ;;  %v3545_v0 = vadd.f32 %v3518_v42, %v3379_v49  ;;  %v3382_v31 = vadd.f32 %v5016_v1, %v3216_v18  ;;  %3703 = vst.msk [vmem:[%s5221_s7 + $0x24] sm:$0xf] %vm3613_vm6, %v4542_v25  ;;  %v3830_v4 = vsel %vm3711_vm7, %v3544_v46, 0.0  ;;  %v3808_v42 = vld [vmem:[%s5211_s16 + $0x2] sm:$0x1] }
 0x24f   : > { %v3355_v12 = vpop.f32.mrf.mxu0  ;;  %v3882_v36 = vsel %vm3711_vm7, %v3858_v47, 0.0  ;;  %v3829_v44 = vadd.f32 %v3828_v5, %v3827_v63  ;;  %v4547_v15 = vpack.c.bf16 %v3547_v2, %v3547_v2  ;;  %v3886_v27 = vsel %vm3711_vm7, %v3860_v14, 0.0  ;;  %v3848_v54 = vld [vmem:[%s5211_s16 + $0x3] sm:$0x1] }
 0x250   : > { %v3380_v58 = vadd.f32 %v3355_v12, %v3214_v35  ;;  %v3883_v21 = vadd.f32 %v3882_v36, %v3881_v38  ;;  %v4545_v56 = vpack.c.bf16 %v3545_v0, %v3545_v0  ;;  %v3861_v9 = vmul.f32 %v3545_v0, %v3545_v0  ;;  %v3521_v39 = vpop.f32.mrf.mxu1 }
 0x251   : > { %3708 = vst.msk [vmem:[%s5221_s7 + $0x38] sm:$0xf] %vm3613_vm6, %v4547_v15  ;;  %v3831_v48 = vadd.f32 %v3830_v4, %v3829_v44  ;;  %v3548_v57 = vadd.f32 %v5034_v34, %v3382_v31  ;;  %v3832_v45 = vsel %vm3711_vm7, %v3545_v0, 0.0  ;;  %v3863_v23 = vmul.f32 %v3547_v2, %v3547_v2 }
 0x252   : > { %v3885_v40 = vadd.f32 %v3884_v10, %v3883_v21  ;;  %v3546_v37 = vadd.f32 %v3521_v39, %v3380_v58  ;;  %3706 = vst.msk [vmem:[%s5221_s7 + $0x30] sm:$0xf] %vm3613_vm6, %v4545_v56  ;;  %v3888_v11 = vsel %vm3711_vm7, %v3861_v9, 0.0  ;;  %v3836_v33 = vsel %vm3711_vm7, %v3547_v2, 0.0 }
 0x253   : > { %v3833_v55 = vadd.f32 %v3832_v45, %v3831_v48  ;;  %v4548_v28 = vpack.c.bf16 %v3548_v57, %v3548_v57  ;;  %v3864_v19 = vmul.f32 %v3548_v57, %v3548_v57  ;;  %v3892_v6 = vsel %vm3711_vm7, %v3863_v23, 0.0 }
 0x254   : > { %v3887_v51 = vadd.f32 %v3886_v27, %v3885_v40  ;;  %v4546_v52 = vpack.c.bf16 %v3546_v37, %v3546_v37  ;;  %v3834_v60 = vsel %vm3711_vm7, %v3546_v37, 0.0  ;;  %v3862_v29 = vmul.f32 %v3546_v37, %v3546_v37 }
 0x255   : > { %3709 = vst.msk [vmem:[%s5221_s7 + $0x3c] sm:$0xf] %vm3613_vm6, %v4548_v28  ;;  %v3835_v46 = vadd.f32 %v3834_v60, %v3833_v55  ;;  %v3838_v18 = vsel %vm3711_vm7, %v3548_v57, 0.0  ;;  %v3894_v41 = vsel %vm3711_vm7, %v3864_v19, 0.0 }
 0x256   : > { %v3889_v50 = vadd.f32 %v3888_v11, %v3887_v51  ;;  %3707 = vst.msk [vmem:[%s5221_s7 + $0x34] sm:$0xf] %vm3613_vm6, %v4546_v52  ;;  %v3890_v22 = vsel %vm3711_vm7, %v3862_v29, 0.0 }
 0x257   : > { %v3837_v59 = vadd.f32 %v3836_v33, %v3835_v46 }
 0x258   : > { %v3891_v20 = vadd.f32 %v3890_v22, %v3889_v50 }
 0x259   : > { %v3839_v17 = vadd.f32 %v3838_v18, %v3837_v59 }
 0x25a   : > { %v3893_v13 = vadd.f32 %v3892_v6, %v3891_v20 }
 0x25b   : > { %v3840_v30 = vrot.slane %v3839_v17, 4 }
 0x25c   : > { %v3895_v26 = vadd.f32 %v3894_v41, %v3893_v13 }
 0x25d   : > { %v3841_v53 = vadd.f32 %v3840_v30, %v3839_v17 }
 0x25e   : > { %v3896_v24 = vrot.slane %v3895_v26, 4 }
 0x25f   : > { %v3842_v32 = vrot.slane %v3841_v53, 2 }
 0x260   : > { %v3897_v7 = vadd.f32 %v3896_v24, %v3895_v26 }
 0x261   : > { %v3843_v61 = vadd.f32 %v3842_v32, %v3841_v53 }
 0x262   : > { %v3898_v43 = vrot.slane %v3897_v7, 2 }
 0x263   : > { %v3844_v62 = vrot.slane %v3843_v61, 1 }
 0x264   : > { %v3899_v8 = vadd.f32 %v3898_v43, %v3897_v7 }
 0x265   : > { %v3845_v35 = vadd.f32 %v3844_v62, %v3843_v61 }
 0x266   : > { %v3900_v3 = vrot.slane %v3899_v8, 1 }
 0x267   : > { %v3846_v49 = vadd.f32 %v3845_v35, %v3808_v42 }
 0x268   : > { %v3901_v1 = vadd.f32 %v3900_v3, %v3899_v8 }
 0x269   : > { %3847 = vst.msk [vmem:[%s5211_s16 + $0x2] sm:$0x1] %vm3750_vm8, %v3846_v49 }
 0x26a   : > { %v3902_v38 = vadd.f32 %v3901_v1, %v3848_v54 }
 0x26c   : > { %3903 = vst.msk [vmem:[%s5211_s16 + $0x3] sm:$0x1] %vm3750_vm8, %v3902_v38 }
 0x26d PF: > { %s17_s25 = sadd.s32 1, %s5132_s25   ;;  %s6987_s19 = sld [smem:[#allocation4_spill]] }
 0x26e   : > { %p14_p8 = scmp.ge.s32.totalorder %s17_s25, 6   ;;  %s6988_s21 = smov %s5124_s23 }
 0x26f   : > { %s6989_s22 = smov %s5128_s24  ;;  %s6990_s23 = smov %s6993_s26 }
 0x270   :  { %16 = sbr.rel (!%p14_p8) target bundleno = 3 (0x3), region = 120 }
 0x273   : > { %s6991_s24 = smov %s6987_s19 }

</bundles_post_ra>
